<compile_context>
chip_gen: v5e
topology: v5e:2x2
jax: 0.10.0
libtpu: 0.0.40
codegen_flags: <defaults>
</compile_context>

<pallas_src>
import functools

import jax
import jax.numpy as jnp
from jax.experimental import pallas as pl
from jax.experimental.pallas import tpu as pltpu

# ---- module hyper-parameters (small, consistent with the PyTorch __init__) ----
N, H, W = 2, 16, 16
IN_C, MID_C, OUT_C = 32, 32, 64
GROUP = 4          # mid_channel must be divisible by group
REDUCTION = 16     # out_channel // reduction = 4
STRIDE = 1
IS_SHORTCUT = True
BN_EPS = 1e-5
PAD_OFF = 8        # sublane-aligned interior offset inside the padded VMEM scratch


# ----------------------------- fused Pallas kernel -----------------------------

def _senext_bottleneck_kernel(
    x_ref,        # (H, W, IN_C)             one image
    w1sc_ref,     # (IN_C, MID_C+OUT_C)      conv1 + shortcut 1x1, BN scale folded
    w2_ref,       # (9*MID_C, MID_C)         grouped 3x3 taps (block-diag), scale folded
    w3_ref,       # (MID_C, OUT_C)           conv3 1x1, scale folded
    bias_ref,     # (4, 128)                 rows: b1sc | b2 | b3 | se_b2
    se_ref,       # (3*CR, OUT_C)            rows: se_w1 | se_w2 | se_b1 (col 0)
    o_ref,        # (HW//2, 2*OUT_C)         lane-dense packed output
    xpad_ref,     # VMEM scratch (H+2, 2*PAD_OFF+W, MID_C)
    *, h, w, mid_c, out_c, cr, pad_off):
  hw = h * w
  in_c = x_ref.shape[-1]
  wpad = 2 * pad_off + w

  # ---- packed per-channel biases (single 1-vreg load, value slices) ----
  bias = bias_ref[...]
  b1sc = bias[0:1, 0:mid_c + out_c]
  b2 = bias[1:2, 0:mid_c]
  b3 = bias[2:3, 0:out_c]
  seb2 = bias[3:4, 0:out_c]

  # ---- conv_bn1 (1x1) and shortcut conv_bn (1x1): one matmul, shared LHS ----
  x2d = x_ref[...].reshape(hw, in_c)
  y = jnp.dot(x2d, w1sc_ref[...], preferred_element_type=jnp.float32) + b1sc
  h1 = jnp.maximum(y[:, :mid_c], 0.0)     # branch activation (ReLU)
  res = y[:, mid_c:]                      # shortcut path (BN only, no ReLU)

  # ---- conv_bn2: 3x3 grouped conv. Zero only the halo strips (interior is fully
  #      overwritten each grid step), then 9 accumulated MXU dots on shifted slices.
  xpad_ref[pl.ds(0, 1), :, :] = jnp.zeros((1, wpad, mid_c), jnp.float32)
  xpad_ref[pl.ds(h + 1, 1), :, :] = jnp.zeros((1, wpad, mid_c), jnp.float32)
  xpad_ref[pl.ds(1, h), pl.ds(0, pad_off), :] = jnp.zeros((h, pad_off, mid_c),
                                                          jnp.float32)
  xpad_ref[pl.ds(1, h), pl.ds(pad_off + w, pad_off), :] = jnp.zeros(
      (h, pad_off, mid_c), jnp.float32)
  xpad_ref[pl.ds(1, h), pl.ds(pad_off, w), :] = h1.reshape(h, w, mid_c)

  h2 = None
  for dy in range(3):
    for dx in range(3):
      t = dy * 3 + dx
      p = xpad_ref[pl.ds(dy, h), pl.ds(pad_off - 1 + dx, w), :].reshape(hw, mid_c)
      wtap = w2_ref[pl.ds(t * mid_c, mid_c), :]
      d = jnp.dot(p, wtap, preferred_element_type=jnp.float32)
      h2 = d if h2 is None else h2 + d
  h2 = jnp.maximum(h2 + b2, 0.0)

  # ---- conv_bn3 (1x1), no ReLU ----
  h3 = jnp.dot(h2, w3_ref[...], preferred_element_type=jnp.float32) + b3

  # ---- SE block (additive gating, exactly as the PyTorch module) ----
  # Tiny FCs on the VPU/XLU (broadcast-multiply + reduce); sigmoid on the EUP.
  pooled = jnp.mean(h3, axis=0, keepdims=True)                    # (1, out_c)
  base = h3 + res          # fold shortcut in early -> frees `res` before SE math

  se_all = se_ref[...]
  sew1 = se_all[0:cr, :]
  sew2 = se_all[cr:2 * cr, :]
  seb1 = se_all[2 * cr:3 * cr, 0:1]
  se = jnp.sum(pooled * sew1, axis=1, keepdims=True) + seb1       # (cr, 1)
  se = jnp.maximum(se, 0.0)
  gate = jnp.sum(se * sew2, axis=0, keepdims=True) + seb2         # (1, out_c)
  gate = 1.0 / (1.0 + jnp.exp(-gate))                             # sigmoid

  out = jnp.maximum(base + gate, 0.0)                             # (hw, out_c)

  # ---- lane-dense output: pack two row-halves side by side -> (hw/2, 2*out_c) ----
  dense = jnp.concatenate([out[:hw // 2, :], out[hw // 2:, :]], axis=1)
  o_ref[...] = dense.astype(o_ref.dtype)


# ----------------------------- glue / parameters ------------------------------

def fold_bn(gamma, beta, mean, var, eps=BN_EPS):
  scale = gamma / jnp.sqrt(var + eps)
  bias = beta - mean * scale
  return scale, bias


def expand_grouped_weight(w, groups):
  """PyTorch grouped weight (Cout, Cin/groups, 3, 3) -> block-diagonal (3,3,Cin,Cout)."""
  cout, cpg, kh, kw = w.shape
  full = jnp.zeros((kh, kw, cout, cout), jnp.float32)
  for g in range(groups):
    blk = w[g * cpg:(g + 1) * cpg]             # (cpg_out, cpg_in, 3, 3)
    blk = jnp.transpose(blk, (2, 3, 1, 0))     # (3, 3, cpg_in, cpg_out)
    full = full.at[:, :, g * cpg:(g + 1) * cpg, g * cpg:(g + 1) * cpg].set(blk)
  return full


def init_params(key):
  ks = jax.random.split(key, 12)

  def w(k, shape):
    return 0.1 * jax.random.normal(k, shape, jnp.float32)

  def bn(k, c):
    k1, k2, k3, k4 = jax.random.split(k, 4)
    return (1.0 + 0.1 * jax.random.normal(k1, (c,), jnp.float32),
            0.1 * jax.random.normal(k2, (c,), jnp.float32),
            0.1 * jax.random.normal(k3, (c,), jnp.float32),
            0.5 + jax.random.uniform(k4, (c,), jnp.float32))

  cr = OUT_C // REDUCTION
  return {
      "w1": w(ks[0], (MID_C, IN_C, 1, 1)), "bn1": bn(ks[1], MID_C),
      "w2": w(ks[2], (MID_C, MID_C // GROUP, 3, 3)), "bn2": bn(ks[3], MID_C),
      "w3": w(ks[4], (OUT_C, MID_C, 1, 1)), "bn3": bn(ks[5], OUT_C),
      "se_w1": w(ks[6], (cr, OUT_C, 1, 1)), "se_b1": w(ks[7], (cr,)),
      "se_w2": w(ks[8], (OUT_C, cr, 1, 1)), "se_b2": w(ks[9], (OUT_C,)),
      "wsc": w(ks[10], (OUT_C, IN_C, 1, 1)), "bnsc": bn(ks[11], OUT_C),
  }


def pallas_forward(x_nchw, p):
  assert STRIDE == 1 and IS_SHORTCUT  # fused kernel covers the configured case
  n, cin, h, w = x_nchw.shape
  hw = h * w
  assert hw % 2 == 0 and 2 * OUT_C == 128  # lane-dense output packing assumption
  cr = OUT_C // REDUCTION
  x = jnp.transpose(x_nchw, (0, 2, 3, 1))                      # NCHW -> NHWC

  # ---- fold BN into scale/bias; fold the scales into the conv weights ----
  s1, b1 = fold_bn(*p["bn1"])
  s2, b2 = fold_bn(*p["bn2"])
  s3, b3 = fold_bn(*p["bn3"])
  ssc, bsc = fold_bn(*p["bnsc"])

  w1 = p["w1"][:, :, 0, 0].T * s1[None, :]                     # (IN_C, MID_C)
  wsc = p["wsc"][:, :, 0, 0].T * ssc[None, :]                  # (IN_C, OUT_C)
  w1sc = jnp.concatenate([w1, wsc], axis=1)                    # (IN_C, MID_C+OUT_C)
  b1sc = jnp.concatenate([b1, bsc])                            # (MID_C+OUT_C,)

  w2full = expand_grouped_weight(p["w2"], GROUP) * s2[None, None, None, :]
  w2col = w2full.reshape(9 * MID_C, MID_C)                     # tap-major rows

  w3 = p["w3"][:, :, 0, 0].T * s3[None, :]                     # (MID_C, OUT_C)

  sew1 = p["se_w1"][:, :, 0, 0]                                # (CR, OUT_C)
  sew2 = p["se_w2"][:, :, 0, 0].T                              # (CR, OUT_C)

  # ---- pack all remaining small vectors into two refs ----
  bias_pack = jnp.zeros((4, 128), jnp.float32)
  bias_pack = bias_pack.at[0, :MID_C + OUT_C].set(b1sc)
  bias_pack = bias_pack.at[1, :MID_C].set(b2)
  bias_pack = bias_pack.at[2, :OUT_C].set(b3)
  bias_pack = bias_pack.at[3, :OUT_C].set(p["se_b2"])

  se_pack = jnp.zeros((3 * cr, OUT_C), jnp.float32)
  se_pack = se_pack.at[:cr].set(sew1)
  se_pack = se_pack.at[cr:2 * cr].set(sew2)
  se_pack = se_pack.at[2 * cr:, 0].set(p["se_b1"])

  kernel = functools.partial(_senext_bottleneck_kernel, h=h, w=w, mid_c=MID_C,
                             out_c=OUT_C, cr=cr, pad_off=PAD_OFF)
  wmap = lambda i: (0, 0)
  out = pl.pallas_call(
      kernel,
      out_shape=jax.ShapeDtypeStruct((n, hw // 2, 2 * OUT_C), jnp.float32),
      grid_spec=pltpu.PrefetchScalarGridSpec(
          num_scalar_prefetch=0,
          grid=(n,),
          in_specs=[
              pl.BlockSpec((None, h, w, cin), lambda i: (i, 0, 0, 0)),
              pl.BlockSpec((cin, MID_C + OUT_C), wmap),
              pl.BlockSpec((9 * MID_C, MID_C), wmap),
              pl.BlockSpec((MID_C, OUT_C), wmap),
              pl.BlockSpec((4, 128), wmap),
              pl.BlockSpec((3 * cr, OUT_C), wmap),
          ],
          out_specs=pl.BlockSpec((None, hw // 2, 2 * OUT_C), lambda i: (i, 0, 0)),
          scratch_shapes=[pltpu.VMEM((h + 2, 2 * PAD_OFF + w, MID_C), jnp.float32)],
      ),
      compiler_params=pltpu.CompilerParams(dimension_semantics=("parallel",)),
  )(x, w1sc, w2col, w3, bias_pack, se_pack)

  # unpack lane-dense slab: (n, hw/2, 2*OUT_C) -> (n, hw, OUT_C) -> NCHW
  out = jnp.concatenate([out[:, :, :OUT_C], out[:, :, OUT_C:]], axis=1)
  out = out.reshape(n, h, w, OUT_C)
  return jnp.transpose(out, (0, 3, 1, 2))                      # NHWC -> NCHW


# ----------------------------- pure-JAX reference -----------------------------

def ref_forward(x_nchw, p):
  def conv(x, w, stride=1, padding=0, groups=1):
    return jax.lax.conv_general_dilated(
        x, w, (stride, stride), [(padding, padding), (padding, padding)],
        dimension_numbers=("NCHW", "OIHW", "NCHW"),
        feature_group_count=groups)

  def bn(x, prm):
    g, b, m, v = prm
    inv = g / jnp.sqrt(v + BN_EPS)
    return x * inv[None, :, None, None] + (b - m * inv)[None, :, None, None]

  h = jax.nn.relu(bn(conv(x_nchw, p["w1"]), p["bn1"]))
  h = jax.nn.relu(bn(conv(h, p["w2"], stride=STRIDE, padding=1, groups=GROUP), p["bn2"]))
  h = bn(conv(h, p["w3"]), p["bn3"])
  se = jnp.mean(h, axis=(2, 3), keepdims=True)
  se = conv(se, p["se_w1"]) + p["se_b1"][None, :, None, None]
  se = jax.nn.relu(se)
  se = conv(se, p["se_w2"]) + p["se_b2"][None, :, None, None]
  h = h + jax.nn.sigmoid(se)
  if IS_SHORTCUT:
    res = bn(conv(x_nchw, p["wsc"], stride=STRIDE), p["bnsc"])
  else:
    res = x_nchw
  return jax.nn.relu(h + res)


# ----------------------------------- main --------------------------------------

if __name__ == "__main__":
  key = jax.random.PRNGKey(0)
  kx, kp = jax.random.split(key)
  params = init_params(kp)
  x = jax.random.normal(kx, (N, IN_C, H, W), jnp.float32)      # NCHW like PyTorch

  out = pallas_forward(x, params)
  out = jax.block_until_ready(out)

  ref = ref_forward(x, params)
  assert out.shape == ref.shape, (out.shape, ref.shape)
  max_err = float(jnp.max(jnp.abs(out - ref)))
  assert jnp.allclose(out, ref, rtol=1e-3, atol=1e-3), f"max abs err {max_err}"

  print("KERNEL_OK")
</pallas_src>

<mosaic_0001>
module attributes {stable_mosaic.version = 11 : i64} {
  func.func @_senext_bottleneck_kernel(%arg0: i32, %arg1: memref<1x16x16x32xf32, #tpu.memory_space<vmem>>, %arg2: memref<32x96xf32, #tpu.memory_space<vmem>>, %arg3: memref<288x32xf32, #tpu.memory_space<vmem>>, %arg4: memref<32x64xf32, #tpu.memory_space<vmem>>, %arg5: memref<4x128xf32, #tpu.memory_space<vmem>>, %arg6: memref<12x64xf32, #tpu.memory_space<vmem>>, %arg7: memref<1x128x128xf32, #tpu.memory_space<vmem>>, %arg8: memref<18x32x32xf32, #tpu.memory_space<vmem>>) attributes {dimension_semantics = [#tpu.dimension_semantics<parallel>], iteration_bounds = array<i64: 2>, scalar_prefetch = 0 : i64, scratch_operands = 1 : i64, tpu.core_type = #tpu.core_type<tc>, window_params = [{transform_indices = @transform_0, window_bounds = array<i64: 1, 16, 16, 32>}, {pipeline_mode = #tpu.pipeline_mode<synchronous>, transform_indices = @transform_1, window_bounds = array<i64: 32, 96>}, {pipeline_mode = #tpu.pipeline_mode<synchronous>, transform_indices = @transform_2, window_bounds = array<i64: 288, 32>}, {pipeline_mode = #tpu.pipeline_mode<synchronous>, transform_indices = @transform_3, window_bounds = array<i64: 32, 64>}, {pipeline_mode = #tpu.pipeline_mode<synchronous>, transform_indices = @transform_4, window_bounds = array<i64: 4, 128>}, {pipeline_mode = #tpu.pipeline_mode<synchronous>, transform_indices = @transform_5, window_bounds = array<i64: 12, 64>}, {transform_indices = @transform_6, window_bounds = array<i64: 1, 128, 128>}]} {
    %c0 = arith.constant 0 : index
    %c0_0 = arith.constant 0 : index
    %0 = vector.load %arg5[%c0, %c0_0] : memref<4x128xf32, #tpu.memory_space<vmem>>, vector<4x128xf32>
    %1 = vector.extract_strided_slice %0 {offsets = [0, 0], sizes = [1, 96], strides = [1, 1]} : vector<4x128xf32> to vector<1x96xf32>
    %2 = vector.extract_strided_slice %0 {offsets = [1, 0], sizes = [1, 32], strides = [1, 1]} : vector<4x128xf32> to vector<1x32xf32>
    %3 = vector.extract_strided_slice %0 {offsets = [2, 0], sizes = [1, 64], strides = [1, 1]} : vector<4x128xf32> to vector<1x64xf32>
    %4 = vector.extract_strided_slice %0 {offsets = [3, 0], sizes = [1, 64], strides = [1, 1]} : vector<4x128xf32> to vector<1x64xf32>
    %c0_1 = arith.constant 0 : index
    %c0_2 = arith.constant 0 : index
    %c0_3 = arith.constant 0 : index
    %c0_4 = arith.constant 0 : index
    %5 = vector.load %arg1[%c0_1, %c0_2, %c0_3, %c0_4] : memref<1x16x16x32xf32, #tpu.memory_space<vmem>>, vector<1x16x16x32xf32>
    %6 = vector.shape_cast %5 : vector<1x16x16x32xf32> to vector<16x16x32xf32>
    %7 = vector.shape_cast %6 : vector<16x16x32xf32> to vector<256x32xf32>
    %c0_5 = arith.constant 0 : index
    %c0_6 = arith.constant 0 : index
    %8 = vector.load %arg2[%c0_5, %c0_6] : memref<32x96xf32, #tpu.memory_space<vmem>>, vector<32x96xf32>
    %cst = arith.constant dense<0.000000e+00> : vector<256x96xf32>
    %9 = tpu.matmul %7, %8, %cst {dimension_numbers = #tpu.dot_dimension_numbers<[1], [0], [0], [1], [0, 0, 1, 1], [], []>} : vector<256x32xf32>, vector<32x96xf32>, vector<256x96xf32> -> vector<256x96xf32>
    %10 = vector.broadcast %1 : vector<1x96xf32> to vector<256x96xf32>
    %11 = arith.addf %9, %10 : vector<256x96xf32>
    %12 = vector.extract_strided_slice %11 {offsets = [0, 0], sizes = [256, 32], strides = [1, 1]} : vector<256x96xf32> to vector<256x32xf32>
    %cst_7 = arith.constant 0.000000e+00 : f32
    %13 = vector.broadcast %cst_7 : f32 to vector<256x32xf32>
    %14 = arith.maximumf %12, %13 : vector<256x32xf32>
    %15 = vector.extract_strided_slice %11 {offsets = [0, 32], sizes = [256, 64], strides = [1, 1]} : vector<256x96xf32> to vector<256x64xf32>
    %cst_8 = arith.constant 0.000000e+00 : f32
    %16 = vector.broadcast %cst_8 : f32 to vector<1x32x32xf32>
    %c0_9 = arith.constant 0 : index
    %c0_10 = arith.constant 0 : index
    %c0_11 = arith.constant 0 : index
    %17 = vector.load %arg8[%c0_9, %c0_10, %c0_11] : memref<18x32x32xf32, #tpu.memory_space<vmem>>, vector<1x32x32xf32>
    tpu.vector_store %arg8[%c0_9, %c0_10, %c0_11], %16 {strides = array<i32>} : memref<18x32x32xf32, #tpu.memory_space<vmem>>, vector<1x32x32xf32>,
    %cst_12 = arith.constant 0.000000e+00 : f32
    %18 = vector.broadcast %cst_12 : f32 to vector<1x32x32xf32>
    %c17 = arith.constant 17 : index
    %c0_13 = arith.constant 0 : index
    %c0_14 = arith.constant 0 : index
    %19 = vector.load %arg8[%c17, %c0_13, %c0_14] : memref<18x32x32xf32, #tpu.memory_space<vmem>>, vector<1x32x32xf32>
    tpu.vector_store %arg8[%c17, %c0_13, %c0_14], %18 {strides = array<i32>} : memref<18x32x32xf32, #tpu.memory_space<vmem>>, vector<1x32x32xf32>,
    %cst_15 = arith.constant 0.000000e+00 : f32
    %20 = vector.broadcast %cst_15 : f32 to vector<16x8x32xf32>
    %c1 = arith.constant 1 : index
    %c0_16 = arith.constant 0 : index
    %c0_17 = arith.constant 0 : index
    %21 = vector.load %arg8[%c1, %c0_16, %c0_17] : memref<18x32x32xf32, #tpu.memory_space<vmem>>, vector<16x8x32xf32>
    tpu.vector_store %arg8[%c1, %c0_16, %c0_17], %20 {strides = array<i32>} : memref<18x32x32xf32, #tpu.memory_space<vmem>>, vector<16x8x32xf32>,
    %cst_18 = arith.constant 0.000000e+00 : f32
    %22 = vector.broadcast %cst_18 : f32 to vector<16x8x32xf32>
    %c1_19 = arith.constant 1 : index
    %c24 = arith.constant 24 : index
    %c0_20 = arith.constant 0 : index
    %23 = vector.load %arg8[%c1_19, %c24, %c0_20] : memref<18x32x32xf32, #tpu.memory_space<vmem>>, vector<16x8x32xf32>
    tpu.vector_store %arg8[%c1_19, %c24, %c0_20], %22 {strides = array<i32>} : memref<18x32x32xf32, #tpu.memory_space<vmem>>, vector<16x8x32xf32>,
    %24 = vector.shape_cast %14 : vector<256x32xf32> to vector<16x16x32xf32>
    %c1_21 = arith.constant 1 : index
    %c8 = arith.constant 8 : index
    %c0_22 = arith.constant 0 : index
    %25 = vector.load %arg8[%c1_21, %c8, %c0_22] : memref<18x32x32xf32, #tpu.memory_space<vmem>>, vector<16x16x32xf32>
    tpu.vector_store %arg8[%c1_21, %c8, %c0_22], %24 {strides = array<i32>} : memref<18x32x32xf32, #tpu.memory_space<vmem>>, vector<16x16x32xf32>,
    %c0_23 = arith.constant 0 : index
    %c7 = arith.constant 7 : index
    %c0_24 = arith.constant 0 : index
    %26 = vector.load %arg8[%c0_23, %c7, %c0_24] : memref<18x32x32xf32, #tpu.memory_space<vmem>>, vector<16x16x32xf32>
    %27 = vector.shape_cast %26 : vector<16x16x32xf32> to vector<256x32xf32>
    %c0_25 = arith.constant 0 : index
    %c0_26 = arith.constant 0 : index
    %28 = vector.load %arg3[%c0_25, %c0_26] : memref<288x32xf32, #tpu.memory_space<vmem>>, vector<32x32xf32>
    %cst_27 = arith.constant dense<0.000000e+00> : vector<256x32xf32>
    %29 = tpu.matmul %27, %28, %cst_27 {dimension_numbers = #tpu.dot_dimension_numbers<[1], [0], [0], [1], [0, 0, 1, 1], [], []>} : vector<256x32xf32>, vector<32x32xf32>, vector<256x32xf32> -> vector<256x32xf32>
    %c0_28 = arith.constant 0 : index
    %c8_29 = arith.constant 8 : index
    %c0_30 = arith.constant 0 : index
    %30 = vector.load %arg8[%c0_28, %c8_29, %c0_30] : memref<18x32x32xf32, #tpu.memory_space<vmem>>, vector<16x16x32xf32>
    %31 = vector.shape_cast %30 : vector<16x16x32xf32> to vector<256x32xf32>
    %c32 = arith.constant 32 : index
    %c0_31 = arith.constant 0 : index
    %32 = vector.load %arg3[%c32, %c0_31] : memref<288x32xf32, #tpu.memory_space<vmem>>, vector<32x32xf32>
    %cst_32 = arith.constant dense<0.000000e+00> : vector<256x32xf32>
    %33 = tpu.matmul %31, %32, %cst_32 {dimension_numbers = #tpu.dot_dimension_numbers<[1], [0], [0], [1], [0, 0, 1, 1], [], []>} : vector<256x32xf32>, vector<32x32xf32>, vector<256x32xf32> -> vector<256x32xf32>
    %34 = arith.addf %29, %33 : vector<256x32xf32>
    %c0_33 = arith.constant 0 : index
    %c9 = arith.constant 9 : index
    %c0_34 = arith.constant 0 : index
    %35 = vector.load %arg8[%c0_33, %c9, %c0_34] : memref<18x32x32xf32, #tpu.memory_space<vmem>>, vector<16x16x32xf32>
    %36 = vector.shape_cast %35 : vector<16x16x32xf32> to vector<256x32xf32>
    %c64 = arith.constant 64 : index
    %c0_35 = arith.constant 0 : index
    %37 = vector.load %arg3[%c64, %c0_35] : memref<288x32xf32, #tpu.memory_space<vmem>>, vector<32x32xf32>
    %cst_36 = arith.constant dense<0.000000e+00> : vector<256x32xf32>
    %38 = tpu.matmul %36, %37, %cst_36 {dimension_numbers = #tpu.dot_dimension_numbers<[1], [0], [0], [1], [0, 0, 1, 1], [], []>} : vector<256x32xf32>, vector<32x32xf32>, vector<256x32xf32> -> vector<256x32xf32>
    %39 = arith.addf %34, %38 : vector<256x32xf32>
    %c1_37 = arith.constant 1 : index
    %c7_38 = arith.constant 7 : index
    %c0_39 = arith.constant 0 : index
    %40 = vector.load %arg8[%c1_37, %c7_38, %c0_39] : memref<18x32x32xf32, #tpu.memory_space<vmem>>, vector<16x16x32xf32>
    %41 = vector.shape_cast %40 : vector<16x16x32xf32> to vector<256x32xf32>
    %c96 = arith.constant 96 : index
    %c0_40 = arith.constant 0 : index
    %42 = vector.load %arg3[%c96, %c0_40] : memref<288x32xf32, #tpu.memory_space<vmem>>, vector<32x32xf32>
    %cst_41 = arith.constant dense<0.000000e+00> : vector<256x32xf32>
    %43 = tpu.matmul %41, %42, %cst_41 {dimension_numbers = #tpu.dot_dimension_numbers<[1], [0], [0], [1], [0, 0, 1, 1], [], []>} : vector<256x32xf32>, vector<32x32xf32>, vector<256x32xf32> -> vector<256x32xf32>
    %44 = arith.addf %39, %43 : vector<256x32xf32>
    %c1_42 = arith.constant 1 : index
    %c8_43 = arith.constant 8 : index
    %c0_44 = arith.constant 0 : index
    %45 = vector.load %arg8[%c1_42, %c8_43, %c0_44] : memref<18x32x32xf32, #tpu.memory_space<vmem>>, vector<16x16x32xf32>
    %46 = vector.shape_cast %45 : vector<16x16x32xf32> to vector<256x32xf32>
    %c128 = arith.constant 128 : index
    %c0_45 = arith.constant 0 : index
    %47 = vector.load %arg3[%c128, %c0_45] : memref<288x32xf32, #tpu.memory_space<vmem>>, vector<32x32xf32>
    %cst_46 = arith.constant dense<0.000000e+00> : vector<256x32xf32>
    %48 = tpu.matmul %46, %47, %cst_46 {dimension_numbers = #tpu.dot_dimension_numbers<[1], [0], [0], [1], [0, 0, 1, 1], [], []>} : vector<256x32xf32>, vector<32x32xf32>, vector<256x32xf32> -> vector<256x32xf32>
    %49 = arith.addf %44, %48 : vector<256x32xf32>
    %c1_47 = arith.constant 1 : index
    %c9_48 = arith.constant 9 : index
    %c0_49 = arith.constant 0 : index
    %50 = vector.load %arg8[%c1_47, %c9_48, %c0_49] : memref<18x32x32xf32, #tpu.memory_space<vmem>>, vector<16x16x32xf32>
    %51 = vector.shape_cast %50 : vector<16x16x32xf32> to vector<256x32xf32>
    %c160 = arith.constant 160 : index
    %c0_50 = arith.constant 0 : index
    %52 = vector.load %arg3[%c160, %c0_50] : memref<288x32xf32, #tpu.memory_space<vmem>>, vector<32x32xf32>
    %cst_51 = arith.constant dense<0.000000e+00> : vector<256x32xf32>
    %53 = tpu.matmul %51, %52, %cst_51 {dimension_numbers = #tpu.dot_dimension_numbers<[1], [0], [0], [1], [0, 0, 1, 1], [], []>} : vector<256x32xf32>, vector<32x32xf32>, vector<256x32xf32> -> vector<256x32xf32>
    %54 = arith.addf %49, %53 : vector<256x32xf32>
    %c2 = arith.constant 2 : index
    %c7_52 = arith.constant 7 : index
    %c0_53 = arith.constant 0 : index
    %55 = vector.load %arg8[%c2, %c7_52, %c0_53] : memref<18x32x32xf32, #tpu.memory_space<vmem>>, vector<16x16x32xf32>
    %56 = vector.shape_cast %55 : vector<16x16x32xf32> to vector<256x32xf32>
    %c192 = arith.constant 192 : index
    %c0_54 = arith.constant 0 : index
    %57 = vector.load %arg3[%c192, %c0_54] : memref<288x32xf32, #tpu.memory_space<vmem>>, vector<32x32xf32>
    %cst_55 = arith.constant dense<0.000000e+00> : vector<256x32xf32>
    %58 = tpu.matmul %56, %57, %cst_55 {dimension_numbers = #tpu.dot_dimension_numbers<[1], [0], [0], [1], [0, 0, 1, 1], [], []>} : vector<256x32xf32>, vector<32x32xf32>, vector<256x32xf32> -> vector<256x32xf32>
    %59 = arith.addf %54, %58 : vector<256x32xf32>
    %c2_56 = arith.constant 2 : index
    %c8_57 = arith.constant 8 : index
    %c0_58 = arith.constant 0 : index
    %60 = vector.load %arg8[%c2_56, %c8_57, %c0_58] : memref<18x32x32xf32, #tpu.memory_space<vmem>>, vector<16x16x32xf32>
    %61 = vector.shape_cast %60 : vector<16x16x32xf32> to vector<256x32xf32>
    %c224 = arith.constant 224 : index
    %c0_59 = arith.constant 0 : index
    %62 = vector.load %arg3[%c224, %c0_59] : memref<288x32xf32, #tpu.memory_space<vmem>>, vector<32x32xf32>
    %cst_60 = arith.constant dense<0.000000e+00> : vector<256x32xf32>
    %63 = tpu.matmul %61, %62, %cst_60 {dimension_numbers = #tpu.dot_dimension_numbers<[1], [0], [0], [1], [0, 0, 1, 1], [], []>} : vector<256x32xf32>, vector<32x32xf32>, vector<256x32xf32> -> vector<256x32xf32>
    %64 = arith.addf %59, %63 : vector<256x32xf32>
    %c2_61 = arith.constant 2 : index
    %c9_62 = arith.constant 9 : index
    %c0_63 = arith.constant 0 : index
    %65 = vector.load %arg8[%c2_61, %c9_62, %c0_63] : memref<18x32x32xf32, #tpu.memory_space<vmem>>, vector<16x16x32xf32>
    %66 = vector.shape_cast %65 : vector<16x16x32xf32> to vector<256x32xf32>
    %c256 = arith.constant 256 : index
    %c0_64 = arith.constant 0 : index
    %67 = vector.load %arg3[%c256, %c0_64] : memref<288x32xf32, #tpu.memory_space<vmem>>, vector<32x32xf32>
    %cst_65 = arith.constant dense<0.000000e+00> : vector<256x32xf32>
    %68 = tpu.matmul %66, %67, %cst_65 {dimension_numbers = #tpu.dot_dimension_numbers<[1], [0], [0], [1], [0, 0, 1, 1], [], []>} : vector<256x32xf32>, vector<32x32xf32>, vector<256x32xf32> -> vector<256x32xf32>
    %69 = arith.addf %64, %68 : vector<256x32xf32>
    %70 = vector.broadcast %2 : vector<1x32xf32> to vector<256x32xf32>
    %71 = arith.addf %69, %70 : vector<256x32xf32>
    %cst_66 = arith.constant 0.000000e+00 : f32
    %72 = vector.broadcast %cst_66 : f32 to vector<256x32xf32>
    %73 = arith.maximumf %71, %72 : vector<256x32xf32>
    %c0_67 = arith.constant 0 : index
    %c0_68 = arith.constant 0 : index
    %74 = vector.load %arg4[%c0_67, %c0_68] : memref<32x64xf32, #tpu.memory_space<vmem>>, vector<32x64xf32>
    %cst_69 = arith.constant dense<0.000000e+00> : vector<256x64xf32>
    %75 = tpu.matmul %73, %74, %cst_69 {dimension_numbers = #tpu.dot_dimension_numbers<[1], [0], [0], [1], [0, 0, 1, 1], [], []>} : vector<256x32xf32>, vector<32x64xf32>, vector<256x64xf32> -> vector<256x64xf32>
    %76 = vector.broadcast %3 : vector<1x64xf32> to vector<256x64xf32>
    %77 = arith.addf %75, %76 : vector<256x64xf32>
    %cst_70 = arith.constant dense<0.000000e+00> : vector<64xf32>
    %78 = vector.multi_reduction <add>, %77, %cst_70 [0] : vector<256x64xf32> to vector<64xf32>
    %79 = vector.shape_cast %78 : vector<64xf32> to vector<1x64xf32>
    %cst_71 = arith.constant 2.560000e+02 : f32
    %80 = vector.broadcast %cst_71 : f32 to vector<1x64xf32>
    %81 = arith.divf %79, %80 : vector<1x64xf32>
    %82 = arith.addf %77, %15 : vector<256x64xf32>
    %c0_72 = arith.constant 0 : index
    %c0_73 = arith.constant 0 : index
    %83 = vector.load %arg6[%c0_72, %c0_73] : memref<12x64xf32, #tpu.memory_space<vmem>>, vector<12x64xf32>
    %84 = vector.extract_strided_slice %83 {offsets = [0, 0], sizes = [4, 64], strides = [1, 1]} : vector<12x64xf32> to vector<4x64xf32>
    %85 = vector.extract_strided_slice %83 {offsets = [4, 0], sizes = [4, 64], strides = [1, 1]} : vector<12x64xf32> to vector<4x64xf32>
    %86 = vector.extract_strided_slice %83 {offsets = [8, 0], sizes = [4, 1], strides = [1, 1]} : vector<12x64xf32> to vector<4x1xf32>
    %87 = vector.broadcast %81 : vector<1x64xf32> to vector<4x64xf32>
    %88 = arith.mulf %87, %84 : vector<4x64xf32>
    %cst_74 = arith.constant dense<0.000000e+00> : vector<4xf32>
    %89 = vector.multi_reduction <add>, %88, %cst_74 [1] : vector<4x64xf32> to vector<4xf32>
    %90 = vector.shape_cast %89 : vector<4xf32> to vector<4x1xf32>
    %91 = arith.addf %90, %86 : vector<4x1xf32>
    %cst_75 = arith.constant 0.000000e+00 : f32
    %92 = vector.broadcast %cst_75 : f32 to vector<4x1xf32>
    %93 = arith.maximumf %91, %92 : vector<4x1xf32>
    %94 = vector.broadcast %93 : vector<4x1xf32> to vector<4x64xf32>
    %95 = arith.mulf %94, %85 : vector<4x64xf32>
    %cst_76 = arith.constant dense<0.000000e+00> : vector<64xf32>
    %96 = vector.multi_reduction <add>, %95, %cst_76 [0] : vector<4x64xf32> to vector<64xf32>
    %97 = vector.shape_cast %96 : vector<64xf32> to vector<1x64xf32>
    %98 = arith.addf %97, %4 : vector<1x64xf32>
    %cst_77 = arith.constant 0.000000e+00 : f32
    %99 = vector.broadcast %cst_77 : f32 to vector<1x64xf32>
    %100 = arith.subf %99, %98 : vector<1x64xf32>
    %101 = math.exp %100 : vector<1x64xf32>
    %cst_78 = arith.constant 1.000000e+00 : f32
    %102 = vector.broadcast %cst_78 : f32 to vector<1x64xf32>
    %103 = arith.addf %102, %101 : vector<1x64xf32>
    %cst_79 = arith.constant 1.000000e+00 : f32
    %104 = vector.broadcast %cst_79 : f32 to vector<1x64xf32>
    %105 = arith.divf %104, %103 : vector<1x64xf32>
    %106 = vector.broadcast %105 : vector<1x64xf32> to vector<256x64xf32>
    %107 = arith.addf %82, %106 : vector<256x64xf32>
    %cst_80 = arith.constant 0.000000e+00 : f32
    %108 = vector.broadcast %cst_80 : f32 to vector<256x64xf32>
    %109 = arith.maximumf %107, %108 : vector<256x64xf32>
    %110 = vector.extract_strided_slice %109 {offsets = [0, 0], sizes = [128, 64], strides = [1, 1]} : vector<256x64xf32> to vector<128x64xf32>
    %111 = vector.extract_strided_slice %109 {offsets = [128, 0], sizes = [128, 64], strides = [1, 1]} : vector<256x64xf32> to vector<128x64xf32>
    %112 = tpu.concatenate %110, %111 in 1 : vector<128x64xf32>, vector<128x64xf32> -> vector<128x128xf32>
    %c0_81 = arith.constant 0 : index
    %c0_82 = arith.constant 0 : index
    %c0_83 = arith.constant 0 : index
    %113 = vector.load %arg7[%c0_81, %c0_82, %c0_83] : memref<1x128x128xf32, #tpu.memory_space<vmem>>, vector<1x128x128xf32>
    %114 = vector.shape_cast %113 : vector<1x128x128xf32> to vector<128x128xf32>
    %115 = vector.shape_cast %112 : vector<128x128xf32> to vector<1x128x128xf32>
    tpu.vector_store %arg7[%c0_81, %c0_82, %c0_83], %115 {strides = array<i32>} : memref<1x128x128xf32, #tpu.memory_space<vmem>>, vector<1x128x128xf32>,
    return
  }
  func.func @transform_0(%arg0: i32) -> (i32, i32, i32, i32) {
    %c0_i32 = arith.constant 0 : i32
    %c0_i32_0 = arith.constant 0 : i32
    %c0_i32_1 = arith.constant 0 : i32
    %c0_i32_2 = arith.constant 0 : i32
    return %arg0, %c0_i32, %c0_i32_0, %c0_i32_1 : i32, i32, i32, i32
  }
  func.func @transform_1(%arg0: i32) -> (i32, i32) {
    %c0_i32 = arith.constant 0 : i32
    %c0_i32_0 = arith.constant 0 : i32
    %c0_i32_1 = arith.constant 0 : i32
    return %c0_i32, %c0_i32_0 : i32, i32
  }
  func.func @transform_2(%arg0: i32) -> (i32, i32) {
    %c0_i32 = arith.constant 0 : i32
    %c0_i32_0 = arith.constant 0 : i32
    %c0_i32_1 = arith.constant 0 : i32
    return %c0_i32, %c0_i32_0 : i32, i32
  }
  func.func @transform_3(%arg0: i32) -> (i32, i32) {
    %c0_i32 = arith.constant 0 : i32
    %c0_i32_0 = arith.constant 0 : i32
    %c0_i32_1 = arith.constant 0 : i32
    return %c0_i32, %c0_i32_0 : i32, i32
  }
  func.func @transform_4(%arg0: i32) -> (i32, i32) {
    %c0_i32 = arith.constant 0 : i32
    %c0_i32_0 = arith.constant 0 : i32
    %c0_i32_1 = arith.constant 0 : i32
    return %c0_i32, %c0_i32_0 : i32, i32
  }
  func.func @transform_5(%arg0: i32) -> (i32, i32) {
    %c0_i32 = arith.constant 0 : i32
    %c0_i32_0 = arith.constant 0 : i32
    %c0_i32_1 = arith.constant 0 : i32
    return %c0_i32, %c0_i32_0 : i32, i32
  }
  func.func @transform_6(%arg0: i32) -> (i32, i32, i32) {
    %c0_i32 = arith.constant 0 : i32
    %c0_i32_0 = arith.constant 0 : i32
    %c0_i32_1 = arith.constant 0 : i32
    return %arg0, %c0_i32, %c0_i32_0 : i32, i32, i32
  }
}

</mosaic_0001>

<bundles_post_ra>
// kernel: tpu_custom_call.1
= control target key start
LH: loop header
LB: loop body
LE: loop exit
PB: predicated region body
PF: predicated region fallthrough
CT: control target
= control target key end

     0   :  { %11 = vsyncpa [#allocation4], 0  ;;  %s6715_s0 = inlined_call_operand.hbm [shape: f32[2,16,16,32], index: 0, kind: input, shape index: {}]   ;;  %s6716_s1 = inlined_call_operand.vmem [shape: f32[32,96], index: 1, kind: input, shape index: {}]   ;;  %s6717_s2 = inlined_call_operand.vmem [shape: f32[288,32], index: 2, kind: input, shape index: {}]   ;;  %s6718_s3 = inlined_call_operand.vmem [shape: f32[32,64], index: 3, kind: input, shape index: {}]   ;;  %s6719_s4 = inlined_call_operand.vmem [shape: f32[4,128], index: 4, kind: input, shape index: {}]   ;;  %s6720_s5 = inlined_call_operand.vmem [shape: f32[12,64], index: 5, kind: input, shape index: {}]   ;;  %s6721_s6 = inlined_call_operand.hbm [shape: f32[2,128,128], index: 6, kind: output, shape index: {}]  }
   0x1   :  { %13 = vsyncpa [#allocation4 + $0x1], 0 }
   0x2   :  { %14 = vsyncpa [#allocation5], 0 }
   0x3   :  { %16 = vsyncpa [#allocation5 + $0x1], 0  ;;  %s4455_s21 = smov 0   ;;  %s4457_s22 = smov 0  }
   0x4   :  { %s4459_s23 = smov 0   ;;  %s4461_s24 = smov 0  }
   0x5 LB: > { %s4476_s25 = sadd.s32 4294967295, %s4409_s24   ;;  %s3868_s26 = sadd.s32 4294967294, %s4409_s24   ;;  %s4409_s24 = sphi %s4461_s24, %s6960_s24   ;;  %s4405_s23 = sphi %s4459_s23, %s6959_s23   ;;  %s4401_s22 = sphi %s4457_s22, %s6958_s22   ;;  %s4397_s21 = sphi %s4455_s21, %s6957_s21  }
   0x6   : > { %s4480_s27 = sadd.s32 1, %s4409_s24   ;;  %s29_s28 = sadd.s32 1, %s4405_s23 }
   0x7   : > { %s26_s29 = ssub.s32 %s4409_s24, %s4480_s27  ;;  %p36_p0 = scmp.ne.s32.totalorder %s4405_s23, %s4401_s22 }
   0x8   : > { %p27_p1 = scmp.eq.s32.totalorder %s26_s29, 0  ;;  %p37_p2 = scmp.eq.s32.totalorder %s4409_s24, 0 }
   0x9   : > { %p42_p3 = scmp.ne.s32.totalorder %s4401_s22, %s4397_s21  ;;  %p43_p4 = scmp.eq.s32.totalorder %s4476_s25, 0 }
   0xa   : > { %s4492_s30 = scalar_select %p27_p1, %s4405_s23, %s29_s28  }
   0xb   : > { %p4494_p5 = por %p37_p2, %p36_p0  ;;  %p4498_p6 = por %p43_p4, %p42_p3 }
   0xc   : > { %p171_p7 = scmp.eq.s32.totalorder %s4476_s25, 1  ;;  %p177_p8 = scmp.eq.s32.totalorder %s3868_s26, 1 }
   0xd   : > { %p4260_p10 = scmp.lt.s32.totalorder %s4409_s24, 2  ;;  %s212_s11 = sand.u32 1, %s4405_s23  }
   0xe   : > { %p4505_p11 = por %p171_p7, %p36_p0  ;;  %p4509_p12 = por %p177_p8, %p42_p3 }
   0xf   : > { %s4234_s12 = sshll.u32 %s4409_s24, 8  ;;  %s3871_s13 = sshll.u32 %s212_s11, 8 }
  0x10   : > { %s221_s16 = scalar_lea.hbm %s6715_s0, %s4234_s12  ;;  %s216_s18 = scalar_lea.vmem [#allocation3], %s3871_s13 }
  0x11   : > { %s222_s17 = sshll.u32 %s221_s16, 4  ;;  %s224_s19 = sshll.u32 %s216_s18, 4  ;;  %s223_s17 = int_to_ptr.hbm [resolvable:$true] %s222_s17  ;;  %s225_s19 = int_to_ptr.vmem [resolvable:$true] %s224_s19 }
  0x12   : > { %p4520_p13 = pnand %p4260_p10, %p4494_p5  ;;  %p3874_p0 = scmp.ge.s32.totalorder %s4409_s24, 1 }
  0x13   : > { %p232_p1 = scmp.lt.s32.totalorder %s4409_s24, 3  ;;  %s213_s26 = scalar_lea.sflag [#allocation4], %s212_s11 }
  0x14   : > { %s4313_s28 = sshra.s32 %s223_s17, 4  ;;  %p4317_p3 = pneg %p4520_p13  ;;  %s4314_s28 = int_to_ptr.hbm [resolvable:$true] %s4313_s28 }
  0x15   : > { %s4315_s29 = scalar_lea.hbm %s4314_s28, 256  ;;  %s4320_s7 = scalar_lea.hbm %s6715_s0, 512 }
  0x16   : > { %p4316_p2 = scmp.ne.s32.totalorder %s4314_s28, %s4315_s29  ;;  %p4321_p5 = scmp.lt.s32.totalorder %s4314_s28, %s6715_s0 }
  0x17   : > { %p4322_p8 = scmp.lt.s32.totalorder %s4320_s7, %s4315_s29 }
  0x18   : > { %p4318_p4 = pnand %p4317_p3, %p4316_p2 }
  0x19   : > { %p4323_p10 = por %p4322_p8, %p4321_p5 }
  0x1a   : > { %p4319_p7 = pneg %p4318_p4 }
  0x1c   : > { %p4324_p9 = pnand %p4323_p10, %p4319_p7 }
  0x1e   : > { %4327 = shalt.err (!%p4324_p9)
}
  0x1f   : > { %s4411_s11 = smov 128   ;;  %s4412_s16 = smov 8  }
  0x20   : > { %4255 = dma.hbm_to_vmem [thread:$0]  (!%p4520_p13), %s223_s17, 4096, %s225_s19, %s213_s26, %s4411_s11, %s4411_s11, %s4412_s16  }
  0x21   : > { %p233_p2 = pnand %p3874_p0, %p232_p1 }
  0x23   : > { %236 = sbr.rel (%p233_p2) target bundleno = 1722 (0x6ba), region = 44 }
  0x28   : > { %s4541_s18 = sand.u32 1, %s4401_s22  }
  0x29   : > { %s3875_s28 = sshll.u32 %s4541_s18, 8  ;;  %s239_s29 = scalar_lea.sflag [#allocation4], %s4541_s18 }
  0x2a   : > { %s4545_s12 = scalar_lea.vmem [#allocation3], %s3875_s28 }
  0x2b   : > { %4388 = dma.done.wait (%p4498_p6), %s239_s29, 4096  }
  0x2c   : > { %4390 = vsyncadd (%p4498_p6), %s239_s29, 4294963200  ;;  %v308_v0 = vld [vmem:[%s6716_s1 + $0x18] sm:$0xff]  ;;  %v307_v1 = vld [vmem:[%s6716_s1 + $0x10] sm:$0xff]  ;;  %vm310_vm0 = vcmask 261120   ;;  %v4413_v21 = vmov 0.0   ;;  %s4414_s17 = smov 96  }
  0x2d   : > { %419 = vmatpush.msra.mxu0 %v308_v0  ;;  %4236 = vmatpush.msra.mxu3 %v308_v0  ;;  %v306_v2 = vld [vmem:[%s6716_s1 + $0x8] sm:$0xff]  ;;  %v305_v3 = vld [vmem:[%s6716_s1] sm:$0xff]  ;;  %v275_v6 = vld [vmem:[%s4545_s12 + $0x10] sm:$0xff]  ;;  %553 = vst.msk [vmem:[#allocation2 + $0x8] sm:$0xff] %vm310_vm0, %v4413_v21  ;;  %vm3335_vm1 = vcmask 523264   ;;  %vm3576_vm3 = vcmask 519168  }
  0x2e   : > { %v273_v4 = vld [vmem:[%s4545_s12] sm:$0xff]  ;;  %v274_v5 = vld [vmem:[%s4545_s12 + $0x8] sm:$0xff]  ;;  %v276_v7 = vld [vmem:[%s4545_s12 + $0x18] sm:$0xff]  ;;  %552 = vst.msk [vmem:[#allocation2] sm:$0xff] %vm310_vm0, %v4413_v21  ;;  %s4417_s14 = smov 64   ;;  %s3876_s15 = sshll.u32 %s4541_s18, 7 }
  0x2f   : > { %420 = vmatpush.msra.mxu0 %v307_v1  ;;  %4237 = vmatpush.msra.mxu3 %v307_v1  ;;  %v277_v8 = vld [vmem:[%s4545_s12 + $0x20] sm:$0xff]  ;;  %v278_v9 = vld [vmem:[%s4545_s12 + $0x28] sm:$0xff]  ;;  %v279_v10 = vld [vmem:[%s4545_s12 + $0x30] sm:$0xff]  ;;  %554 = vst.msk [vmem:[#allocation2 + $0x10] sm:$0xff] %vm310_vm0, %v4413_v21  ;;  %s6633_s11 = scalar_lea.vmem [#allocation6], %s3876_s15  ;;  %s4235_s16 = sshll.u32 %s4476_s25, 7 }
  0x30   : > { %v280_v11 = vld [vmem:[%s4545_s12 + $0x38] sm:$0xff]  ;;  %v281_v12 = vld [vmem:[%s4545_s12 + $0x40] sm:$0xff]  ;;  %v282_v13 = vld [vmem:[%s4545_s12 + $0x48] sm:$0xff]  ;;  %555 = vst.msk [vmem:[#allocation2 + $0x18] sm:$0xff] %vm310_vm0, %v4413_v21  ;;  %s3791_s29 = scalar_lea.hbm %s6721_s6, %s4235_s16  ;;  %s3792_s25 = sshll.u32 %s6633_s11, 4  ;;  %s3793_s25 = int_to_ptr.vmem [resolvable:$true] %s3792_s25 }
  0x31   : > { %421 = vmatpush.msra.mxu0 %v306_v2  ;;  %4238 = vmatpush.msra.mxu3 %v306_v2  ;;  %v283_v14 = vld [vmem:[%s4545_s12 + $0x50] sm:$0xff]  ;;  %v697_v15 = vld [vmem:[%s6717_s2 + $0x38] sm:$0xff]  ;;  %v695_v19 = vld [vmem:[%s6717_s2 + $0x28] sm:$0xff]  ;;  %557 = vst.msk [vmem:[#allocation2 + $0x220] sm:$0xff] %vm310_vm0, %v4413_v21  ;;  %s3794_s19 = sshll.u32 %s3791_s29, 4  ;;  %s3780_s20 = scalar_lea.sflag [#allocation5], %s4541_s18  ;;  %s3795_s19 = int_to_ptr.hbm [resolvable:$true] %s3794_s19 }
  0x32   : > { %v4591_v16 = vld [vmem:[%s6717_s2 + $0x18] sm:$0xff]  ;;  %v696_v17 = vld [vmem:[%s6717_s2 + $0x30] sm:$0xff]  ;;  %806 = vmatpush.msra.mxu1 %v697_v15  ;;  %v4608_v20 = vld [vmem:[%s6717_s2 + $0x8] sm:$0xff]  ;;  %558 = vst.msk [vmem:[#allocation2 + $0x228] sm:$0xff] %vm310_vm0, %v4413_v21  ;;  %s4357_s26 = sshra.s32 %s3795_s19, 4  ;;  %s4358_s26 = int_to_ptr.hbm [resolvable:$true] %s4357_s26 }
  0x33   : > { %422 = vmatpush.msra.mxu0 %v305_v3  ;;  %4239 = vmatpush.msra.mxu3 %v305_v3  ;;  %v4600_v18 = vld [vmem:[%s6717_s2 + $0x10] sm:$0xff]  ;;  %v284_v22 = vld [vmem:[%s4545_s12 + $0x58] sm:$0xff]  ;;  %v694_v23 = vld [vmem:[%s6717_s2 + $0x20] sm:$0xff]  ;;  %559 = vst.msk [vmem:[#allocation2 + $0x230] sm:$0xff] %vm310_vm0, %v4413_v21  ;;  %s4359_s13 = scalar_lea.hbm %s4358_s26, 128  ;;  %p4364_p0 = scmp.lt.s32.totalorder %s4358_s26, %s6721_s6 }
  0x34   : > { %3877 = vmatmul.msk.f32.vlgmr.msra.gmra.mxu0 %vm310_vm0, %v273_v4  ;;  %1015 = vmatpush.msra.mxu2 %v4591_v16  ;;  %v4632_v24 = vld [vmem:[%s6717_s2] sm:$0xff]  ;;  %v662_v25 = vld [vmem:[#allocation2 + $0x8] sm:$0xff]  ;;  %560 = vst.msk [vmem:[#allocation2 + $0x238] sm:$0xff] %vm310_vm0, %v4413_v21  ;;  %v287_v31 = vld [vmem:[%s4545_s12 + $0x70] sm:$0xff]  ;;  %p4360_p6 = scmp.ne.s32.totalorder %s4358_s26, %s4359_s13 }
  0x35   : > { %4240 = vmatpush.msrb.mxu3 %v697_v15  ;;  %807 = vmatpush.msra.mxu1 %v696_v17  ;;  %562 = vst.msk [vmem:[#allocation2 + $0x20] sm:$0xff] %vm310_vm0, %v4413_v21  ;;  %v626_v26 = vld [vmem:[#allocation2 + $0x7] sm:$0xff]  ;;  %v288_v32 = vld [vmem:[%s4545_s12 + $0x78] sm:$0xff]  ;;  %v272_v33 = vld [vmem:[%s6719_s4] sm:$0xf] }
  0x36   : > { %1016 = vmatpush.msra.mxu2 %v4600_v18  ;;  %563 = vst.msk [vmem:[#allocation2 + $0x40] sm:$0xff] %vm310_vm0, %v4413_v21  ;;  %v285_v27 = vld [vmem:[%s4545_s12 + $0x60] sm:$0xff]  ;;  %v663_v28 = vld [vmem:[#allocation2 + $0x10] sm:$0xff]  ;;  %v286_v30 = vld [vmem:[%s4545_s12 + $0x68] sm:$0xff]  ;;  %v4718_v34 = vperm.slane %v272_v33, 0  ;;  %p4361_p9 = pnand %p4360_p6, %p4505_p11 }
  0x37   : > { %4241 = vmatpush.msrb.mxu3 %v696_v17  ;;  %808 = vmatpush.msra.mxu1 %v695_v19  ;;  %564 = vst.msk [vmem:[#allocation2 + $0x60] sm:$0xff] %vm310_vm0, %v4413_v21  ;;  %v627_v29 = vld [vmem:[#allocation2 + $0xf] sm:$0xff]  ;;  %v289_v36 = vld [vmem:[%s4545_s12 + $0x80] sm:$0xff]  ;;  %v292_v53 = vld [vmem:[%s4545_s12 + $0x98] sm:$0xff] }
  0x38   : > { %1017 = vmatpush.msra.mxu2 %v4608_v20  ;;  %565 = vst.msk [vmem:[#allocation2 + $0x80] sm:$0xff] %vm310_vm0, %v4413_v21  ;;  %v290_v40 = vld [vmem:[%s4545_s12 + $0x88] sm:$0xff]  ;;  %v291_v46 = vld [vmem:[%s4545_s12 + $0x90] sm:$0xff]  ;;  %v297_v51 = vld [vmem:[%s4545_s12 + $0xc0] sm:$0xff]  ;;  %p4362_p13 = pneg %p4361_p9 }
  0x39   : > { %4242 = vmatpush.msrb.mxu3 %v695_v19  ;;  %809 = vmatpush.msra.mxu1 %v694_v23  ;;  %566 = vst.msk [vmem:[#allocation2 + $0xa0] sm:$0xff] %vm310_vm0, %v4413_v21  ;;  %v1428_v56 = vld [vmem:[%s6717_s2 + $0x78] sm:$0xff]  ;;  %v298_v59 = vld [vmem:[%s4545_s12 + $0xc8] sm:$0xff]  ;;  %v1427_v60 = vld [vmem:[%s6717_s2 + $0x70] sm:$0xff] }
  0x3a   : > { %1018 = vmatpush.msra.mxu2 %v4632_v24  ;;  %3909 = vmatmul.msk.f32.vlgmr.msra.gmra.mxu1 %vm310_vm0, %v662_v25  ;;  %567 = vst.msk [vmem:[#allocation2 + $0xc0] sm:$0xff] %vm310_vm0, %v4413_v21  ;;  %v1426_v61 = vld [vmem:[%s6717_s2 + $0x68] sm:$0xff]  ;;  %v293_v63 = vld [vmem:[%s4545_s12 + $0xa0] sm:$0xff] }
  0x3b   : > { %4243 = vmatpush.msrb.mxu3 %v694_v23  ;;  %3941 = vmatmul.msk.f32.vlgmr.msra.gmra.mxu2 %vm310_vm0, %v626_v26  ;;  %568 = vst.msk [vmem:[#allocation2 + $0xe0] sm:$0xff] %vm310_vm0, %v4413_v21  ;;  %v1425_v1 = vld [vmem:[%s6717_s2 + $0x60] sm:$0xff]  ;;  %v302_v26 = vld [vmem:[%s4545_s12 + $0xe8] sm:$0xff] }
  0x3c   : > { %3878 = vmatmul.msk.f32.gmra.mxu0 %vm310_vm0, %v274_v5  ;;  %569 = vst.msk [vmem:[#allocation2 + $0x100] sm:$0xff] %vm310_vm0, %v4413_v21  ;;  %3901 = vmatmul.msk.f32.vlgmr.msra.gmra.mxu3 %vm310_vm0, %v297_v51  ;;  %v299_v5 = vld [vmem:[%s4545_s12 + $0xd0] sm:$0xff]  ;;  %v301_v19 = vld [vmem:[%s4545_s12 + $0xe0] sm:$0xff] }
  0x3d   : > { %570 = vst.msk [vmem:[#allocation2 + $0x120] sm:$0xff] %vm310_vm0, %v4413_v21  ;;  %4244 = vmatpush.msra.mxu3 %v4591_v16  ;;  %1537 = vmatpush.msrb.mxu0 %v1428_v56 }
  0x3e   : > { %571 = vst.msk [vmem:[#allocation2 + $0x140] sm:$0xff] %vm310_vm0, %v4413_v21 }
  0x3f   : > { %572 = vst.msk [vmem:[#allocation2 + $0x160] sm:$0xff] %vm310_vm0, %v4413_v21  ;;  %4245 = vmatpush.msra.mxu3 %v4600_v18  ;;  %1538 = vmatpush.msrb.mxu0 %v1427_v60 }
  0x40   : > { %573 = vst.msk [vmem:[#allocation2 + $0x180] sm:$0xff] %vm310_vm0, %v4413_v21 }
  0x41   : > { %574 = vst.msk [vmem:[#allocation2 + $0x1a0] sm:$0xff] %vm310_vm0, %v4413_v21  ;;  %4246 = vmatpush.msra.mxu3 %v4608_v20  ;;  %1539 = vmatpush.msrb.mxu0 %v1426_v61 }
  0x42   : > { %3910 = vmatmul.msk.f32.gmra.mxu1 %vm310_vm0, %v663_v28  ;;  %575 = vst.msk [vmem:[#allocation2 + $0x1c0] sm:$0xff] %vm310_vm0, %v4413_v21 }
  0x43   : > { %3942 = vmatmul.msk.f32.gmra.mxu2 %vm310_vm0, %v627_v29  ;;  %576 = vst.msk [vmem:[#allocation2 + $0x1e0] sm:$0xff] %vm310_vm0, %v4413_v21  ;;  %4247 = vmatpush.msra.mxu3 %v4632_v24 }
  0x44   : > { %3879 = vmatmul.msk.f32.gmra.mxu0 %vm310_vm0, %v275_v6  ;;  %577 = vst.msk [vmem:[#allocation2 + $0x200] sm:$0xff] %vm310_vm0, %v4413_v21  ;;  %3902 = vmatmul.msk.f32.gmra.mxu3 %vm310_vm0, %v298_v59 }
  0x45   : > { %578 = vst.msk [vmem:[#allocation2 + $0x38] sm:$0xff] %vm310_vm0, %v4413_v21  ;;  %1540 = vmatpush.msrb.mxu0 %v1425_v1 }
  0x46   : > { %579 = vst.msk [vmem:[#allocation2 + $0x58] sm:$0xff] %vm310_vm0, %v4413_v21 }
  0x47   : > { %580 = vst.msk [vmem:[#allocation2 + $0x78] sm:$0xff] %vm310_vm0, %v4413_v21 }
  0x48   : > { %581 = vst.msk [vmem:[#allocation2 + $0x98] sm:$0xff] %vm310_vm0, %v4413_v21 }
  0x49   : > { %582 = vst.msk [vmem:[#allocation2 + $0xb8] sm:$0xff] %vm310_vm0, %v4413_v21 }
  0x4a   : > { %583 = vst.msk [vmem:[#allocation2 + $0xd8] sm:$0xff] %vm310_vm0, %v4413_v21 }
  0x4b   : > { %584 = vst.msk [vmem:[#allocation2 + $0xf8] sm:$0xff] %vm310_vm0, %v4413_v21 }
  0x4c   : > { %3880 = vmatmul.msk.f32.gmra.mxu0 %vm310_vm0, %v276_v7  ;;  %585 = vst.msk [vmem:[#allocation2 + $0x118] sm:$0xff] %vm310_vm0, %v4413_v21  ;;  %3903 = vmatmul.msk.f32.gmra.mxu3 %vm310_vm0, %v299_v5  ;;  %v294_v7 = vld [vmem:[%s4545_s12 + $0xa8] sm:$0xff] }
  0x4d   : > { %586 = vst.msk [vmem:[#allocation2 + $0x138] sm:$0xff] %vm310_vm0, %v4413_v21 }
  0x4e   : > { %587 = vst.msk [vmem:[#allocation2 + $0x158] sm:$0xff] %vm310_vm0, %v4413_v21 }
  0x4f   : > { %588 = vst.msk [vmem:[#allocation2 + $0x178] sm:$0xff] %vm310_vm0, %v4413_v21 }
  0x50   : > { %589 = vst.msk [vmem:[#allocation2 + $0x198] sm:$0xff] %vm310_vm0, %v4413_v21 }
  0x51   : > { %590 = vst.msk [vmem:[#allocation2 + $0x1b8] sm:$0xff] %vm310_vm0, %v4413_v21 }
  0x52   : > { %591 = vst.msk [vmem:[#allocation2 + $0x1d8] sm:$0xff] %vm310_vm0, %v4413_v21 }
  0x53   : > { %592 = vst.msk [vmem:[#allocation2 + $0x1f8] sm:$0xff] %vm310_vm0, %v4413_v21 }
  0x54   : > { %3881 = vmatmul.msk.f32.gmra.mxu0 %vm310_vm0, %v277_v8  ;;  %593 = vst.msk [vmem:[#allocation2 + $0x218] sm:$0xff] %vm310_vm0, %v4413_v21  ;;  %v296_v21 = vld [vmem:[%s4545_s12 + $0xb8] sm:$0xff] }
  0x5c   : > { %3882 = vmatmul.msk.f32.gmra.mxu0 %vm310_vm0, %v278_v9 }
  0x64   : > { %3883 = vmatmul.msk.f32.gmra.mxu0 %vm310_vm0, %v279_v10 }
  0x6c   : > { %3884 = vmatmul.msk.f32.gmra.mxu0 %vm310_vm0, %v280_v11 }
  0x74   : > { %3885 = vmatmul.msk.f32.gmra.mxu0 %vm310_vm0, %v281_v12  ;;  %v300_v12 = vld [vmem:[%s4545_s12 + $0xd8] sm:$0xff] }
  0x75   : > { %3904 = vmatmul.msk.f32.gmra.mxu3 %vm310_vm0, %v300_v12 }
  0x7c   : > { %3886 = vmatmul.msk.f32.gmra.mxu0 %vm310_vm0, %v282_v13 }
  0x7d   : > { %3905 = vmatmul.msk.f32.gmra.mxu3 %vm310_vm0, %v301_v19 }
  0x84   : > { %3887 = vmatmul.msk.f32.gmra.mxu0 %vm310_vm0, %v283_v14  ;;  %v295_v14 = vld [vmem:[%s4545_s12 + $0xb0] sm:$0xff] }
  0x85   : > { %3906 = vmatmul.msk.f32.gmra.mxu3 %vm310_vm0, %v302_v26 }
  0x8c   : > { %3888 = vmatmul.msk.f32.gmra.mxu0 %vm310_vm0, %v284_v22 }
  0x94   : > { %3889 = vmatmul.msk.f32.gmra.mxu0 %vm310_vm0, %v285_v27 }
  0x9c   : > { %3890 = vmatmul.msk.f32.gmra.mxu0 %vm310_vm0, %v286_v30 }
  0xa4   : > { %3891 = vmatmul.msk.f32.gmra.mxu0 %vm310_vm0, %v287_v31 }
  0xac   : > { %3892 = vmatmul.msk.f32.gmra.mxu0 %vm310_vm0, %v288_v32 }
  0xb1   : > { %v424_v35 = vpop.f32.mrf.mxu0 }
  0xb2   : > { %v425_v37 = vadd.f32 %v424_v35, %v4718_v34 }
  0xb4   : > { %3893 = vmatmul.msk.f32.gmra.mxu0 %vm310_vm0, %v289_v36  ;;  %3445 = vrot.lane.b32.xlu0 %v425_v37, %s4414_s17  ;;  %v520_v38 = vmax.f32 %v425_v37, 0.0 }
  0xb6   : > { %594 = vst.msk [vmem:[#allocation2 + $0x28] sm:$0xff] %vm310_vm0, %v520_v38 }
  0xb9   : > { %v427_v39 = vpop.f32.mrf.mxu0 }
  0xba   : > { %v428_v41 = vadd.f32 %v427_v39, %v4718_v34 }
  0xbc   : > { %3894 = vmatmul.msk.f32.gmra.mxu0 %vm310_vm0, %v290_v40  ;;  %3447 = vrot.lane.b32.xlu1 %v428_v41, %s4414_s17  ;;  %v521_v42 = vmax.f32 %v428_v41, 0.0 }
  0xbd   : > { %v4729_v43 = vld [vmem:[#allocation2 + $0x28] sm:$0xff] }
  0xbe   : > { %v4731_v44 = vld [vmem:[#allocation2 + $0x27] sm:$0xff]  ;;  %595 = vst.msk [vmem:[#allocation2 + $0x30] sm:$0xff] %vm310_vm0, %v521_v42  ;;  %3911 = vmatmul.msk.f32.gmra.mxu1 %vm310_vm0, %v4729_v43 }
  0xbf   : > { %3943 = vmatmul.msk.f32.gmra.mxu2 %vm310_vm0, %v4731_v44 }
  0xc1   : > { %v430_v45 = vpop.f32.mrf.mxu0 }
  0xc2   : > { %v431_v47 = vadd.f32 %v430_v45, %v4718_v34 }
  0xc4   : > { %v522_v48 = vmax.f32 %v431_v47, 0.0  ;;  %3895 = vmatmul.msk.f32.gmra.mxu0 %vm310_vm0, %v291_v46  ;;  %3449 = vrot.lane.b32.xlu1 %v431_v47, %s4414_s17 }
  0xc5   : > { %v4742_v49 = vld [vmem:[#allocation2 + $0x30] sm:$0xff] }
  0xc6   : > { %v4744_v50 = vld [vmem:[#allocation2 + $0x2f] sm:$0xff]  ;;  %596 = vst.msk [vmem:[#allocation2 + $0x48] sm:$0xff] %vm310_vm0, %v522_v48  ;;  %3912 = vmatmul.msk.f32.gmra.mxu1 %vm310_vm0, %v4742_v49 }
  0xc7   : > { %3944 = vmatmul.msk.f32.gmra.mxu2 %vm310_vm0, %v4744_v50 }
  0xc9   : > { %v433_v52 = vpop.f32.mrf.mxu0 }
  0xca   : > { %v434_v54 = vadd.f32 %v433_v52, %v4718_v34 }
  0xcc   : > { %3896 = vmatmul.msk.f32.gmra.mxu0 %vm310_vm0, %v292_v53  ;;  %3451 = vrot.lane.b32.xlu2 %v434_v54, %s4414_s17  ;;  %v523_v55 = vmax.f32 %v434_v54, 0.0 }
  0xcd   : > { %v4762_v57 = vld [vmem:[#allocation2 + $0x48] sm:$0xff] }
  0xce   : > { %v4764_v58 = vld [vmem:[#allocation2 + $0x47] sm:$0xff]  ;;  %597 = vst.msk [vmem:[#allocation2 + $0x50] sm:$0xff] %vm310_vm0, %v523_v55  ;;  %3913 = vmatmul.msk.f32.gmra.mxu1 %vm310_vm0, %v4762_v57  ;;  %v1705_v55 = vld [vmem:[%s6717_s2 + $0x98] sm:$0xff] }
  0xcf   : > { %3945 = vmatmul.msk.f32.gmra.mxu2 %vm310_vm0, %v4764_v58  ;;  %1814 = vmatpush.msrb.mxu1 %v1705_v55  ;;  %v1703_v55 = vld [vmem:[%s6717_s2 + $0x88] sm:$0xff] }
  0xd1   : > { %v436_v62 = vpop.f32.mrf.mxu0 }
  0xd2   : > { %v437_v0 = vadd.f32 %v436_v62, %v4718_v34 }
  0xd4   : > { %v524_v2 = vmax.f32 %v437_v0, 0.0  ;;  %3897 = vmatmul.msk.f32.gmra.mxu0 %vm310_vm0, %v293_v63  ;;  %3453 = vrot.lane.b32.xlu2 %v437_v0, %s4414_s17 }
  0xd5   : > { %v4788_v3 = vld [vmem:[#allocation2 + $0x50] sm:$0xff] }
  0xd6   : > { %v4790_v4 = vld [vmem:[#allocation2 + $0x4f] sm:$0xff]  ;;  %598 = vst.msk [vmem:[#allocation2 + $0x68] sm:$0xff] %vm310_vm0, %v524_v2  ;;  %3914 = vmatmul.msk.f32.gmra.mxu1 %vm310_vm0, %v4788_v3 }
  0xd7   : > { %3946 = vmatmul.msk.f32.gmra.mxu2 %vm310_vm0, %v4790_v4 }
  0xd9   : > { %v439_v6 = vpop.f32.mrf.mxu0 }
  0xda   : > { %v440_v8 = vadd.f32 %v439_v6, %v4718_v34 }
  0xdc   : > { %v525_v9 = vmax.f32 %v440_v8, 0.0  ;;  %3898 = vmatmul.msk.f32.gmra.mxu0 %vm310_vm0, %v294_v7  ;;  %3455 = vrot.lane.b32.xlu1 %v440_v8, %s4414_s17 }
  0xdd   : > { %v4803_v10 = vld [vmem:[#allocation2 + $0x68] sm:$0xff] }
  0xde   : > { %v4805_v11 = vld [vmem:[#allocation2 + $0x67] sm:$0xff]  ;;  %599 = vst.msk [vmem:[#allocation2 + $0x70] sm:$0xff] %vm310_vm0, %v525_v9  ;;  %3915 = vmatmul.msk.f32.gmra.mxu1 %vm310_vm0, %v4803_v10 }
  0xdf   : > { %3947 = vmatmul.msk.f32.gmra.mxu2 %vm310_vm0, %v4805_v11 }
  0xe1   : > { %v442_v13 = vpop.f32.mrf.mxu0 }
  0xe2   : > { %v443_v15 = vadd.f32 %v442_v13, %v4718_v34 }
  0xe4   : > { %v526_v16 = vmax.f32 %v443_v15, 0.0  ;;  %3899 = vmatmul.msk.f32.gmra.mxu0 %vm310_vm0, %v295_v14  ;;  %3457 = vrot.lane.b32.xlu2 %v443_v15, %s4414_s17  ;;  %v303_v15 = vld [vmem:[%s4545_s12 + $0xf0] sm:$0xff] }
  0xe5   : > { %v4818_v17 = vld [vmem:[#allocation2 + $0x70] sm:$0xff]  ;;  %3907 = vmatmul.msk.f32.gmra.mxu3 %vm310_vm0, %v303_v15 }
  0xe6   : > { %v4820_v18 = vld [vmem:[#allocation2 + $0x6f] sm:$0xff]  ;;  %600 = vst.msk [vmem:[#allocation2 + $0x88] sm:$0xff] %vm310_vm0, %v526_v16  ;;  %3916 = vmatmul.msk.f32.gmra.mxu1 %vm310_vm0, %v4818_v17 }
  0xe7   : > { %3948 = vmatmul.msk.f32.gmra.mxu2 %vm310_vm0, %v4820_v18 }
  0xe9   : > { %v445_v20 = vpop.f32.mrf.mxu0 }
  0xea   : > { %v446_v22 = vadd.f32 %v445_v20, %v4718_v34 }
  0xec   : > { %v527_v23 = vmax.f32 %v446_v22, 0.0  ;;  %3900 = vmatmul.msk.f32.gmra.mxu0 %vm310_vm0, %v296_v21  ;;  %3459 = vrot.lane.b32.xlu1 %v446_v22, %s4414_s17 }
  0xed   : > { %v4833_v24 = vld [vmem:[#allocation2 + $0x88] sm:$0xff] }
  0xee   : > { %v4835_v25 = vld [vmem:[#allocation2 + $0x87] sm:$0xff]  ;;  %601 = vst.msk [vmem:[#allocation2 + $0x90] sm:$0xff] %vm310_vm0, %v527_v23  ;;  %3917 = vmatmul.msk.f32.gmra.mxu1 %vm310_vm0, %v4833_v24 }
  0xef   : > { %3949 = vmatmul.msk.f32.gmra.mxu2 %vm310_vm0, %v4835_v25 }
  0xf1   : > { %v448_v27 = vpop.f32.mrf.mxu0 }
  0xf2   : > { %v449_v28 = vadd.f32 %v448_v27, %v4718_v34 }
  0xf4   : > { %v528_v29 = vmax.f32 %v449_v28, 0.0  ;;  %3461 = vrot.lane.b32.xlu2 %v449_v28, %s4414_s17  ;;  %4005 = vmatmul.msk.f32.vlgmr.msrb.gmra.mxu0 %vm310_vm0, %v4731_v44 }
  0xf5   : > { %v4848_v30 = vld [vmem:[#allocation2 + $0x90] sm:$0xff] }
  0xf6   : > { %v4850_v31 = vld [vmem:[#allocation2 + $0x8f] sm:$0xff]  ;;  %602 = vst.msk [vmem:[#allocation2 + $0xa8] sm:$0xff] %vm310_vm0, %v528_v29  ;;  %3918 = vmatmul.msk.f32.gmra.mxu1 %vm310_vm0, %v4848_v30 }
  0xf7   : > { %3950 = vmatmul.msk.f32.gmra.mxu2 %vm310_vm0, %v4850_v31 }
  0xf9   : > { %v451_v32 = vpop.f32.mrf.mxu0 }
  0xfa   : > { %v452_v33 = vadd.f32 %v451_v32, %v4718_v34 }
  0xfc   : > { %v529_v35 = vmax.f32 %v452_v33, 0.0  ;;  %3463 = vrot.lane.b32.xlu0 %v452_v33, %s4414_s17  ;;  %4006 = vmatmul.msk.f32.gmra.mxu0 %vm310_vm0, %v4744_v50 }
  0xfd   : > { %v4861_v36 = vld [vmem:[#allocation2 + $0xa8] sm:$0xff] }
  0xfe   : > { %v4863_v37 = vld [vmem:[#allocation2 + $0xa7] sm:$0xff]  ;;  %603 = vst.msk [vmem:[#allocation2 + $0xb0] sm:$0xff] %vm310_vm0, %v529_v35  ;;  %3919 = vmatmul.msk.f32.gmra.mxu1 %vm310_vm0, %v4861_v36 }
  0xff   : > { %3951 = vmatmul.msk.f32.gmra.mxu2 %vm310_vm0, %v4863_v37 }
 0x101   : > { %v454_v38 = vpop.f32.mrf.mxu0 }
 0x102   : > { %v455_v39 = vadd.f32 %v454_v38, %v4718_v34 }
 0x104   : > { %v530_v40 = vmax.f32 %v455_v39, 0.0  ;;  %3465 = vrot.lane.b32.xlu1 %v455_v39, %s4414_s17  ;;  %4007 = vmatmul.msk.f32.gmra.mxu0 %vm310_vm0, %v4764_v58 }
 0x105   : > { %v4874_v41 = vld [vmem:[#allocation2 + $0xb0] sm:$0xff] }
 0x106   : > { %v4876_v42 = vld [vmem:[#allocation2 + $0xaf] sm:$0xff]  ;;  %604 = vst.msk [vmem:[#allocation2 + $0xc8] sm:$0xff] %vm310_vm0, %v530_v40  ;;  %3920 = vmatmul.msk.f32.gmra.mxu1 %vm310_vm0, %v4874_v41  ;;  %v1982_v40 = vld [vmem:[%s6717_s2 + $0xb8] sm:$0xff] }
 0x107   : > { %3952 = vmatmul.msk.f32.gmra.mxu2 %vm310_vm0, %v4876_v42 }
 0x108   : > { %2091 = vmatpush.msrb.mxu2 %v1982_v40 }
 0x109   : > { %v457_v44 = vpop.f32.mrf.mxu0 }
 0x10a   : > { %v4884_v45 = vadd.f32 %v457_v44, %v4718_v34  ;;  %v1981_v44 = vld [vmem:[%s6717_s2 + $0xb0] sm:$0xff] }
 0x10b   : > { %2092 = vmatpush.msrb.mxu2 %v1981_v44 }
 0x10c   : > { %6742 = vst [vmem:[#allocation9_spill] sm:$0xff] %v4884_v45  ;;  %v531_v46 = vmax.f32 %v4884_v45, 0.0  ;;  %4008 = vmatmul.msk.f32.gmra.mxu0 %vm310_vm0, %v4790_v4  ;;  %v4942_v4 = vpop.f32.mrf.mxu1 }
 0x10d   : > { %v4889_v47 = vld [vmem:[#allocation2 + $0xc8] sm:$0xff]  ;;  %6744 = vst [vmem:[#allocation11_spill] sm:$0xff] %v4942_v4 }
 0x10e   : > { %v4891_v48 = vld [vmem:[#allocation2 + $0xc7] sm:$0xff]  ;;  %605 = vst.msk [vmem:[#allocation2 + $0xd0] sm:$0xff] %vm310_vm0, %v531_v46  ;;  %3921 = vmatmul.msk.f32.gmra.mxu1 %vm310_vm0, %v4889_v47 }
 0x10f   : > { %3953 = vmatmul.msk.f32.gmra.mxu2 %vm310_vm0, %v4891_v48 }
 0x111   : > { %v460_v50 = vpop.f32.mrf.mxu0 }
 0x112   : > { %v461_v51 = vadd.f32 %v460_v50, %v4718_v34 }
 0x114   : > { %v532_v52 = vmax.f32 %v461_v51, 0.0  ;;  %3469 = vrot.lane.b32.xlu1 %v461_v51, %s4414_s17  ;;  %4009 = vmatmul.msk.f32.gmra.mxu0 %vm310_vm0, %v4805_v11  ;;  %v4952_v11 = vpop.f32.mrf.mxu2  ;;  %v4959_v13 = vpop.f32.mrf.mxu1 }
 0x115   : > { %v4902_v53 = vld [vmem:[#allocation2 + $0xd0] sm:$0xff]  ;;  %6745 = vst [vmem:[#allocation12_spill] sm:$0xff] %v4952_v11 }
 0x116   : > { %v4904_v54 = vld [vmem:[#allocation2 + $0xcf] sm:$0xff]  ;;  %606 = vst.msk [vmem:[#allocation2 + $0xe8] sm:$0xff] %vm310_vm0, %v532_v52  ;;  %3922 = vmatmul.msk.f32.gmra.mxu1 %vm310_vm0, %v4902_v53  ;;  %v496_v52 = vpop.f32.mrf.mxu3 }
 0x117   : > { %3954 = vmatmul.msk.f32.gmra.mxu2 %vm310_vm0, %v4904_v54  ;;  %6746 = vst [vmem:[#allocation13_spill] sm:$0xff] %v4959_v13 }
 0x119   : > { %v463_v56 = vpop.f32.mrf.mxu0 }
 0x11a   : > { %v464_v58 = vadd.f32 %v463_v56, %v4718_v34  ;;  %v1980_v56 = vld [vmem:[%s6717_s2 + $0xa8] sm:$0xff] }
 0x11b   : > { %2093 = vmatpush.msrb.mxu2 %v1980_v56 }
 0x11c   : > { %v533_v59 = vmax.f32 %v464_v58, 0.0  ;;  %3471 = vrot.lane.b32.xlu2 %v464_v58, %s4414_s17  ;;  %4010 = vmatmul.msk.f32.gmra.mxu0 %vm310_vm0, %v4820_v18  ;;  %v4978_v20 = vpop.f32.mrf.mxu2 }
 0x11d   : > { %v4918_v60 = vld [vmem:[#allocation2 + $0xe8] sm:$0xff]  ;;  %6748 = vst [vmem:[#allocation15_spill] sm:$0xff] %v4978_v20 }
 0x11e   : > { %v4920_v61 = vld [vmem:[#allocation2 + $0xe7] sm:$0xff]  ;;  %607 = vst.msk [vmem:[#allocation2 + $0xf0] sm:$0xff] %vm310_vm0, %v533_v59  ;;  %3923 = vmatmul.msk.f32.gmra.mxu1 %vm310_vm0, %v4918_v60 }
 0x11f   : > { %3955 = vmatmul.msk.f32.gmra.mxu2 %vm310_vm0, %v4920_v61 }
 0x121   : > { %v466_v62 = vpop.f32.mrf.mxu0 }
 0x122   : > { %v4928_v63 = vadd.f32 %v466_v62, %v4718_v34  ;;  %v1702_v62 = vld [vmem:[%s6717_s2 + $0x80] sm:$0xff] }
 0x124   : > { %6743 = vst [vmem:[#allocation10_spill] sm:$0xff] %v4928_v63  ;;  %v534_v0 = vmax.f32 %v4928_v63, 0.0  ;;  %4011 = vmatmul.msk.f32.gmra.mxu0 %vm310_vm0, %v4835_v25  ;;  %v304_v25 = vld [vmem:[%s4545_s12 + $0xf8] sm:$0xff]  ;;  %v5267_v63 = vld [vmem:[#allocation2 + $0xa9] sm:$0xff] }
 0x125   : > { %v4933_v1 = vld [vmem:[#allocation2 + $0xf0] sm:$0xff]  ;;  %3908 = vmatmul.msk.f32.gmra.mxu3 %vm310_vm0, %v304_v25 }
 0x126   : > { %v4935_v2 = vld [vmem:[#allocation2 + $0xef] sm:$0xff]  ;;  %608 = vst.msk [vmem:[#allocation2 + $0x108] sm:$0xff] %vm310_vm0, %v534_v0  ;;  %3924 = vmatmul.msk.f32.gmra.mxu1 %vm310_vm0, %v4933_v1  ;;  %v1979_v0 = vld [vmem:[%s6717_s2 + $0xa0] sm:$0xff] }
 0x127   : > { %3956 = vmatmul.msk.f32.gmra.mxu2 %vm310_vm0, %v4935_v2 }
 0x128   : > { %2094 = vmatpush.msrb.mxu2 %v1979_v0 }
 0x129   : > { %v469_v5 = vpop.f32.mrf.mxu0 }
 0x12a   : > { %v470_v6 = vadd.f32 %v469_v5, %v4718_v34 }
 0x12c   : > { %v535_v7 = vmax.f32 %v470_v6, 0.0  ;;  %3475 = vrot.lane.b32.xlu1 %v470_v6, %s4414_s17  ;;  %4012 = vmatmul.msk.f32.gmra.mxu0 %vm310_vm0, %v4850_v31 }
 0x12d   : > { %v4948_v8 = vld [vmem:[#allocation2 + $0x108] sm:$0xff] }
 0x12e   : > { %v4950_v9 = vld [vmem:[#allocation2 + $0x107] sm:$0xff]  ;;  %609 = vst.msk [vmem:[#allocation2 + $0x110] sm:$0xff] %vm310_vm0, %v535_v7  ;;  %3925 = vmatmul.msk.f32.gmra.mxu1 %vm310_vm0, %v4948_v8 }
 0x12f   : > { %3957 = vmatmul.msk.f32.gmra.mxu2 %vm310_vm0, %v4950_v9 }
 0x131   : > { %v472_v12 = vpop.f32.mrf.mxu0 }
 0x132   : > { %v4962_v14 = vadd.f32 %v472_v12, %v4718_v34 }
 0x134   : > { %6747 = vst [vmem:[#allocation14_spill] sm:$0xff] %v4962_v14  ;;  %v536_v16 = vmax.f32 %v4962_v14, 0.0  ;;  %4013 = vmatmul.msk.f32.gmra.mxu0 %vm310_vm0, %v4863_v37 }
 0x135   : > { %v4969_v18 = vld [vmem:[#allocation2 + $0x110] sm:$0xff] }
 0x136   : > { %v4971_v19 = vld [vmem:[#allocation2 + $0x10f] sm:$0xff]  ;;  %610 = vst.msk [vmem:[#allocation2 + $0x128] sm:$0xff] %vm310_vm0, %v536_v16  ;;  %3926 = vmatmul.msk.f32.gmra.mxu1 %vm310_vm0, %v4969_v18 }
 0x137   : > { %3958 = vmatmul.msk.f32.gmra.mxu2 %vm310_vm0, %v4971_v19 }
 0x139   : > { %v475_v21 = vpop.f32.mrf.mxu0 }
 0x13a   : > { %v4981_v22 = vadd.f32 %v475_v21, %v4718_v34 }
 0x13b   : > { %v817_v23 = vpop.f32.mrf.mxu1 }
 0x13c   : > { %6749 = vst [vmem:[#allocation16_spill] sm:$0xff] %v4981_v22  ;;  %v537_v26 = vmax.f32 %v4981_v22, 0.0  ;;  %4014 = vmatmul.msk.f32.gmra.mxu0 %vm310_vm0, %v4876_v42  ;;  %v1704_v42 = vld [vmem:[%s6717_s2 + $0x90] sm:$0xff] }
 0x13d   : > { %v4988_v27 = vld [vmem:[#allocation2 + $0x128] sm:$0xff]  ;;  %1815 = vmatpush.msrb.mxu1 %v1704_v42 }
 0x13e   : > { %v4990_v28 = vld [vmem:[#allocation2 + $0x127] sm:$0xff]  ;;  %611 = vst.msk [vmem:[#allocation2 + $0x130] sm:$0xff] %vm310_vm0, %v537_v26  ;;  %3927 = vmatmul.msk.f32.gmra.mxu1 %vm310_vm0, %v4988_v27 }
 0x13f   : > { %3959 = vmatmul.msk.f32.gmra.mxu2 %vm310_vm0, %v4990_v28  ;;  %1816 = vmatpush.msrb.mxu1 %v1703_v55 }
 0x141   : > { %v478_v29 = vpop.f32.mrf.mxu0  ;;  %1817 = vmatpush.msrb.mxu1 %v1702_v62 }
 0x142   : > { %v1026_v31 = vpop.f32.mrf.mxu2  ;;  %v479_v32 = vadd.f32 %v478_v29, %v4718_v34 }
 0x143   : > { %v4998_v33 = vadd.f32 %v1026_v31, %v817_v23  ;;  %v820_v35 = vpop.f32.mrf.mxu1  ;;  %v499_v23 = vpop.f32.mrf.mxu3 }
 0x144   : > { %v538_v37 = vmax.f32 %v479_v32, 0.0  ;;  %3481 = vrot.lane.b32.xlu1 %v479_v32, %s4414_s17  ;;  %4015 = vmatmul.msk.f32.gmra.mxu0 %vm310_vm0, %v4891_v48  ;;  %v5058_v26 = vadd.f32 %v499_v23, %v4718_v34 }
 0x145   : > { %v5003_v38 = vld [vmem:[#allocation2 + $0x130] sm:$0xff] }
 0x146   : > { %v5005_v39 = vld [vmem:[#allocation2 + $0x12f] sm:$0xff]  ;;  %612 = vst.msk [vmem:[#allocation2 + $0x148] sm:$0xff] %vm310_vm0, %v538_v37  ;;  %3928 = vmatmul.msk.f32.gmra.mxu1 %vm310_vm0, %v5003_v38 }
 0x147   : > { %3960 = vmatmul.msk.f32.gmra.mxu2 %vm310_vm0, %v5005_v39  ;;  %6752 = vst [vmem:[#allocation19_spill] sm:$0xff] %v5058_v26 }
 0x149   : > { %v481_v46 = vpop.f32.mrf.mxu0 }
 0x14a   : > { %v1029_v48 = vpop.f32.mrf.mxu2  ;;  %v5022_v50 = vadd.f32 %v481_v46, %v4718_v34 }
 0x14b   : > { %v5024_v51 = vadd.f32 %v1029_v48, %v820_v35  ;;  %v823_v58 = vpop.f32.mrf.mxu1  ;;  %v545_v35 = vmax.f32 %v5058_v26, 0.0  ;;  %v502_v44 = vpop.f32.mrf.mxu3 }
 0x14c   : > { %6750 = vst [vmem:[#allocation17_spill] sm:$0xff] %v5022_v50  ;;  %v539_v59 = vmax.f32 %v5022_v50, 0.0  ;;  %4016 = vmatmul.msk.f32.gmra.mxu0 %vm310_vm0, %v4904_v54  ;;  %v497_v54 = vadd.f32 %v496_v52, %v4718_v34  ;;  %v5078_v48 = vadd.f32 %v502_v44, %v4718_v34 }
 0x14d   : > { %v5041_v5 = vld [vmem:[#allocation2 + $0x148] sm:$0xff]  ;;  %619 = vst.msk [vmem:[#allocation2 + $0x1b0] sm:$0xff] %vm310_vm0, %v545_v35 }
 0x14e   : > { %v5043_v6 = vld [vmem:[#allocation2 + $0x147] sm:$0xff]  ;;  %613 = vst.msk [vmem:[#allocation2 + $0x150] sm:$0xff] %vm310_vm0, %v539_v59  ;;  %3929 = vmatmul.msk.f32.gmra.mxu1 %vm310_vm0, %v5041_v5  ;;  %v544_v7 = vmax.f32 %v497_v54, 0.0 }
 0x14f   : > { %3961 = vmatmul.msk.f32.gmra.mxu2 %vm310_vm0, %v5043_v6  ;;  %6753 = vst [vmem:[#allocation20_spill] sm:$0xff] %v5078_v48 }
 0x150   : > { %618 = vst.msk [vmem:[#allocation2 + $0x1a8] sm:$0xff] %vm310_vm0, %v544_v7 }
 0x151   : > { %v484_v12 = vpop.f32.mrf.mxu0 }
 0x152   : > { %v1032_v15 = vpop.f32.mrf.mxu2  ;;  %v5052_v16 = vadd.f32 %v484_v12, %v4718_v34 }
 0x153   : > { %v5054_v21 = vadd.f32 %v1032_v15, %v823_v58  ;;  %v826_v25 = vpop.f32.mrf.mxu1  ;;  %v546_v58 = vmax.f32 %v5078_v48, 0.0  ;;  %v505_v7 = vpop.f32.mrf.mxu3 }
 0x154   : > { %6751 = vst [vmem:[#allocation18_spill] sm:$0xff] %v5052_v16  ;;  %v540_v29 = vmax.f32 %v5052_v16, 0.0  ;;  %4017 = vmatmul.msk.f32.gmra.mxu0 %vm310_vm0, %v4920_v61  ;;  %v506_v15 = vadd.f32 %v505_v7, %v4718_v34  ;;  %v5257_v16 = vld [vmem:[#allocation2 + $0x91] sm:$0xff] }
 0x155   : > { %v5063_v31 = vld [vmem:[#allocation2 + $0x150] sm:$0xff]  ;;  %620 = vst.msk [vmem:[#allocation2 + $0x1c8] sm:$0xff] %vm310_vm0, %v546_v58 }
 0x156   : > { %v5065_v32 = vld [vmem:[#allocation2 + $0x14f] sm:$0xff]  ;;  %614 = vst.msk [vmem:[#allocation2 + $0x168] sm:$0xff] %vm310_vm0, %v540_v29  ;;  %3930 = vmatmul.msk.f32.gmra.mxu1 %vm310_vm0, %v5063_v31  ;;  %v547_v35 = vmax.f32 %v506_v15, 0.0 }
 0x157   : > { %3962 = vmatmul.msk.f32.gmra.mxu2 %vm310_vm0, %v5065_v32 }
 0x158   : > { %621 = vst.msk [vmem:[#allocation2 + $0x1d0] sm:$0xff] %vm310_vm0, %v547_v35 }
 0x159   : > { %v487_v37 = vpop.f32.mrf.mxu0 }
 0x15a   : > { %v1035_v40 = vpop.f32.mrf.mxu2  ;;  %v488_v61 = vadd.f32 %v487_v37, %v4718_v34 }
 0x15b   : > { %v5075_v42 = vadd.f32 %v1035_v40, %v826_v25  ;;  %v829_v46 = vpop.f32.mrf.mxu1 }
 0x15c   : > { %v541_v52 = vmax.f32 %v488_v61, 0.0  ;;  %3487 = vrot.lane.b32.xlu1 %v488_v61, %s4414_s17  ;;  %4018 = vmatmul.msk.f32.gmra.mxu0 %vm310_vm0, %v4935_v2  ;;  %v508_v61 = vpop.f32.mrf.mxu3  ;;  %v5196_v26 = vld [vmem:[#allocation2 + $0x1c8] sm:$0xff] }
 0x15d   : > { %v5083_v55 = vld [vmem:[#allocation2 + $0x168] sm:$0xff] }
 0x15e   : > { %v5085_v56 = vld [vmem:[#allocation2 + $0x167] sm:$0xff]  ;;  %615 = vst.msk [vmem:[#allocation2 + $0x170] sm:$0xff] %vm310_vm0, %v541_v52  ;;  %3931 = vmatmul.msk.f32.gmra.mxu1 %vm310_vm0, %v5083_v55 }
 0x15f   : > { %3963 = vmatmul.msk.f32.gmra.mxu2 %vm310_vm0, %v5085_v56  ;;  %v5215_v50 = vld [vmem:[#allocation2 + $0x1d0] sm:$0xff] }
 0x161   : > { %v490_v59 = vpop.f32.mrf.mxu0 }
 0x162   : > { %v1038_v62 = vpop.f32.mrf.mxu2  ;;  %v5095_v2 = vadd.f32 %v490_v59, %v4718_v34 }
 0x163   : > { %v5097_v0 = vadd.f32 %v1038_v62, %v829_v46  ;;  %v832_v12 = vpop.f32.mrf.mxu1  ;;  %v5120_v46 = vadd.f32 %v508_v61, %v4718_v34  ;;  %v5134_v62 = vld [vmem:[#allocation2 + $0x29] sm:$0xff] }
 0x164   : > { %6754 = vst [vmem:[#allocation21_spill] sm:$0xff] %v5095_v2  ;;  %v542_v23 = vmax.f32 %v5095_v2, 0.0  ;;  %4019 = vmatmul.msk.f32.gmra.mxu0 %vm310_vm0, %v4950_v9  ;;  %3493 = vrot.lane.b32.xlu1 %v497_v54, %s4414_s17 }
 0x165   : > { %v5104_v25 = vld [vmem:[#allocation2 + $0x170] sm:$0xff]  ;;  %6756 = vst [vmem:[#allocation23_spill] sm:$0xff] %v5120_v46  ;;  %v548_v59 = vmax.f32 %v5120_v46, 0.0 }
 0x166   : > { %v5106_v29 = vld [vmem:[#allocation2 + $0x16f] sm:$0xff]  ;;  %616 = vst.msk [vmem:[#allocation2 + $0x188] sm:$0xff] %vm310_vm0, %v542_v23  ;;  %3932 = vmatmul.msk.f32.gmra.mxu1 %vm310_vm0, %v5104_v25 }
 0x167   : > { %3964 = vmatmul.msk.f32.gmra.mxu2 %vm310_vm0, %v5106_v29  ;;  %622 = vst.msk [vmem:[#allocation2 + $0x1e8] sm:$0xff] %vm310_vm0, %v548_v59  ;;  %v5164_v59 = vld [vmem:[#allocation2 + $0x1a8] sm:$0xff] }
 0x169   : > { %v493_v37 = vpop.f32.mrf.mxu0 }
 0x16a   : > { %v1041_v40 = vpop.f32.mrf.mxu2  ;;  %v5115_v9 = vadd.f32 %v493_v37, %v4718_v34 }
 0x16b   : > { %v5117_v54 = vadd.f32 %v1041_v40, %v832_v12  ;;  %v835_v44 = vpop.f32.mrf.mxu1  ;;  %v5155_v40 = vld [vmem:[#allocation2 + $0x31] sm:$0xff] }
 0x16c   : > { %6755 = vst [vmem:[#allocation22_spill] sm:$0xff] %v5115_v9  ;;  %v543_v52 = vmax.f32 %v5115_v9, 0.0  ;;  %4020 = vmatmul.msk.f32.gmra.mxu0 %vm310_vm0, %v4971_v19  ;;  %3499 = vrot.lane.b32.xlu1 %v506_v15, %s4414_s17  ;;  %v511_v15 = vpop.f32.mrf.mxu3 }
 0x16d   : > { %v5126_v58 = vld [vmem:[#allocation2 + $0x188] sm:$0xff]  ;;  %v5144_v35 = vadd.f32 %v511_v15, %v4718_v34 }
 0x16e   : > { %617 = vst.msk [vmem:[#allocation2 + $0x190] sm:$0xff] %vm310_vm0, %v543_v52  ;;  %3933 = vmatmul.msk.f32.vlgmr.msrb.gmra.mxu3 %vm310_vm0, %v5126_v58  ;;  %4037 = vmatmul.msk.f32.vlgmr.msrb.gmra.mxu1 %vm310_vm0, %v4729_v43  ;;  %v5229_v14 = vld [vmem:[#allocation2 + $0x1e8] sm:$0xff] }
 0x16f   : > { %4069 = vmatmul.msk.f32.vlgmr.msrb.gmra.mxu2 %vm310_vm0, %v5134_v62  ;;  %6758 = vst [vmem:[#allocation25_spill] sm:$0xff] %v5144_v35  ;;  %v549_v37 = vmax.f32 %v5144_v35, 0.0  ;;  %v1415_v48 = vld [vmem:[#allocation2 + $0x187] sm:$0xff] }
 0x171   : > { %v5139_v7 = vpop.f32.mrf.mxu0  ;;  %623 = vst.msk [vmem:[#allocation2 + $0x1f0] sm:$0xff] %vm310_vm0, %v549_v37 }
 0x172   : > { %v1044_v19 = vpop.f32.mrf.mxu2  ;;  %6757 = vst [vmem:[#allocation24_spill] sm:$0xff] %v5139_v7 }
 0x173   : > { %v5141_v12 = vadd.f32 %v1044_v19, %v835_v44  ;;  %v838_v23 = vpop.f32.mrf.mxu1 }
 0x174   : > { %4021 = vmatmul.msk.f32.gmra.mxu0 %vm310_vm0, %v4990_v28 }
 0x175   : > { %v5148_v43 = vld [vmem:[#allocation2 + $0x190] sm:$0xff] }
 0x176   : > { %3934 = vmatmul.msk.f32.gmra.mxu3 %vm310_vm0, %v5148_v43  ;;  %4038 = vmatmul.msk.f32.gmra.mxu1 %vm310_vm0, %v4742_v49  ;;  %v5172_v49 = vld [vmem:[#allocation2 + $0x49] sm:$0xff] }
 0x177   : > { %4070 = vmatmul.msk.f32.gmra.mxu2 %vm310_vm0, %v5155_v40  ;;  %v1416_v22 = vld [vmem:[#allocation2 + $0x18f] sm:$0xff] }
 0x178   : > { %v5248_v9 = vld [vmem:[#allocation2 + $0x1f0] sm:$0xff] }
 0x179   : > { %v5160_v44 = vpop.f32.mrf.mxu0 }
 0x17a   : > { %v1047_v61 = vpop.f32.mrf.mxu2  ;;  %6759 = vst [vmem:[#allocation26_spill] sm:$0xff] %v5160_v44 }
 0x17b   : > { %v5162_v28 = vadd.f32 %v1047_v61, %v838_v23  ;;  %v841_v52 = vpop.f32.mrf.mxu1  ;;  %v5180_v61 = vld [vmem:[#allocation2 + $0x1b0] sm:$0xff] }
 0x17c   : > { %4022 = vmatmul.msk.f32.gmra.mxu0 %vm310_vm0, %v5005_v39 }
 0x17e   : > { %3935 = vmatmul.msk.f32.gmra.mxu3 %vm310_vm0, %v5164_v59  ;;  %4039 = vmatmul.msk.f32.gmra.mxu1 %vm310_vm0, %v4762_v57  ;;  %v5188_v57 = vld [vmem:[#allocation2 + $0x51] sm:$0xff] }
 0x17f   : > { %4071 = vmatmul.msk.f32.gmra.mxu2 %vm310_vm0, %v5172_v49 }
 0x181   : > { %v5176_v15 = vpop.f32.mrf.mxu0 }
 0x182   : > { %v1050_v19 = vpop.f32.mrf.mxu2  ;;  %6760 = vst [vmem:[#allocation27_spill] sm:$0xff] %v5176_v15 }
 0x183   : > { %v5178_v23 = vadd.f32 %v1050_v19, %v841_v52  ;;  %v844_v37 = vpop.f32.mrf.mxu1 }
 0x184   : > { %4023 = vmatmul.msk.f32.gmra.mxu0 %vm310_vm0, %v5043_v6  ;;  %v1151_v6 = vld [vmem:[%s6717_s2 + $0x58] sm:$0xff] }
 0x185   : > { %1260 = vmatpush.msrb.mxu3 %v1151_v6 }
 0x186   : > { %3936 = vmatmul.msk.f32.gmra.mxu3 %vm310_vm0, %v5180_v61  ;;  %4040 = vmatmul.msk.f32.gmra.mxu1 %vm310_vm0, %v4788_v3  ;;  %v5204_v3 = vld [vmem:[#allocation2 + $0x69] sm:$0xff] }
 0x187   : > { %4072 = vmatmul.msk.f32.gmra.mxu2 %vm310_vm0, %v5188_v57 }
 0x189   : > { %v5192_v52 = vpop.f32.mrf.mxu0 }
 0x18a   : > { %v1053_v39 = vpop.f32.mrf.mxu2  ;;  %6761 = vst [vmem:[#allocation28_spill] sm:$0xff] %v5192_v52  ;;  %v1418_v52 = vld [vmem:[#allocation2 + $0x1af] sm:$0xff] }
 0x18b   : > { %v5194_v19 = vadd.f32 %v1053_v39, %v844_v37  ;;  %v847_v46 = vpop.f32.mrf.mxu1 }
 0x18c   : > { %4024 = vmatmul.msk.f32.gmra.mxu0 %vm310_vm0, %v5065_v32 }
 0x18e   : > { %3937 = vmatmul.msk.f32.gmra.mxu3 %vm310_vm0, %v5196_v26  ;;  %4041 = vmatmul.msk.f32.gmra.mxu1 %vm310_vm0, %v4803_v10  ;;  %v5223_v10 = vld [vmem:[#allocation2 + $0x71] sm:$0xff] }
 0x18f   : > { %4073 = vmatmul.msk.f32.gmra.mxu2 %vm310_vm0, %v5204_v3 }
 0x191   : > { %v5213_v32 = vpop.f32.mrf.mxu0 }
 0x192   : > { %v1056_v37 = vpop.f32.mrf.mxu2  ;;  %6762 = vst [vmem:[#allocation29_spill] sm:$0xff] %v5213_v32 }
 0x193   : > { %v5211_v39 = vadd.f32 %v1056_v37, %v847_v46  ;;  %v850_v2 = vpop.f32.mrf.mxu1 }
 0x194   : > { %4025 = vmatmul.msk.f32.gmra.mxu0 %vm310_vm0, %v5085_v56  ;;  %v1150_v56 = vld [vmem:[%s6717_s2 + $0x50] sm:$0xff] }
 0x195   : > { %1261 = vmatpush.msrb.mxu3 %v1150_v56 }
 0x196   : > { %3938 = vmatmul.msk.f32.gmra.mxu3 %vm310_vm0, %v5215_v50  ;;  %4042 = vmatmul.msk.f32.gmra.mxu1 %vm310_vm0, %v4818_v17  ;;  %v5239_v17 = vld [vmem:[#allocation2 + $0x89] sm:$0xff] }
 0x197   : > { %4074 = vmatmul.msk.f32.gmra.mxu2 %vm310_vm0, %v5223_v10 }
 0x199   : > { %v5231_v35 = vpop.f32.mrf.mxu0 }
 0x19a   : > { %v1059_v46 = vpop.f32.mrf.mxu2  ;;  %6763 = vst [vmem:[#allocation30_spill] sm:$0xff] %v5231_v35 }
 0x19b   : > { %v5227_v6 = vadd.f32 %v1059_v46, %v850_v2  ;;  %v853_v37 = vpop.f32.mrf.mxu1 }
 0x19c   : > { %4026 = vmatmul.msk.f32.gmra.mxu0 %vm310_vm0, %v5106_v29 }
 0x19e   : > { %3939 = vmatmul.msk.f32.gmra.mxu3 %vm310_vm0, %v5229_v14  ;;  %4043 = vmatmul.msk.f32.gmra.mxu1 %vm310_vm0, %v4833_v24 }
 0x19f   : > { %4075 = vmatmul.msk.f32.gmra.mxu2 %vm310_vm0, %v5239_v17 }
 0x1a1   : > { %v5251_v24 = vpop.f32.mrf.mxu0 }
 0x1a2   : > { %v1062_v2 = vpop.f32.mrf.mxu2  ;;  %6764 = vst [vmem:[#allocation31_spill] sm:$0xff] %v5251_v24 }
 0x1a3   : > { %v5246_v46 = vadd.f32 %v1062_v2, %v853_v37  ;;  %v856_v29 = vpop.f32.mrf.mxu1 }
 0x1a4   : > { %4027 = vmatmul.msk.f32.gmra.mxu0 %vm310_vm0, %v1415_v48 }
 0x1a6   : > { %3940 = vmatmul.msk.f32.gmra.mxu3 %vm310_vm0, %v5248_v9  ;;  %4044 = vmatmul.msk.f32.gmra.mxu1 %vm310_vm0, %v4848_v30  ;;  %v1149_v30 = vld [vmem:[%s6717_s2 + $0x48] sm:$0xff] }
 0x1a7   : > { %4076 = vmatmul.msk.f32.gmra.mxu2 %vm310_vm0, %v5257_v16  ;;  %1262 = vmatpush.msrb.mxu3 %v1149_v30  ;;  %v514_v30 = vpop.f32.mrf.mxu3 }
 0x1aa   : > { %v1065_v37 = vpop.f32.mrf.mxu2 }
 0x1ab   : > { %v5261_v56 = vadd.f32 %v1065_v37, %v856_v29  ;;  %v859_v2 = vpop.f32.mrf.mxu1  ;;  %v5274_v29 = vpop.f32.mrf.mxu0 }
 0x1ac   : > { %4028 = vmatmul.msk.f32.gmra.mxu0 %vm310_vm0, %v1416_v22  ;;  %6765 = vst [vmem:[#allocation32_spill] sm:$0xff] %v5274_v29  ;;  %v515_v29 = vadd.f32 %v514_v30, %v4718_v34 }
 0x1ae   : > { %3965 = vmatmul.msk.f32.vlgmr.msra.gmra.mxu3 %vm310_vm0, %v1415_v48  ;;  %4045 = vmatmul.msk.f32.gmra.mxu1 %vm310_vm0, %v4861_v36  ;;  %v1417_v48 = vld [vmem:[#allocation2 + $0x1a7] sm:$0xff]  ;;  %v5282_v36 = vld [vmem:[#allocation2 + $0xb1] sm:$0xff]  ;;  %v550_v32 = vmax.f32 %v515_v29, 0.0 }
 0x1af   : > { %4077 = vmatmul.msk.f32.gmra.mxu2 %vm310_vm0, %v5267_v63  ;;  %3505 = vrot.lane.b32.xlu1 %v515_v29, %s4414_s17 }
 0x1b0   : > { %624 = vst.msk [vmem:[#allocation2 + $0x208] sm:$0xff] %vm310_vm0, %v550_v32 }
 0x1b2   : > { %v1068_v37 = vpop.f32.mrf.mxu2 }
 0x1b3   : > { %v5276_v45 = vadd.f32 %v1068_v37, %v859_v2  ;;  %v862_v24 = vpop.f32.mrf.mxu1  ;;  %v5287_v2 = vpop.f32.mrf.mxu0 }
 0x1b4   : > { %4029 = vmatmul.msk.f32.gmra.mxu0 %vm310_vm0, %v1417_v48  ;;  %6766 = vst [vmem:[#allocation33_spill] sm:$0xff] %v5287_v2  ;;  %v1419_v2 = vld [vmem:[#allocation2 + $0x1c7] sm:$0xff] }
 0x1b6   : > { %3966 = vmatmul.msk.f32.gmra.mxu3 %vm310_vm0, %v1416_v22  ;;  %4046 = vmatmul.msk.f32.gmra.mxu1 %vm310_vm0, %v4874_v41  ;;  %v5297_v41 = vld [vmem:[#allocation2 + $0xc9] sm:$0xff] }
 0x1b7   : > { %4078 = vmatmul.msk.f32.gmra.mxu2 %vm310_vm0, %v5282_v36 }
 0x1ba   : > { %v1071_v35 = vpop.f32.mrf.mxu2 }
 0x1bb   : > { %v5289_v37 = vadd.f32 %v1071_v35, %v862_v24  ;;  %v865_v22 = vpop.f32.mrf.mxu1  ;;  %v1148_v35 = vld [vmem:[%s6717_s2 + $0x40] sm:$0xff]  ;;  %v517_v24 = vpop.f32.mrf.mxu3 }
 0x1bc   : > { %4030 = vmatmul.msk.f32.gmra.mxu0 %vm310_vm0, %v1418_v52  ;;  %1263 = vmatpush.msrb.mxu3 %v1148_v35  ;;  %v5305_v29 = vadd.f32 %v517_v24, %v4718_v34  ;;  %v5310_v15 = vpop.f32.mrf.mxu0  ;;  %v5317_v34 = vld [vmem:[#allocation2 + $0xd1] sm:$0xff] }
 0x1bd   : > { %6768 = vst [vmem:[#allocation35_spill] sm:$0xff] %v5310_v15  ;;  %v2534_v15 = vld [vmem:[%s6717_s2 + $0xe0] sm:$0xff] }
 0x1be   : > { %3967 = vmatmul.msk.f32.gmra.mxu3 %vm310_vm0, %v1417_v48  ;;  %4047 = vmatmul.msk.f32.gmra.mxu1 %vm310_vm0, %v4889_v47  ;;  %6767 = vst [vmem:[#allocation34_spill] sm:$0xff] %v5305_v29  ;;  %v551_v48 = vmax.f32 %v5305_v29, 0.0 }
 0x1bf   : > { %4079 = vmatmul.msk.f32.gmra.mxu2 %vm310_vm0, %v5297_v41 }
 0x1c0   : > { %625 = vst.msk [vmem:[#allocation2 + $0x210] sm:$0xff] %vm310_vm0, %v551_v48  ;;  %v2537_v48 = vld [vmem:[%s6717_s2 + $0xf8] sm:$0xff] }
 0x1c1   : > { %2646 = vmatpush.msra.mxu0 %v2537_v48 }
 0x1c2   : > { %v1074_v32 = vpop.f32.mrf.mxu2 }
 0x1c3   : > { %v5307_v30 = vadd.f32 %v1074_v32, %v865_v22  ;;  %v868_v47 = vpop.f32.mrf.mxu1  ;;  %v1420_v32 = vld [vmem:[#allocation2 + $0x1cf] sm:$0xff] }
 0x1c4   : > { %4031 = vmatmul.msk.f32.gmra.mxu0 %vm310_vm0, %v1419_v2 }
 0x1c6   : > { %3968 = vmatmul.msk.f32.gmra.mxu3 %vm310_vm0, %v1418_v52  ;;  %4048 = vmatmul.msk.f32.gmra.mxu1 %vm310_vm0, %v4902_v53  ;;  %v5327_v52 = vpop.f32.mrf.mxu0  ;;  %v5332_v53 = vld [vmem:[#allocation2 + $0xe9] sm:$0xff] }
 0x1c7   : > { %4080 = vmatmul.msk.f32.gmra.mxu2 %vm310_vm0, %v5317_v34  ;;  %6769 = vst [vmem:[#allocation36_spill] sm:$0xff] %v5327_v52  ;;  %v1421_v52 = vld [vmem:[#allocation2 + $0x1e7] sm:$0xff]  ;;  %v1424_v20 = vld [vmem:[#allocation2 + $0x20f] sm:$0xff] }
 0x1ca   : > { %v1077_v22 = vpop.f32.mrf.mxu2 }
 0x1cb   : > { %v5321_v35 = vadd.f32 %v1077_v22, %v868_v47  ;;  %v871_v24 = vpop.f32.mrf.mxu1  ;;  %v2260_v47 = vld [vmem:[%s6717_s2 + $0xd8] sm:$0xff]  ;;  %v2536_v22 = vld [vmem:[%s6717_s2 + $0xf0] sm:$0xff] }
 0x1cc   : > { %4032 = vmatmul.msk.f32.gmra.mxu0 %vm310_vm0, %v1420_v32  ;;  %2369 = vmatpush.msra.mxu3 %v2260_v47  ;;  %v5354_v47 = vld [vmem:[#allocation2 + $0xf1] sm:$0xff] }
 0x1cd   : > { %2647 = vmatpush.msra.mxu0 %v2536_v22 }
 0x1ce   : > { %3969 = vmatmul.msk.f32.gmra.mxu3 %vm310_vm0, %v1419_v2  ;;  %4049 = vmatmul.msk.f32.gmra.mxu1 %vm310_vm0, %v4918_v60  ;;  %v2535_v60 = vld [vmem:[%s6717_s2 + $0xe8] sm:$0xff]  ;;  %v5361_v22 = vpop.f32.mrf.mxu0 }
 0x1cf   : > { %4081 = vmatmul.msk.f32.gmra.mxu2 %vm310_vm0, %v5332_v53  ;;  %2648 = vmatpush.msra.mxu0 %v2535_v60  ;;  %6770 = vst [vmem:[#allocation37_spill] sm:$0xff] %v5361_v22  ;;  %v1423_v22 = vld [vmem:[#allocation2 + $0x207] sm:$0xff] }
 0x1d1   : > { %2649 = vmatpush.msra.mxu0 %v2534_v15 }
 0x1d2   : > { %v1080_v48 = vpop.f32.mrf.mxu2 }
 0x1d3   : > { %v5345_v2 = vadd.f32 %v1080_v48, %v871_v24  ;;  %v874_v29 = vpop.f32.mrf.mxu1  ;;  %v2814_v24 = vld [vmem:[%s6717_s2 + $0x118] sm:$0xff] }
 0x1d4   : > { %4033 = vmatmul.msk.f32.gmra.mxu0 %vm310_vm0, %v1421_v52  ;;  %2923 = vmatpush.msra.mxu1 %v2814_v24 }
 0x1d6   : > { %3970 = vmatmul.msk.f32.gmra.mxu3 %vm310_vm0, %v1420_v32  ;;  %4050 = vmatmul.msk.f32.gmra.mxu1 %vm310_vm0, %v4933_v1  ;;  %v1422_v32 = vld [vmem:[#allocation2 + $0x1ef] sm:$0xff]  ;;  %v5373_v24 = vpop.f32.mrf.mxu0 }
 0x1d7   : > { %4082 = vmatmul.msk.f32.gmra.mxu2 %vm310_vm0, %v5354_v47  ;;  %v5369_v1 = vld [vmem:[#allocation2 + $0x109] sm:$0xff]  ;;  %6771 = vst [vmem:[#allocation38_spill] sm:$0xff] %v5373_v24 }
 0x1da   : > { %v1083_v48 = vpop.f32.mrf.mxu2 }
 0x1db   : > { %v5363_v60 = vadd.f32 %v1083_v48, %v874_v29  ;;  %v877_v15 = vpop.f32.mrf.mxu1 }
 0x1dc   : > { %4034 = vmatmul.msk.f32.gmra.mxu0 %vm310_vm0, %v1422_v32 }
 0x1de   : > { %3971 = vmatmul.msk.f32.gmra.mxu3 %vm310_vm0, %v1421_v52  ;;  %4051 = vmatmul.msk.f32.gmra.mxu1 %vm310_vm0, %v4948_v8  ;;  %v5381_v8 = vld [vmem:[#allocation2 + $0x111] sm:$0xff] }
 0x1df   : > { %4083 = vmatmul.msk.f32.gmra.mxu2 %vm310_vm0, %v5369_v1 }
 0x1e2   : > { %v1086_v44 = vpop.f32.mrf.mxu2 }
 0x1e3   : > { %v5375_v29 = vadd.f32 %v1086_v44, %v877_v15  ;;  %v880_v48 = vpop.f32.mrf.mxu1  ;;  %v1116_v44 = vld [vmem:[#allocation2 + $0x9] sm:$0xff]  ;;  %v5389_v15 = vpop.f32.mrf.mxu0 }
 0x1e4   : > { %4035 = vmatmul.msk.f32.gmra.mxu0 %vm310_vm0, %v1423_v22  ;;  %6775 = vst [vmem:[#allocation42_spill] sm:$0xff] %v5389_v15 }
 0x1e5   : > { %6772 = vst [vmem:[#allocation39_spill] sm:$0xff] %v5375_v29  ;;  %v2514_v29 = vld [vmem:[#allocation2 + $0x108] sm:$0xff] }
 0x1e6   : > { %3972 = vmatmul.msk.f32.gmra.mxu3 %vm310_vm0, %v1422_v32  ;;  %4052 = vmatmul.msk.f32.gmra.mxu1 %vm310_vm0, %v4969_v18  ;;  %v5395_v18 = vld [vmem:[#allocation2 + $0x129] sm:$0xff] }
 0x1e7   : > { %4084 = vmatmul.msk.f32.gmra.mxu2 %vm310_vm0, %v5381_v8 }
 0x1ea   : > { %v1089_v52 = vpop.f32.mrf.mxu2 }
 0x1eb   : > { %v5385_v13 = vadd.f32 %v1089_v52, %v880_v48  ;;  %v5387_v24 = vpop.f32.mrf.mxu1  ;;  %v2502_v48 = vld [vmem:[#allocation2 + $0x48] sm:$0xff]  ;;  %v1117_v52 = vld [vmem:[#allocation2 + $0x11] sm:$0xff]  ;;  %v5404_v15 = vpop.f32.mrf.mxu0 }
 0x1ec   : > { %6774 = vst [vmem:[#allocation41_spill] sm:$0xff] %v5387_v24  ;;  %4036 = vmatmul.msk.f32.gmra.mxu0 %vm310_vm0, %v1424_v20  ;;  %v5409_v20 = vld [vmem:[#allocation2 + $0x131] sm:$0xff] }
 0x1ed   : > { %6773 = vst [vmem:[#allocation40_spill] sm:$0xff] %v5385_v13 }
 0x1ee   : > { %3973 = vmatmul.msk.f32.vlgmr.msrb.gmra.mxu3 %vm310_vm0, %v1116_v44  ;;  %4053 = vmatmul.msk.f32.gmra.mxu1 %vm310_vm0, %v4988_v27  ;;  %6777 = vst [vmem:[#allocation44_spill] sm:$0xff] %v5404_v15 }
 0x1ef   : > { %4085 = vmatmul.msk.f32.gmra.mxu2 %vm310_vm0, %v5395_v18 }
 0x1f1   : > { %v5399_v22 = vpop.f32.mrf.mxu3 }
 0x1f3   : > { %v5401_v32 = vpop.f32.mrf.mxu1 }
 0x1f4   : > { %6776 = vst [vmem:[#allocation43_spill] sm:$0xff] %v5401_v32  ;;  %4133 = vmatmul.msk.f32.vlgmr.msra.gmra.mxu0 %vm310_vm0, %v2502_v48  ;;  %v2503_v32 = vld [vmem:[#allocation2 + $0x50] sm:$0xff] }
 0x1f5   : > { %v5422_v48 = vld [vmem:[#allocation2 + $0x149] sm:$0xff] }
 0x1f6   : > { %3974 = vmatmul.msk.f32.gmra.mxu3 %vm310_vm0, %v1117_v52  ;;  %4054 = vmatmul.msk.f32.gmra.mxu1 %vm310_vm0, %v5003_v38  ;;  %v5426_v38 = vpop.f32.mrf.mxu0 }
 0x1f7   : > { %4086 = vmatmul.msk.f32.gmra.mxu2 %vm310_vm0, %v5409_v20  ;;  %6779 = vst [vmem:[#allocation46_spill] sm:$0xff] %v5426_v38  ;;  %v2505_v38 = vld [vmem:[#allocation2 + $0x70] sm:$0xff] }
 0x1f9   : > { %v5413_v27 = vpop.f32.mrf.mxu3 }
 0x1fb   : > { %v5415_v44 = vpop.f32.mrf.mxu1 }
 0x1fc   : > { %6778 = vst [vmem:[#allocation45_spill] sm:$0xff] %v5415_v44  ;;  %4134 = vmatmul.msk.f32.gmra.mxu0 %vm310_vm0, %v2503_v32  ;;  %v2504_v44 = vld [vmem:[#allocation2 + $0x68] sm:$0xff] }
 0x1fe   : > { %3975 = vmatmul.msk.f32.gmra.mxu3 %vm310_vm0, %v5134_v62  ;;  %4055 = vmatmul.msk.f32.gmra.mxu1 %vm310_vm0, %v5041_v5  ;;  %v5437_v5 = vld [vmem:[#allocation2 + $0x151] sm:$0xff]  ;;  %v5443_v32 = vpop.f32.mrf.mxu0 }
 0x1ff   : > { %4087 = vmatmul.msk.f32.gmra.mxu2 %vm310_vm0, %v5422_v48  ;;  %6781 = vst [vmem:[#allocation48_spill] sm:$0xff] %v5443_v32  ;;  %v2506_v32 = vld [vmem:[#allocation2 + $0x88] sm:$0xff] }
 0x201   : > { %v5428_v52 = vpop.f32.mrf.mxu3 }
 0x203   : > { %v5430_v15 = vpop.f32.mrf.mxu1 }
 0x204   : > { %6780 = vst [vmem:[#allocation47_spill] sm:$0xff] %v5430_v15  ;;  %4135 = vmatmul.msk.f32.gmra.mxu0 %vm310_vm0, %v2504_v44 }
 0x206   : > { %3976 = vmatmul.msk.f32.gmra.mxu3 %vm310_vm0, %v5155_v40  ;;  %4056 = vmatmul.msk.f32.gmra.mxu1 %vm310_vm0, %v5063_v31  ;;  %v5452_v31 = vld [vmem:[#allocation2 + $0x169] sm:$0xff] }
 0x207   : > { %4088 = vmatmul.msk.f32.gmra.mxu2 %vm310_vm0, %v5437_v5  ;;  %v2259_v40 = vld [vmem:[%s6717_s2 + $0xd0] sm:$0xff] }
 0x208   : > { %2370 = vmatpush.msra.mxu3 %v2259_v40  ;;  %v2813_v40 = vld [vmem:[%s6717_s2 + $0x110] sm:$0xff] }
 0x209   : > { %v5441_v62 = vpop.f32.mrf.mxu3  ;;  %2924 = vmatpush.msra.mxu1 %v2813_v40  ;;  %v5492_v40 = vpop.f32.mrf.mxu2 }
 0x20a   : > { %6787 = vst [vmem:[#allocation54_spill] sm:$0xff] %v5492_v40 }
 0x20b   : > { %v5445_v15 = vpop.f32.mrf.mxu1 }
 0x20c   : > { %6782 = vst [vmem:[#allocation49_spill] sm:$0xff] %v5445_v15  ;;  %4136 = vmatmul.msk.f32.gmra.mxu0 %vm310_vm0, %v2505_v38  ;;  %v5461_v38 = vpop.f32.mrf.mxu0 }
 0x20d   : > { %6783 = vst [vmem:[#allocation50_spill] sm:$0xff] %v5461_v38 }
 0x20e   : > { %3977 = vmatmul.msk.f32.gmra.mxu3 %vm310_vm0, %v5172_v49  ;;  %4057 = vmatmul.msk.f32.gmra.mxu1 %vm310_vm0, %v5083_v55  ;;  %v5470_v55 = vld [vmem:[#allocation2 + $0x171] sm:$0xff] }
 0x20f   : > { %4089 = vmatmul.msk.f32.gmra.mxu2 %vm310_vm0, %v5452_v31 }
 0x211   : > { %v5459_v44 = vpop.f32.mrf.mxu3  ;;  %v5511_v11 = vpop.f32.mrf.mxu2 }
 0x212   : > { %6790 = vst [vmem:[#allocation57_spill] sm:$0xff] %v5511_v11  ;;  %v2510_v11 = vld [vmem:[#allocation2 + $0xc8] sm:$0xff] }
 0x213   : > { %v5464_v15 = vpop.f32.mrf.mxu1 }
 0x214   : > { %4137 = vmatmul.msk.f32.gmra.mxu0 %vm310_vm0, %v2506_v32  ;;  %6784 = vst [vmem:[#allocation51_spill] sm:$0xff] %v5464_v15  ;;  %v2507_v32 = vld [vmem:[#allocation2 + $0x90] sm:$0xff]  ;;  %v5480_v15 = vpop.f32.mrf.mxu0 }
 0x215   : > { %6785 = vst [vmem:[#allocation52_spill] sm:$0xff] %v5480_v15 }
 0x216   : > { %3978 = vmatmul.msk.f32.gmra.mxu3 %vm310_vm0, %v5188_v57  ;;  %4058 = vmatmul.msk.f32.gmra.mxu1 %vm310_vm0, %v5104_v25  ;;  %v5486_v25 = vld [vmem:[#allocation2 + $0x189] sm:$0xff] }
 0x217   : > { %4090 = vmatmul.msk.f32.gmra.mxu2 %vm310_vm0, %v5470_v55 }
 0x219   : > { %v5477_v38 = vpop.f32.mrf.mxu3 }
 0x21b   : > { %v5490_v24 = vpop.f32.mrf.mxu1 }
 0x21c   : > { %4138 = vmatmul.msk.f32.gmra.mxu0 %vm310_vm0, %v2507_v32  ;;  %6786 = vst [vmem:[#allocation53_spill] sm:$0xff] %v5490_v24  ;;  %v2508_v32 = vld [vmem:[#allocation2 + $0xa8] sm:$0xff]  ;;  %v5505_v15 = vpop.f32.mrf.mxu0 }
 0x21d   : > { %6788 = vst [vmem:[#allocation55_spill] sm:$0xff] %v5505_v15 }
 0x21e   : > { %3979 = vmatmul.msk.f32.gmra.mxu3 %vm310_vm0, %v5204_v3  ;;  %4059 = vmatmul.msk.f32.gmra.mxu1 %vm310_vm0, %v5126_v58  ;;  %v5501_v58 = vld [vmem:[#allocation2 + $0x191] sm:$0xff] }
 0x21f   : > { %4091 = vmatmul.msk.f32.gmra.mxu2 %vm310_vm0, %v5486_v25 }
 0x221   : > { %v5494_v7 = vpop.f32.mrf.mxu3 }
 0x223   : > { %v5509_v40 = vpop.f32.mrf.mxu1 }
 0x224   : > { %4139 = vmatmul.msk.f32.gmra.mxu0 %vm310_vm0, %v2508_v32  ;;  %6789 = vst [vmem:[#allocation56_spill] sm:$0xff] %v5509_v40  ;;  %v2509_v32 = vld [vmem:[#allocation2 + $0xb0] sm:$0xff]  ;;  %v5522_v4 = vpop.f32.mrf.mxu0 }
 0x225   : > { %6791 = vst [vmem:[#allocation58_spill] sm:$0xff] %v5522_v4  ;;  %v2511_v4 = vld [vmem:[#allocation2 + $0xd0] sm:$0xff] }
 0x226   : > { %3980 = vmatmul.msk.f32.gmra.mxu3 %vm310_vm0, %v5223_v10  ;;  %4060 = vmatmul.msk.f32.gmra.mxu1 %vm310_vm0, %v5148_v43  ;;  %v5518_v43 = vld [vmem:[#allocation2 + $0x1a9] sm:$0xff] }
 0x227   : > { %4092 = vmatmul.msk.f32.gmra.mxu2 %vm310_vm0, %v5501_v58 }
 0x229   : > { %v5507_v24 = vpop.f32.mrf.mxu3 }
 0x22b   : > { %v5527_v13 = vpop.f32.mrf.mxu1 }
 0x22c   : > { %4140 = vmatmul.msk.f32.gmra.mxu0 %vm310_vm0, %v2509_v32  ;;  %6793 = vst [vmem:[#allocation60_spill] sm:$0xff] %v5527_v13  ;;  %v5530_v32 = vpop.f32.mrf.mxu2  ;;  %v5543_v13 = vpop.f32.mrf.mxu0 }
 0x22d   : > { %6794 = vst [vmem:[#allocation61_spill] sm:$0xff] %v5530_v32  ;;  %v5552_v32 = vld [vmem:[#allocation2 + $0x1c9] sm:$0xff] }
 0x22e   : > { %3981 = vmatmul.msk.f32.gmra.mxu3 %vm310_vm0, %v5239_v17  ;;  %4061 = vmatmul.msk.f32.gmra.mxu1 %vm310_vm0, %v5164_v59  ;;  %v5536_v59 = vld [vmem:[#allocation2 + $0x1b1] sm:$0xff]  ;;  %6796 = vst [vmem:[#allocation63_spill] sm:$0xff] %v5543_v13 }
 0x22f   : > { %4093 = vmatmul.msk.f32.gmra.mxu2 %vm310_vm0, %v5518_v43 }
 0x231   : > { %v1092_v15 = vpop.f32.mrf.mxu3 }
 0x232   : > { %v5525_v40 = vadd.f32 %v1092_v15, %v5399_v22 }
 0x234   : > { %6792 = vst [vmem:[#allocation59_spill] sm:$0xff] %v5525_v40  ;;  %4141 = vmatmul.msk.f32.gmra.mxu0 %vm310_vm0, %v2510_v11  ;;  %v5546_v11 = vpop.f32.mrf.mxu1  ;;  %v5554_v40 = vpop.f32.mrf.mxu2 }
 0x235   : > { %6797 = vst [vmem:[#allocation64_spill] sm:$0xff] %v5546_v11  ;;  %v5562_v13 = vpop.f32.mrf.mxu0  ;;  %v5568_v11 = vld [vmem:[#allocation2 + $0x1d1] sm:$0xff] }
 0x236   : > { %3982 = vmatmul.msk.f32.gmra.mxu3 %vm310_vm0, %v5257_v16  ;;  %4062 = vmatmul.msk.f32.gmra.mxu1 %vm310_vm0, %v5180_v61  ;;  %6798 = vst [vmem:[#allocation65_spill] sm:$0xff] %v5554_v40 }
 0x237   : > { %4094 = vmatmul.msk.f32.gmra.mxu2 %vm310_vm0, %v5536_v59  ;;  %6800 = vst [vmem:[#allocation67_spill] sm:$0xff] %v5562_v13  ;;  %v2513_v13 = vld [vmem:[#allocation2 + $0xf0] sm:$0xff] }
 0x239   : > { %v1095_v15 = vpop.f32.mrf.mxu3 }
 0x23a   : > { %v5541_v22 = vadd.f32 %v1095_v15, %v5413_v27 }
 0x23c   : > { %6795 = vst [vmem:[#allocation62_spill] sm:$0xff] %v5541_v22  ;;  %4142 = vmatmul.msk.f32.gmra.mxu0 %vm310_vm0, %v2511_v4  ;;  %v2512_v4 = vld [vmem:[#allocation2 + $0xe8] sm:$0xff]  ;;  %v5572_v40 = vpop.f32.mrf.mxu1  ;;  %v2811_v22 = vld [vmem:[%s6717_s2 + $0x100] sm:$0xff] }
 0x23d   : > { %6801 = vst [vmem:[#allocation68_spill] sm:$0xff] %v5572_v40 }
 0x23e   : > { %3983 = vmatmul.msk.f32.gmra.mxu3 %vm310_vm0, %v5267_v63  ;;  %4063 = vmatmul.msk.f32.gmra.mxu1 %vm310_vm0, %v5196_v26 }
 0x23f   : > { %4095 = vmatmul.msk.f32.gmra.mxu2 %vm310_vm0, %v5552_v32 }
 0x241   : > { %v1098_v27 = vpop.f32.mrf.mxu3 }
 0x242   : > { %v5559_v15 = vadd.f32 %v1098_v27, %v5428_v52  ;;  %v5574_v52 = vpop.f32.mrf.mxu2 }
 0x243   : > { %6802 = vst [vmem:[#allocation69_spill] sm:$0xff] %v5574_v52 }
 0x244   : > { %6799 = vst [vmem:[#allocation66_spill] sm:$0xff] %v5559_v15  ;;  %4143 = vmatmul.msk.f32.gmra.mxu0 %vm310_vm0, %v2512_v4  ;;  %v2812_v15 = vld [vmem:[%s6717_s2 + $0x108] sm:$0xff]  ;;  %v5599_v40 = vpop.f32.mrf.mxu1 }
 0x245   : > { %2925 = vmatpush.msra.mxu1 %v2812_v15  ;;  %6805 = vst [vmem:[#allocation72_spill] sm:$0xff] %v5599_v40 }
 0x246   : > { %3984 = vmatmul.msk.f32.gmra.mxu3 %vm310_vm0, %v5282_v36  ;;  %4064 = vmatmul.msk.f32.gmra.mxu1 %vm310_vm0, %v5215_v50 }
 0x247   : > { %4096 = vmatmul.msk.f32.gmra.mxu2 %vm310_vm0, %v5568_v11  ;;  %2926 = vmatpush.msra.mxu1 %v2811_v22  ;;  %v5611_v22 = vld [vmem:[#allocation2 + $0x1f1] sm:$0xff] }
 0x249   : > { %v1101_v27 = vpop.f32.mrf.mxu3 }
 0x24a   : > { %v5577_v4 = vadd.f32 %v1101_v27, %v5441_v62  ;;  %v5590_v62 = vld [vmem:[#allocation2 + $0x1e9] sm:$0xff] }
 0x24b   : > { %v2258_v27 = vld [vmem:[%s6717_s2 + $0xc8] sm:$0xff] }
 0x24c   : > { %6803 = vst [vmem:[#allocation70_spill] sm:$0xff] %v5577_v4  ;;  %4144 = vmatmul.msk.f32.gmra.mxu0 %vm310_vm0, %v2513_v13  ;;  %v5597_v13 = vpop.f32.mrf.mxu0  ;;  %2371 = vmatpush.msra.mxu3 %v2258_v27  ;;  %v5604_v4 = vpop.f32.mrf.mxu2 }
 0x24d   : > { %6804 = vst [vmem:[#allocation71_spill] sm:$0xff] %v5597_v13  ;;  %v5620_v40 = vpop.f32.mrf.mxu1 }
 0x24e   : > { %3985 = vmatmul.msk.f32.gmra.mxu3 %vm310_vm0, %v5297_v41  ;;  %4065 = vmatmul.msk.f32.gmra.mxu1 %vm310_vm0, %v5229_v14  ;;  %6807 = vst [vmem:[#allocation74_spill] sm:$0xff] %v5604_v4 }
 0x24f   : > { %4097 = vmatmul.msk.f32.gmra.mxu2 %vm310_vm0, %v5590_v62  ;;  %6810 = vst [vmem:[#allocation77_spill] sm:$0xff] %v5620_v40 }
 0x251   : > { %v1104_v15 = vpop.f32.mrf.mxu3 }
 0x252   : > { %v5602_v52 = vadd.f32 %v1104_v15, %v5459_v44  ;;  %v2515_v15 = vld [vmem:[#allocation2 + $0x110] sm:$0xff] }
 0x254   : > { %6806 = vst [vmem:[#allocation73_spill] sm:$0xff] %v5602_v52  ;;  %4145 = vmatmul.msk.f32.gmra.mxu0 %vm310_vm0, %v2514_v29  ;;  %v5615_v13 = vpop.f32.mrf.mxu0  ;;  %v3124_v29 = vld [vmem:[%s6718_s3 + $0x18] sm:$0xff]  ;;  %v5626_v4 = vpop.f32.mrf.mxu2  ;;  %v5628_v52 = vld [vmem:[#allocation2 + $0x208] sm:$0xff] }
 0x255   : > { %6808 = vst [vmem:[#allocation75_spill] sm:$0xff] %v5615_v13  ;;  %3234 = vmatpush.msra.mxu2 %v3124_v29  ;;  %v2516_v13 = vld [vmem:[#allocation2 + $0x128] sm:$0xff]  ;;  %v5644_v29 = vld [vmem:[#allocation2 + $0x210] sm:$0xff] }
 0x256   : > { %3986 = vmatmul.msk.f32.gmra.mxu3 %vm310_vm0, %v5317_v34  ;;  %4066 = vmatmul.msk.f32.gmra.mxu1 %vm310_vm0, %v5248_v9  ;;  %6811 = vst [vmem:[#allocation78_spill] sm:$0xff] %v5626_v4  ;;  %v5646_v4 = vpop.f32.mrf.mxu1 }
 0x257   : > { %4098 = vmatmul.msk.f32.gmra.mxu2 %vm310_vm0, %v5611_v22  ;;  %6815 = vst [vmem:[#allocation82_spill] sm:$0xff] %v5646_v4 }
 0x259   : > { %v1107_v27 = vpop.f32.mrf.mxu3 }
 0x25a   : > { %v5618_v44 = vadd.f32 %v1107_v27, %v5477_v38  ;;  %v5634_v38 = vld [vmem:[#allocation2 + $0x209] sm:$0xff] }
 0x25b   : > { %6812 = vst [vmem:[#allocation79_spill] sm:$0xff] %v5634_v38 }
 0x25c   : > { %6809 = vst [vmem:[#allocation76_spill] sm:$0xff] %v5618_v44  ;;  %4146 = vmatmul.msk.f32.gmra.mxu0 %vm310_vm0, %v2515_v15  ;;  %v5641_v40 = vpop.f32.mrf.mxu0  ;;  %v5652_v44 = vld [vmem:[#allocation2 + $0x211] sm:$0xff] }
 0x25d   : > { %6814 = vst [vmem:[#allocation81_spill] sm:$0xff] %v5641_v40 }
 0x25e   : > { %3987 = vmatmul.msk.f32.gmra.mxu3 %vm310_vm0, %v5332_v53  ;;  %4067 = vmatmul.msk.f32.gmra.mxu1 %vm310_vm0, %v5628_v52  ;;  %v5668_v4 = vpop.f32.mrf.mxu1 }
 0x25f   : > { %4099 = vmatmul.msk.f32.gmra.mxu2 %vm310_vm0, %v5634_v38  ;;  %v5654_v38 = vpop.f32.mrf.mxu2  ;;  %6818 = vst [vmem:[#allocation85_spill] sm:$0xff] %v5668_v4 }
 0x260   : > { %6816 = vst [vmem:[#allocation83_spill] sm:$0xff] %v5654_v38 }
 0x261   : > { %v1110_v27 = vpop.f32.mrf.mxu3 }
 0x262   : > { %v5639_v15 = vadd.f32 %v1110_v27, %v5494_v7  ;;  %v2517_v27 = vld [vmem:[#allocation2 + $0x130] sm:$0xff] }
 0x264   : > { %6813 = vst [vmem:[#allocation80_spill] sm:$0xff] %v5639_v15  ;;  %4147 = vmatmul.msk.f32.gmra.mxu0 %vm310_vm0, %v2516_v13  ;;  %v5662_v40 = vpop.f32.mrf.mxu0  ;;  %v2518_v15 = vld [vmem:[#allocation2 + $0x148] sm:$0xff] }
 0x265   : > { %6817 = vst [vmem:[#allocation84_spill] sm:$0xff] %v5662_v40 }
 0x266   : > { %3988 = vmatmul.msk.f32.gmra.mxu3 %vm310_vm0, %v5354_v47  ;;  %4068 = vmatmul.msk.f32.gmra.mxu1 %vm310_vm0, %v5644_v29 }
 0x267   : > { %4100 = vmatmul.msk.f32.gmra.mxu2 %vm310_vm0, %v5652_v44 }
 0x269   : > { %v1113_v7 = vpop.f32.mrf.mxu3 }
 0x26a   : > { %v5659_v13 = vadd.f32 %v1113_v7, %v5507_v24 }
 0x26c   : > { %4148 = vmatmul.msk.f32.gmra.mxu0 %vm310_vm0, %v2517_v27  ;;  %v5677_v24 = vpop.f32.mrf.mxu0  ;;  %v5681_v27 = vpop.f32.mrf.mxu1 }
 0x26d   : > { %6819 = vst [vmem:[#allocation86_spill] sm:$0xff] %v5677_v24  ;;  %v2520_v24 = vld [vmem:[#allocation2 + $0x168] sm:$0xff] }
 0x26e   : > { %3989 = vmatmul.msk.f32.gmra.mxu3 %vm310_vm0, %v5369_v1  ;;  %4165 = vmatmul.msk.f32.vlgmr.msra.gmra.mxu1 %vm310_vm0, %v5172_v49  ;;  %6820 = vst [vmem:[#allocation87_spill] sm:$0xff] %v5681_v27  ;;  %v2519_v49 = vld [vmem:[#allocation2 + $0x150] sm:$0xff] }
 0x26f   : > { %v2521_v27 = vld [vmem:[#allocation2 + $0x170] sm:$0xff] }
 0x271   : > { %v5670_v38 = vpop.f32.mrf.mxu3 }
 0x274   : > { %4149 = vmatmul.msk.f32.gmra.mxu0 %vm310_vm0, %v2518_v15  ;;  %v5688_v40 = vpop.f32.mrf.mxu0  ;;  %v5693_v4 = vpop.f32.mrf.mxu1 }
 0x275   : > { %6821 = vst [vmem:[#allocation88_spill] sm:$0xff] %v5688_v40 }
 0x276   : > { %3990 = vmatmul.msk.f32.gmra.mxu3 %vm310_vm0, %v5381_v8  ;;  %4166 = vmatmul.msk.f32.gmra.mxu1 %vm310_vm0, %v5188_v57 }
 0x279   : > { %v5679_v7 = vpop.f32.mrf.mxu3 }
 0x27c   : > { %4150 = vmatmul.msk.f32.gmra.mxu0 %vm310_vm0, %v2519_v49  ;;  %v5703_v40 = vpop.f32.mrf.mxu0 }
 0x27d   : > { %6822 = vst [vmem:[#allocation89_spill] sm:$0xff] %v5703_v40  ;;  %v2523_v40 = vld [vmem:[#allocation2 + $0x190] sm:$0xff] }
 0x27e   : > { %3991 = vmatmul.msk.f32.gmra.mxu3 %vm310_vm0, %v5395_v18  ;;  %4167 = vmatmul.msk.f32.gmra.mxu1 %vm310_vm0, %v5204_v3 }
 0x281   : > { %v1271_v15 = vpop.f32.mrf.mxu3 }
 0x282   : > { %v5691_v57 = vadd.f32 %v1271_v15, %v4998_v33  ;;  %v5706_v33 = vpop.f32.mrf.mxu1  ;;  %v2522_v15 = vld [vmem:[#allocation2 + $0x188] sm:$0xff] }
 0x284   : > { %4151 = vmatmul.msk.f32.gmra.mxu0 %vm310_vm0, %v2520_v24 }
 0x286   : > { %3992 = vmatmul.msk.f32.gmra.mxu3 %vm310_vm0, %v5409_v20  ;;  %4168 = vmatmul.msk.f32.gmra.mxu1 %vm310_vm0, %v5223_v10  ;;  %v2257_v10 = vld [vmem:[%s6717_s2 + $0xc0] sm:$0xff] }
 0x287   : > { %2372 = vmatpush.msra.mxu3 %v2257_v10 }
 0x289   : > { %v1274_v49 = vpop.f32.mrf.mxu3 }
 0x28a   : > { %v5701_v3 = vadd.f32 %v1274_v49, %v5024_v51 }
 0x28c   : > { %4152 = vmatmul.msk.f32.gmra.mxu0 %vm310_vm0, %v2521_v27  ;;  %v5719_v27 = vpop.f32.mrf.mxu0 }
 0x28d   : > { %6823 = vst [vmem:[#allocation90_spill] sm:$0xff] %v5719_v27  ;;  %v2234_v27 = vld [vmem:[#allocation2 + $0xcf] sm:$0xff] }
 0x28e   : > { %3993 = vmatmul.msk.f32.gmra.mxu3 %vm310_vm0, %v5422_v48  ;;  %4169 = vmatmul.msk.f32.gmra.mxu1 %vm310_vm0, %v5239_v17  ;;  %v5725_v17 = vpop.f32.mrf.mxu1 }
 0x291   : > { %v1277_v51 = vpop.f32.mrf.mxu3 }
 0x292   : > { %v5716_v24 = vadd.f32 %v1277_v51, %v5054_v21  ;;  %v3123_v21 = vld [vmem:[%s6718_s3 + $0x10] sm:$0xff] }
 0x293   : > { %3235 = vmatpush.msra.mxu2 %v3123_v21 }
 0x294   : > { %4153 = vmatmul.msk.f32.gmra.mxu0 %vm310_vm0, %v2522_v15 }
 0x296   : > { %3994 = vmatmul.msk.f32.gmra.mxu3 %vm310_vm0, %v5437_v5  ;;  %4170 = vmatmul.msk.f32.gmra.mxu1 %vm310_vm0, %v5257_v16  ;;  %v5738_v16 = vpop.f32.mrf.mxu0  ;;  %v5740_v15 = vpop.f32.mrf.mxu1 }
 0x297   : > { %6824 = vst [vmem:[#allocation91_spill] sm:$0xff] %v5738_v16 }
 0x299   : > { %v1280_v49 = vpop.f32.mrf.mxu3 }
 0x29a   : > { %v5728_v10 = vadd.f32 %v1280_v49, %v5075_v42 }
 0x29c   : > { %4154 = vmatmul.msk.f32.gmra.mxu0 %vm310_vm0, %v2523_v40  ;;  %v2524_v40 = vld [vmem:[#allocation2 + $0x1a8] sm:$0xff] }
 0x29e   : > { %3995 = vmatmul.msk.f32.gmra.mxu3 %vm310_vm0, %v5452_v31  ;;  %4171 = vmatmul.msk.f32.gmra.mxu1 %vm310_vm0, %v5267_v63  ;;  %v5750_v21 = vpop.f32.mrf.mxu0  ;;  %v5755_v16 = vpop.f32.mrf.mxu1 }
 0x29f   : > { %6825 = vst [vmem:[#allocation92_spill] sm:$0xff] %v5755_v16 }
 0x2a1   : > { %v1283_v51 = vpop.f32.mrf.mxu3 }
 0x2a2   : > { %v5743_v42 = vadd.f32 %v1283_v51, %v5097_v0 }
 0x2a4   : > { %4155 = vmatmul.msk.f32.gmra.mxu0 %vm310_vm0, %v2524_v40 }
 0x2a6   : > { %3996 = vmatmul.msk.f32.gmra.mxu3 %vm310_vm0, %v5470_v55  ;;  %4172 = vmatmul.msk.f32.gmra.mxu1 %vm310_vm0, %v5282_v36  ;;  %v5766_v51 = vpop.f32.mrf.mxu0 }
 0x2a9   : > { %v1286_v49 = vpop.f32.mrf.mxu3 }
 0x2aa   : > { %v5753_v63 = vadd.f32 %v1286_v49, %v5117_v54  ;;  %v5770_v54 = vpop.f32.mrf.mxu1 }
 0x2ab   : > { %6826 = vst [vmem:[#allocation93_spill] sm:$0xff] %v5770_v54 }
 0x2ac   : > { %4156 = vmatmul.msk.f32.gmra.mxu0 %vm310_vm0, %v5180_v61 }
 0x2ae   : > { %3997 = vmatmul.msk.f32.gmra.mxu3 %vm310_vm0, %v5486_v25  ;;  %4173 = vmatmul.msk.f32.gmra.mxu1 %vm310_vm0, %v5297_v41 }
 0x2b1   : > { %v1289_v0 = vpop.f32.mrf.mxu3 }
 0x2b2   : > { %v5764_v36 = vadd.f32 %v1289_v0, %v5141_v12  ;;  %v5781_v12 = vpop.f32.mrf.mxu0 }
 0x2b4   : > { %4157 = vmatmul.msk.f32.gmra.mxu0 %vm310_vm0, %v5196_v26  ;;  %v5787_v26 = vpop.f32.mrf.mxu1 }
 0x2b5   : > { %6827 = vst [vmem:[#allocation94_spill] sm:$0xff] %v5787_v26  ;;  %v6859_v26 = vld [vmem:[#allocation24_spill] sm:$0xff] }
 0x2b6   : > { %3998 = vmatmul.msk.f32.gmra.mxu3 %vm310_vm0, %v5501_v58  ;;  %4174 = vmatmul.msk.f32.gmra.mxu1 %vm310_vm0, %v5317_v34 }
 0x2b9   : > { %v1292_v61 = vpop.f32.mrf.mxu3 }
 0x2ba   : > { %v5777_v41 = vadd.f32 %v1292_v61, %v5162_v28 }
 0x2bc   : > { %4158 = vmatmul.msk.f32.gmra.mxu0 %vm310_vm0, %v5215_v50  ;;  %v5798_v50 = vpop.f32.mrf.mxu0  ;;  %v5800_v49 = vpop.f32.mrf.mxu1 }
 0x2bd   : > { %6828 = vst [vmem:[#allocation95_spill] sm:$0xff] %v5800_v49  ;;  %v6857_v49 = vld [vmem:[#allocation80_spill] sm:$0xff] }
 0x2be   : > { %3999 = vmatmul.msk.f32.gmra.mxu3 %vm310_vm0, %v5518_v43  ;;  %4175 = vmatmul.msk.f32.gmra.mxu1 %vm310_vm0, %v5332_v53 }
 0x2c1   : > { %v1295_v40 = vpop.f32.mrf.mxu3 }
 0x2c2   : > { %v5790_v34 = vadd.f32 %v1295_v40, %v5178_v23 }
 0x2c4   : > { %4159 = vmatmul.msk.f32.gmra.mxu0 %vm310_vm0, %v5229_v14  ;;  %v5811_v23 = vpop.f32.mrf.mxu0  ;;  %v5816_v0 = vpop.f32.mrf.mxu1 }
 0x2c5   : > { %6829 = vst [vmem:[#allocation96_spill] sm:$0xff] %v5816_v0  ;;  %v2239_v0 = vld [vmem:[#allocation2 + $0x127] sm:$0xff] }
 0x2c6   : > { %4000 = vmatmul.msk.f32.gmra.mxu3 %vm310_vm0, %v5536_v59  ;;  %4176 = vmatmul.msk.f32.gmra.mxu1 %vm310_vm0, %v5354_v47 }
 0x2c9   : > { %v1298_v28 = vpop.f32.mrf.mxu3 }
 0x2ca   : > { %v5803_v53 = vadd.f32 %v1298_v28, %v5194_v19  ;;  %v2225_v28 = vld [vmem:[#allocation2 + $0x47] sm:$0xff] }
 0x2cc   : > { %4160 = vmatmul.msk.f32.gmra.mxu0 %vm310_vm0, %v5248_v9 }
 0x2ce   : > { %4001 = vmatmul.msk.f32.gmra.mxu3 %vm310_vm0, %v5552_v32  ;;  %4177 = vmatmul.msk.f32.gmra.mxu1 %vm310_vm0, %v5369_v1  ;;  %v5827_v1 = vpop.f32.mrf.mxu0 }
 0x2d1   : > { %v1301_v14 = vpop.f32.mrf.mxu3 }
 0x2d2   : > { %v5814_v47 = vadd.f32 %v1301_v14, %v5211_v39  ;;  %v3122_v39 = vld [vmem:[%s6718_s3 + $0x8] sm:$0xff] }
 0x2d3   : > { %3236 = vmatpush.msra.mxu2 %v3122_v39 }
 0x2d4   : > { %4161 = vmatmul.msk.f32.gmra.mxu0 %vm310_vm0, %v5628_v52  ;;  %v5834_v52 = vpop.f32.mrf.mxu1 }
 0x2d5   : > { %6830 = vst [vmem:[#allocation97_spill] sm:$0xff] %v5834_v52  ;;  %v2237_v52 = vld [vmem:[#allocation2 + $0x107] sm:$0xff] }
 0x2d6   : > { %4002 = vmatmul.msk.f32.gmra.mxu3 %vm310_vm0, %v5568_v11  ;;  %4178 = vmatmul.msk.f32.gmra.mxu1 %vm310_vm0, %v5381_v8 }
 0x2d9   : > { %v1304_v9 = vpop.f32.mrf.mxu3 }
 0x2da   : > { %v5825_v19 = vadd.f32 %v1304_v9, %v5227_v6  ;;  %v2226_v9 = vld [vmem:[#allocation2 + $0x4f] sm:$0xff] }
 0x2dc   : > { %4162 = vmatmul.msk.f32.gmra.mxu0 %vm310_vm0, %v5644_v29  ;;  %v5847_v29 = vpop.f32.mrf.mxu1 }
 0x2dd   : > { %6831 = vst [vmem:[#allocation98_spill] sm:$0xff] %v5847_v29 }
 0x2de   : > { %4003 = vmatmul.msk.f32.gmra.mxu3 %vm310_vm0, %v5590_v62  ;;  %4179 = vmatmul.msk.f32.gmra.mxu1 %vm310_vm0, %v5395_v18 }
 0x2e1   : > { %v1307_v6 = vpop.f32.mrf.mxu3 }
 0x2e2   : > { %v5841_v8 = vadd.f32 %v1307_v6, %v5246_v46  ;;  %v2227_v6 = vld [vmem:[#allocation2 + $0x67] sm:$0xff] }
 0x2e4   : > { %v5855_v18 = vpop.f32.mrf.mxu1 }
 0x2e5   : > { %6832 = vst [vmem:[#allocation99_spill] sm:$0xff] %v5855_v18  ;;  %v2236_v18 = vld [vmem:[#allocation2 + $0xef] sm:$0xff] }
 0x2e6   : > { %4004 = vmatmul.msk.f32.gmra.mxu3 %vm310_vm0, %v5611_v22  ;;  %4180 = vmatmul.msk.f32.gmra.mxu1 %vm310_vm0, %v5409_v20 }
 0x2e9   : > { %v1310_v61 = vpop.f32.mrf.mxu3 }
 0x2ea   : > { %v5850_v40 = vadd.f32 %v1310_v61, %v5261_v56  ;;  %v2228_v61 = vld [vmem:[#allocation2 + $0x6f] sm:$0xff] }
 0x2ec   : > { %v5866_v39 = vpop.f32.mrf.mxu1 }
 0x2ed   : > { %6833 = vst [vmem:[#allocation100_spill] sm:$0xff] %v5866_v39 }
 0x2ee   : > { %4101 = vmatmul.msk.f32.vlgmr.msra.gmra.mxu3 %vm310_vm0, %v2225_v28  ;;  %4181 = vmatmul.msk.f32.gmra.mxu1 %vm310_vm0, %v5422_v48 }
 0x2f1   : > { %v1313_v46 = vpop.f32.mrf.mxu3 }
 0x2f2   : > { %v5858_v14 = vadd.f32 %v1313_v46, %v5276_v45  ;;  %v2229_v46 = vld [vmem:[#allocation2 + $0x87] sm:$0xff] }
 0x2f4   : > { %v5874_v28 = vpop.f32.mrf.mxu1 }
 0x2f5   : > { %6834 = vst [vmem:[#allocation101_spill] sm:$0xff] %v5874_v28 }
 0x2f6   : > { %4102 = vmatmul.msk.f32.gmra.mxu3 %vm310_vm0, %v2226_v9  ;;  %4182 = vmatmul.msk.f32.gmra.mxu1 %vm310_vm0, %v5437_v5 }
 0x2f9   : > { %v1316_v56 = vpop.f32.mrf.mxu3 }
 0x2fa   : > { %v5864_v20 = vadd.f32 %v1316_v56, %v5289_v37 }
 0x2fe   : > { %4103 = vmatmul.msk.f32.gmra.mxu3 %vm310_vm0, %v2227_v6  ;;  %4183 = vmatmul.msk.f32.gmra.mxu1 %vm310_vm0, %v5452_v31  ;;  %v5887_v31 = vpop.f32.mrf.mxu2  ;;  %v2230_v6 = vld [vmem:[#allocation2 + $0x8f] sm:$0xff] }
 0x301   : > { %v1319_v45 = vpop.f32.mrf.mxu3 }
 0x302   : > { %v5872_v48 = vadd.f32 %v1319_v45, %v5307_v30  ;;  %v5885_v30 = vpop.f32.mrf.mxu1 }
 0x303   : > { %6835 = vst [vmem:[#allocation102_spill] sm:$0xff] %v5885_v30  ;;  %v6842_v30 = vld [vmem:[#allocation59_spill] sm:$0xff] }
 0x306   : > { %4104 = vmatmul.msk.f32.gmra.mxu3 %vm310_vm0, %v2228_v61  ;;  %4184 = vmatmul.msk.f32.gmra.mxu1 %vm310_vm0, %v5470_v55  ;;  %v3121_v61 = vld [vmem:[%s6718_s3] sm:$0xff] }
 0x307   : > { %3237 = vmatpush.msra.mxu2 %v3121_v61  ;;  %v6840_v61 = vld [vmem:[#allocation40_spill] sm:$0xff] }
 0x309   : > { %v1322_v37 = vpop.f32.mrf.mxu3 }
 0x30a   : > { %v5880_v5 = vadd.f32 %v1322_v37, %v5321_v35  ;;  %v5895_v55 = vpop.f32.mrf.mxu1  ;;  %v6838_v37 = vld [vmem:[#allocation39_spill] sm:$0xff] }
 0x30b   : > { %6836 = vst [vmem:[#allocation103_spill] sm:$0xff] %v5895_v55  ;;  %v2233_v55 = vld [vmem:[#allocation2 + $0xc7] sm:$0xff] }
 0x30e   : > { %4105 = vmatmul.msk.f32.gmra.mxu3 %vm310_vm0, %v2229_v46  ;;  %4185 = vmatmul.msk.f32.gmra.mxu1 %vm310_vm0, %v5486_v25  ;;  %v5900_v25 = vpop.f32.mrf.mxu2 }
 0x311   : > { %v1325_v9 = vpop.f32.mrf.mxu3 }
 0x312   : > { %v5890_v56 = vadd.f32 %v1325_v9, %v5345_v2  ;;  %v2231_v2 = vld [vmem:[#allocation2 + $0xa7] sm:$0xff]  ;;  %v5911_v9 = vpop.f32.mrf.mxu1 }
 0x316   : > { %4106 = vmatmul.msk.f32.gmra.mxu3 %vm310_vm0, %v2230_v6  ;;  %4186 = vmatmul.msk.f32.gmra.mxu1 %vm310_vm0, %v5501_v58  ;;  %v2232_v6 = vld [vmem:[#allocation2 + $0xaf] sm:$0xff] }
 0x319   : > { %v1328_v35 = vpop.f32.mrf.mxu3 }
 0x31a   : > { %v5898_v45 = vadd.f32 %v1328_v35, %v5363_v60  ;;  %v5913_v60 = vpop.f32.mrf.mxu2 }
 0x31c   : > { %6837 = vst [vmem:[#allocation104_spill] sm:$0xff] %v5898_v45 }
 0x31e   : > { %4107 = vmatmul.msk.f32.gmra.mxu3 %vm310_vm0, %v2231_v2  ;;  %4187 = vmatmul.msk.f32.gmra.mxu1 %vm310_vm0, %v5518_v43  ;;  %v5921_v43 = vpop.f32.mrf.mxu1 }
 0x321   : > { %v1331_v58 = vpop.f32.mrf.mxu3 }
 0x322   : > { %v5909_v46 = vadd.f32 %v1331_v58, %v6838_v37  ;;  %v5926_v58 = vpop.f32.mrf.mxu2 }
 0x324   : > { %6839 = vst [vmem:[#allocation39_spill] sm:$0xff] %v5909_v46  ;;  %v6861_v46 = vld [vmem:[#allocation15_spill] sm:$0xff] }
 0x326   : > { %4108 = vmatmul.msk.f32.gmra.mxu3 %vm310_vm0, %v2232_v6  ;;  %4188 = vmatmul.msk.f32.gmra.mxu1 %vm310_vm0, %v5536_v59  ;;  %v5934_v59 = vpop.f32.mrf.mxu1 }
 0x329   : > { %v1334_v35 = vpop.f32.mrf.mxu3 }
 0x32a   : > { %v5919_v2 = vadd.f32 %v1334_v35, %v6840_v61  ;;  %v5936_v35 = vpop.f32.mrf.mxu2  ;;  %v6844_v61 = vld [vmem:[#allocation62_spill] sm:$0xff] }
 0x32c   : > { %6841 = vst [vmem:[#allocation40_spill] sm:$0xff] %v5919_v2  ;;  %v2240_v2 = vld [vmem:[#allocation2 + $0x12f] sm:$0xff] }
 0x32e   : > { %4109 = vmatmul.msk.f32.gmra.mxu3 %vm310_vm0, %v2233_v55  ;;  %4189 = vmatmul.msk.f32.gmra.mxu1 %vm310_vm0, %v5552_v32  ;;  %v2235_v32 = vld [vmem:[#allocation2 + $0xe7] sm:$0xff] }
 0x331   : > { %v1337_v37 = vpop.f32.mrf.mxu3 }
 0x332   : > { %v5929_v6 = vadd.f32 %v1337_v37, %v6842_v30  ;;  %v5944_v37 = vpop.f32.mrf.mxu1 }
 0x334   : > { %6843 = vst [vmem:[#allocation59_spill] sm:$0xff] %v5929_v6 }
 0x336   : > { %4110 = vmatmul.msk.f32.gmra.mxu3 %vm310_vm0, %v2234_v27  ;;  %4190 = vmatmul.msk.f32.gmra.mxu1 %vm310_vm0, %v5568_v11  ;;  %v6846_v27 = vld [vmem:[#allocation66_spill] sm:$0xff]  ;;  %v5949_v11 = vpop.f32.mrf.mxu2 }
 0x339   : > { %v1340_v55 = vpop.f32.mrf.mxu3 }
 0x33a   : > { %v5939_v28 = vadd.f32 %v1340_v55, %v6844_v61  ;;  %v6848_v61 = vld [vmem:[#allocation70_spill] sm:$0xff]  ;;  %v5957_v29 = vpop.f32.mrf.mxu1 }
 0x33c   : > { %6845 = vst [vmem:[#allocation62_spill] sm:$0xff] %v5939_v28  ;;  %v2238_v28 = vld [vmem:[#allocation2 + $0x10f] sm:$0xff] }
 0x33e   : > { %4111 = vmatmul.msk.f32.gmra.mxu3 %vm310_vm0, %v2235_v32  ;;  %4191 = vmatmul.msk.f32.gmra.mxu1 %vm310_vm0, %v5590_v62  ;;  %v5959_v62 = vpop.f32.mrf.mxu2 }
 0x341   : > { %v1343_v30 = vpop.f32.mrf.mxu3 }
 0x342   : > { %v5947_v39 = vadd.f32 %v1343_v30, %v6846_v27  ;;  %v6850_v30 = vld [vmem:[#allocation79_spill] sm:$0xff] }
 0x344   : > { %6847 = vst [vmem:[#allocation66_spill] sm:$0xff] %v5947_v39  ;;  %v6851_v39 = vld [vmem:[#allocation73_spill] sm:$0xff] }
 0x346   : > { %4112 = vmatmul.msk.f32.gmra.mxu3 %vm310_vm0, %v2236_v18  ;;  %4192 = vmatmul.msk.f32.gmra.mxu1 %vm310_vm0, %v5611_v22  ;;  %v5967_v22 = vpop.f32.mrf.mxu1 }
 0x349   : > { %v1346_v55 = vpop.f32.mrf.mxu3 }
 0x34a   : > { %v5955_v32 = vadd.f32 %v1346_v55, %v6848_v61  ;;  %v5972_v55 = vpop.f32.mrf.mxu2 }
 0x34c   : > { %6849 = vst [vmem:[#allocation70_spill] sm:$0xff] %v5955_v32  ;;  %v6853_v32 = vld [vmem:[#allocation76_spill] sm:$0xff] }
 0x34e   : > { %4113 = vmatmul.msk.f32.gmra.mxu3 %vm310_vm0, %v2237_v52  ;;  %4193 = vmatmul.msk.f32.gmra.mxu1 %vm310_vm0, %v6850_v30 }
 0x351   : > { %v1349_v27 = vpop.f32.mrf.mxu3 }
 0x352   : > { %v5965_v18 = vadd.f32 %v1349_v27, %v6851_v39  ;;  %v5978_v30 = vpop.f32.mrf.mxu2  ;;  %v6855_v27 = vld [vmem:[#allocation11_spill] sm:$0xff] }
 0x354   : > { %6852 = vst [vmem:[#allocation79_spill] sm:$0xff] %v5965_v18  ;;  %v6856_v18 = vld [vmem:[#allocation12_spill] sm:$0xff] }
 0x355   : > { %v1021_v6 = vadd.f32 %v6856_v18, %v6855_v27  ;;  %v2241_v27 = vld [vmem:[#allocation2 + $0x147] sm:$0xff] }
 0x356   : > { %4114 = vmatmul.msk.f32.gmra.mxu3 %vm310_vm0, %v2238_v28  ;;  %4194 = vmatmul.msk.f32.gmra.mxu1 %vm310_vm0, %v5652_v44 }
 0x357   : > { %v1361_v44 = vadd.f32 %v5670_v38, %v1021_v6  ;;  %v6864_v38 = vld [vmem:[#allocation26_spill] sm:$0xff] }
 0x358   : > { %v6865_v6 = vld [vmem:[#allocation54_spill] sm:$0xff] }
 0x359   : > { %v1352_v61 = vpop.f32.mrf.mxu3 }
 0x35a   : > { %v5975_v52 = vadd.f32 %v1352_v61, %v6853_v32  ;;  %v1638_v32 = vadd.f32 %v6859_v26, %v1361_v44  ;;  %v5993_v45 = vpop.f32.mrf.mxu2  ;;  %v6000_v44 = vpop.f32.mrf.mxu0 }
 0x35c   : > { %6854 = vst [vmem:[#allocation73_spill] sm:$0xff] %v5975_v52  ;;  %v6860_v52 = vld [vmem:[#allocation13_spill] sm:$0xff] }
 0x35e   : > { %4115 = vmatmul.msk.f32.gmra.mxu3 %vm310_vm0, %v2239_v0  ;;  %v1024_v0 = vadd.f32 %v6861_v46, %v6860_v52  ;;  %v6002_v52 = vpop.f32.mrf.mxu1 }
 0x360   : > { %v1362_v18 = vadd.f32 %v5679_v7, %v1024_v0  ;;  %v6008_v7 = vld [vmem:[%s6719_s4] sm:$0xf] }
 0x361   : > { %v1355_v39 = vpop.f32.mrf.mxu3 }
 0x362   : > { %v5983_v28 = vadd.f32 %v1355_v39, %v6857_v49  ;;  %v6863_v49 = vld [vmem:[#allocation41_spill] sm:$0xff]  ;;  %v6022_v16 = vpop.f32.mrf.mxu0 }
 0x363   : > { %v1915_v39 = vadd.f32 %v6863_v49, %v1638_v32  ;;  %v6011_v32 = vperm.slane %v6008_v7, 1  ;;  %v2242_v49 = vld [vmem:[#allocation2 + $0x14f] sm:$0xff] }
 0x364   : > { %6858 = vst [vmem:[#allocation76_spill] sm:$0xff] %v5983_v28 }
 0x365   : > { %v2192_v26 = vadd.f32 %v6865_v6, %v1915_v39 }
 0x366   : > { %4116 = vmatmul.msk.f32.gmra.mxu3 %vm310_vm0, %v2240_v2  ;;  %v1639_v2 = vadd.f32 %v6864_v38, %v1362_v18  ;;  %v6014_v18 = vpop.f32.mrf.mxu2  ;;  %v6868_v38 = vld [vmem:[#allocation57_spill] sm:$0xff] }
 0x369   : > { %v1358_v61 = vpop.f32.mrf.mxu3 }
 0x36a   : > { %v5991_v54 = vadd.f32 %v1358_v61, %v5659_v13  ;;  %v6866_v61 = vld [vmem:[#allocation43_spill] sm:$0xff] }
 0x36b   : > { %v1916_v0 = vadd.f32 %v6866_v61, %v1639_v2  ;;  %v6869_v61 = vld [vmem:[#allocation45_spill] sm:$0xff] }
 0x36c   : > { %6862 = vst [vmem:[#allocation11_spill] sm:$0xff] %v5991_v54 }
 0x36d   : > { %v2193_v6 = vadd.f32 %v6868_v38, %v1916_v0  ;;  %v6870_v0 = vld [vmem:[#allocation28_spill] sm:$0xff]  ;;  %v6871_v38 = vld [vmem:[#allocation61_spill] sm:$0xff] }
 0x36e   : > { %4117 = vmatmul.msk.f32.gmra.mxu3 %vm310_vm0, %v2241_v27 }
 0x371   : > { %v2374_v28 = vpop.f32.mrf.mxu3 }
 0x372   : > { %v2470_v46 = vadd.f32 %v2374_v28, %v2192_v26  ;;  %v6867_v28 = vld [vmem:[#allocation27_spill] sm:$0xff] }
 0x374   : > { %v2747_v13 = vadd.f32 %v5750_v21, %v2470_v46  ;;  %v1640_v21 = vadd.f32 %v6867_v28, %v5691_v57  ;;  %v1641_v28 = vadd.f32 %v6870_v0, %v5701_v3 }
 0x376   : > { %v3024_v39 = vadd.f32 %v5911_v9, %v2747_v13  ;;  %4118 = vmatmul.msk.f32.gmra.mxu3 %vm310_vm0, %v2242_v49  ;;  %v1917_v9 = vadd.f32 %v6869_v61, %v1640_v21  ;;  %v6027_v13 = vpop.f32.mrf.mxu1  ;;  %v2243_v49 = vld [vmem:[#allocation2 + $0x167] sm:$0xff]  ;;  %v2244_v61 = vld [vmem:[#allocation2 + $0x16f] sm:$0xff] }
 0x378   : > { %v3057_v27 = vadd.f32 %v6011_v32, %v3024_v39  ;;  %v6031_v39 = vpop.f32.mrf.mxu2 }
 0x379   : > { %v2377_v26 = vpop.f32.mrf.mxu3 }
 0x37a   : > { %v3089_v46 = vmax.f32 %v3057_v27, 0.0  ;;  %v2471_v54 = vadd.f32 %v2377_v26, %v2193_v6 }
 0x37c   : > { %v2748_v2 = vadd.f32 %v5766_v51, %v2471_v54  ;;  %4197 = vmatmul.msk.f32.vlgmr.msra.gmra.mxu2 %vm310_vm0, %v3089_v46  ;;  %v2194_v51 = vadd.f32 %v6871_v38, %v1917_v9  ;;  %v6872_v46 = vld [vmem:[#allocation47_spill] sm:$0xff]  ;;  %v6873_v9 = vld [vmem:[#allocation29_spill] sm:$0xff] }
 0x37e   : > { %v3025_v57 = vadd.f32 %v5921_v43, %v2748_v2  ;;  %4119 = vmatmul.msk.f32.gmra.mxu3 %vm310_vm0, %v2243_v49  ;;  %v1918_v43 = vadd.f32 %v6872_v46, %v1641_v28  ;;  %v6040_v2 = vpop.f32.mrf.mxu0  ;;  %v6044_v3 = vpop.f32.mrf.mxu1 }
 0x380   : > { %v3058_v27 = vadd.f32 %v6011_v32, %v3025_v57  ;;  %v1642_v57 = vadd.f32 %v6873_v9, %v5716_v24  ;;  %v6050_v38 = vpop.f32.mrf.mxu2  ;;  %v6877_v9 = vld [vmem:[#allocation69_spill] sm:$0xff] }
 0x381   : > { %v2380_v54 = vpop.f32.mrf.mxu3 }
 0x382   : > { %v2472_v6 = vadd.f32 %v2380_v54, %v2194_v51  ;;  %v3090_v26 = vmax.f32 %v3058_v27, 0.0  ;;  %v6874_v27 = vld [vmem:[#allocation65_spill] sm:$0xff] }
 0x384   : > { %v2749_v21 = vadd.f32 %v5781_v12, %v2472_v6  ;;  %4198 = vmatmul.msk.f32.gmra.mxu2 %vm310_vm0, %v3090_v26  ;;  %v2195_v12 = vadd.f32 %v6874_v27, %v1918_v43  ;;  %v6876_v43 = vld [vmem:[#allocation30_spill] sm:$0xff] }
 0x386   : > { %v3026_v49 = vadd.f32 %v5934_v59, %v2749_v21  ;;  %4120 = vmatmul.msk.f32.gmra.mxu3 %vm310_vm0, %v2244_v61  ;;  %v6875_v59 = vld [vmem:[#allocation49_spill] sm:$0xff]  ;;  %v6057_v24 = vpop.f32.mrf.mxu0  ;;  %v1643_v61 = vadd.f32 %v6876_v43, %v5728_v10  ;;  %v6063_v27 = vpop.f32.mrf.mxu1 }
 0x387   : > { %v1919_v26 = vadd.f32 %v6875_v59, %v1642_v57  ;;  %v2245_v21 = vld [vmem:[#allocation2 + $0x187] sm:$0xff]  ;;  %v6879_v59 = vld [vmem:[#allocation31_spill] sm:$0xff] }
 0x388   : > { %v3059_v0 = vadd.f32 %v6011_v32, %v3026_v49  ;;  %v6065_v57 = vpop.f32.mrf.mxu2 }
 0x389   : > { %v2383_v51 = vpop.f32.mrf.mxu3 }
 0x38a   : > { %v2473_v28 = vadd.f32 %v2383_v51, %v2195_v12  ;;  %v3091_v54 = vmax.f32 %v3059_v0, 0.0  ;;  %v2196_v0 = vadd.f32 %v6877_v9, %v1919_v26  ;;  %v1644_v26 = vadd.f32 %v6879_v59, %v5743_v42  ;;  %v2247_v42 = vld [vmem:[#allocation2 + $0x1a7] sm:$0xff] }
 0x38c   : > { %v2750_v6 = vadd.f32 %v5798_v50, %v2473_v28  ;;  %4199 = vmatmul.msk.f32.gmra.mxu2 %vm310_vm0, %v3091_v54  ;;  %v6878_v28 = vld [vmem:[#allocation51_spill] sm:$0xff] }
 0x38d   : > { %v1920_v54 = vadd.f32 %v6878_v28, %v1643_v61  ;;  %v6882_v28 = vld [vmem:[#allocation32_spill] sm:$0xff] }
 0x38e   : > { %v3027_v46 = vadd.f32 %v5944_v37, %v2750_v6  ;;  %4121 = vmatmul.msk.f32.gmra.mxu3 %vm310_vm0, %v2245_v21  ;;  %v2246_v6 = vld [vmem:[#allocation2 + $0x18f] sm:$0xff] }
 0x390   : > { %v3060_v49 = vadd.f32 %v6011_v32, %v3027_v46  ;;  %v6880_v46 = vld [vmem:[#allocation74_spill] sm:$0xff] }
 0x391   : > { %v2386_v50 = vpop.f32.mrf.mxu3  ;;  %v2197_v43 = vadd.f32 %v6880_v46, %v1920_v54  ;;  %v1645_v54 = vadd.f32 %v6882_v28, %v5753_v63 }
 0x392   : > { %v2474_v12 = vadd.f32 %v2386_v50, %v2196_v0  ;;  %v3092_v51 = vmax.f32 %v3060_v49, 0.0  ;;  %v6076_v49 = vpop.f32.mrf.mxu0  ;;  %v6078_v50 = vpop.f32.mrf.mxu1 }
 0x394   : > { %v2751_v37 = vadd.f32 %v5811_v23, %v2474_v12  ;;  %4200 = vmatmul.msk.f32.gmra.mxu2 %vm310_vm0, %v3092_v51  ;;  %v6083_v51 = vpop.f32.mrf.mxu2 }
 0x396   : > { %v3028_v10 = vadd.f32 %v5957_v29, %v2751_v37  ;;  %4122 = vmatmul.msk.f32.gmra.mxu3 %vm310_vm0, %v2246_v6  ;;  %v6881_v29 = vld [vmem:[#allocation53_spill] sm:$0xff] }
 0x397   : > { %v1921_v12 = vadd.f32 %v6881_v29, %v1644_v26  ;;  %v6885_v29 = vld [vmem:[#allocation33_spill] sm:$0xff] }
 0x398   : > { %v3061_v21 = vadd.f32 %v6011_v32, %v3028_v10  ;;  %v6883_v10 = vld [vmem:[#allocation78_spill] sm:$0xff] }
 0x399   : > { %v2389_v9 = vpop.f32.mrf.mxu3  ;;  %v2198_v59 = vadd.f32 %v6883_v10, %v1921_v12  ;;  %v1646_v12 = vadd.f32 %v6885_v29, %v5764_v36 }
 0x39a   : > { %v2475_v23 = vadd.f32 %v2389_v9, %v2197_v43  ;;  %v3093_v0 = vmax.f32 %v3061_v21, 0.0  ;;  %v6091_v43 = vpop.f32.mrf.mxu0  ;;  %v6884_v9 = vld [vmem:[#allocation56_spill] sm:$0xff] }
 0x39c   : > { %v2752_v61 = vadd.f32 %v5827_v1, %v2475_v23  ;;  %4201 = vmatmul.msk.f32.gmra.mxu2 %vm310_vm0, %v3093_v0  ;;  %v6096_v23 = vpop.f32.mrf.mxu1  ;;  %v2248_v0 = vld [vmem:[#allocation2 + $0x1af] sm:$0xff] }
 0x39e   : > { %v3029_v37 = vadd.f32 %v5967_v22, %v2752_v61  ;;  %4123 = vmatmul.msk.f32.gmra.mxu3 %vm310_vm0, %v2247_v42  ;;  %v1922_v22 = vadd.f32 %v6884_v9, %v1645_v54  ;;  %v6100_v61 = vpop.f32.mrf.mxu2 }
 0x3a0   : > { %v3062_v6 = vadd.f32 %v6011_v32, %v3029_v37  ;;  %v6886_v37 = vld [vmem:[#allocation83_spill] sm:$0xff] }
 0x3a1   : > { %v2392_v21 = vpop.f32.mrf.mxu3 }
 0x3a2   : > { %v2476_v1 = vadd.f32 %v2392_v21, %v2198_v59  ;;  %v3094_v46 = vmax.f32 %v3062_v6, 0.0  ;;  %v6887_v59 = vld [vmem:[#allocation60_spill] sm:$0xff]  ;;  %v6109_v21 = vpop.f32.mrf.mxu0 }
 0x3a4   : > { %v2753_v26 = vadd.f32 %v6000_v44, %v2476_v1  ;;  %4202 = vmatmul.msk.f32.gmra.mxu2 %vm310_vm0, %v3094_v46  ;;  %v2199_v44 = vadd.f32 %v6886_v37, %v1922_v22  ;;  %v2249_v1 = vld [vmem:[#allocation2 + $0x1c7] sm:$0xff]  ;;  %v6113_v36 = vpop.f32.mrf.mxu1 }
 0x3a6   : > { %v3030_v63 = vadd.f32 %v6002_v52, %v2753_v26  ;;  %4124 = vmatmul.msk.f32.gmra.mxu3 %vm310_vm0, %v2248_v0  ;;  %v1923_v52 = vadd.f32 %v6887_v59, %v1646_v12  ;;  %v6888_v26 = vld [vmem:[#allocation35_spill] sm:$0xff]  ;;  %v6119_v0 = vpop.f32.mrf.mxu2 }
 0x3a7   : > { %v1647_v9 = vadd.f32 %v6888_v26, %v5777_v41  ;;  %v6891_v26 = vld [vmem:[#allocation68_spill] sm:$0xff] }
 0x3a8   : > { %v3063_v42 = vadd.f32 %v6011_v32, %v3030_v63 }
 0x3a9   : > { %v2395_v28 = vpop.f32.mrf.mxu3 }
 0x3aa   : > { %v2477_v6 = vadd.f32 %v2395_v28, %v2199_v44  ;;  %v3095_v10 = vmax.f32 %v3063_v42, 0.0  ;;  %v2250_v44 = vld [vmem:[#allocation2 + $0x1cf] sm:$0xff]  ;;  %v6126_v41 = vpop.f32.mrf.mxu0 }
 0x3ac   : > { %v2754_v54 = vadd.f32 %v6022_v16, %v2477_v6  ;;  %4203 = vmatmul.msk.f32.gmra.mxu2 %vm310_vm0, %v3095_v10  ;;  %v2200_v16 = vadd.f32 %v5887_v31, %v1923_v52  ;;  %v6890_v31 = vld [vmem:[#allocation36_spill] sm:$0xff]  ;;  %v6132_v59 = vpop.f32.mrf.mxu1 }
 0x3ad   : > { %v1648_v6 = vadd.f32 %v6890_v31, %v5790_v34 }
 0x3ae   : > { %v3031_v46 = vadd.f32 %v6027_v13, %v2754_v54  ;;  %4125 = vmatmul.msk.f32.gmra.mxu3 %vm310_vm0, %v2249_v1  ;;  %v6889_v13 = vld [vmem:[#allocation64_spill] sm:$0xff] }
 0x3af   : > { %v1924_v37 = vadd.f32 %v6889_v13, %v1647_v9  ;;  %v1925_v9 = vadd.f32 %v6891_v26, %v1648_v6 }
 0x3b0   : > { %v3064_v22 = vadd.f32 %v6011_v32, %v3031_v46  ;;  %v6134_v46 = vpop.f32.mrf.mxu2 }
 0x3b1   : > { %v2398_v63 = vpop.f32.mrf.mxu3  ;;  %v2201_v54 = vadd.f32 %v5900_v25, %v1924_v37  ;;  %v6892_v25 = vld [vmem:[#allocation37_spill] sm:$0xff] }
 0x3b2   : > { %v2478_v29 = vadd.f32 %v2398_v63, %v2200_v16  ;;  %v3096_v12 = vmax.f32 %v3064_v22, 0.0  ;;  %v2251_v22 = vld [vmem:[#allocation2 + $0x1e7] sm:$0xff]  ;;  %v1649_v16 = vadd.f32 %v6892_v25, %v5803_v53  ;;  %v2252_v53 = vld [vmem:[#allocation2 + $0x1ef] sm:$0xff] }
 0x3b3   : > { %v2253_v25 = vld [vmem:[#allocation2 + $0x207] sm:$0xff] }
 0x3b4   : > { %v2755_v42 = vadd.f32 %v6040_v2, %v2478_v29  ;;  %4204 = vmatmul.msk.f32.gmra.mxu2 %vm310_vm0, %v3096_v12  ;;  %v2202_v29 = vadd.f32 %v5913_v60, %v1925_v9  ;;  %v6145_v12 = vpop.f32.mrf.mxu0  ;;  %v6147_v37 = vpop.f32.mrf.mxu1  ;;  %v2532_v60 = vld [vmem:[#allocation2 + $0x228] sm:$0xff] }
 0x3b5   : > { %4163 = vmatmul.msk.f32.gmra.mxu0 %vm310_vm0, %v2532_v60 }
 0x3b6   : > { %v3032_v28 = vadd.f32 %v6044_v3, %v2755_v42  ;;  %4126 = vmatmul.msk.f32.gmra.mxu3 %vm310_vm0, %v2250_v44 }
 0x3b8   : > { %v3065_v10 = vadd.f32 %v6011_v32, %v3032_v28  ;;  %v6152_v31 = vpop.f32.mrf.mxu2 }
 0x3b9   : > { %v2401_v2 = vpop.f32.mrf.mxu3 }
 0x3ba   : > { %v3097_v52 = vmax.f32 %v3065_v10, 0.0  ;;  %v2479_v1 = vadd.f32 %v2401_v2, %v2201_v54  ;;  %v6894_v10 = vld [vmem:[#allocation38_spill] sm:$0xff] }
 0x3bb   : > { %v1650_v54 = vadd.f32 %v6894_v10, %v5814_v47 }
 0x3bc   : > { %v2756_v3 = vadd.f32 %v6057_v24, %v2479_v1  ;;  %4205 = vmatmul.msk.f32.gmra.mxu2 %vm310_vm0, %v3097_v52  ;;  %v2809_v1 = vld [vmem:[#allocation2 + $0x229] sm:$0xff]  ;;  %v6162_v9 = vpop.f32.mrf.mxu0 }
 0x3bd   : > { %4195 = vmatmul.msk.f32.gmra.mxu1 %vm310_vm0, %v2809_v1 }
 0x3be   : > { %v3033_v34 = vadd.f32 %v6063_v27, %v2756_v3  ;;  %4127 = vmatmul.msk.f32.gmra.mxu3 %vm310_vm0, %v2251_v22  ;;  %v6893_v27 = vld [vmem:[#allocation72_spill] sm:$0xff]  ;;  %v6895_v22 = vld [vmem:[#allocation77_spill] sm:$0xff] }
 0x3bf   : > { %v1926_v28 = vadd.f32 %v6893_v27, %v1649_v16  ;;  %v1927_v47 = vadd.f32 %v6895_v22, %v1650_v54  ;;  %v6898_v54 = vld [vmem:[#allocation44_spill] sm:$0xff] }
 0x3c0   : > { %v3066_v63 = vadd.f32 %v6011_v32, %v3033_v34  ;;  %v6167_v34 = vpop.f32.mrf.mxu1  ;;  %v6171_v16 = vpop.f32.mrf.mxu2 }
 0x3c1   : > { %v2404_v42 = vpop.f32.mrf.mxu3  ;;  %v2203_v52 = vadd.f32 %v5926_v58, %v1926_v28 }
 0x3c2   : > { %v3098_v24 = vmax.f32 %v3066_v63, 0.0  ;;  %v2480_v13 = vadd.f32 %v2404_v42, %v2202_v29  ;;  %v2533_v63 = vld [vmem:[#allocation2 + $0x230] sm:$0xff]  ;;  %v6896_v29 = vld [vmem:[#allocation42_spill] sm:$0xff] }
 0x3c3   : > { %v1651_v42 = vadd.f32 %v6896_v29, %v5825_v19  ;;  %4164 = vmatmul.msk.f32.gmra.mxu0 %vm310_vm0, %v2533_v63  ;;  %v2254_v19 = vld [vmem:[#allocation2 + $0x20f] sm:$0xff] }
 0x3c4   : > { %v2757_v44 = vadd.f32 %v6076_v49, %v2480_v13  ;;  %4206 = vmatmul.msk.f32.gmra.mxu2 %vm310_vm0, %v3098_v24  ;;  %v2699_v60 = vpop.f32.mrf.mxu0 }
 0x3c6   : > { %v3034_v6 = vadd.f32 %v6078_v50, %v2757_v44  ;;  %4128 = vmatmul.msk.f32.gmra.mxu3 %vm310_vm0, %v2252_v53  ;;  %v2810_v44 = vld [vmem:[#allocation2 + $0x231] sm:$0xff]  ;;  %v6897_v53 = vld [vmem:[#allocation82_spill] sm:$0xff] }
 0x3c7   : > { %4196 = vmatmul.msk.f32.gmra.mxu1 %vm310_vm0, %v2810_v44  ;;  %v2256_v44 = vld [vmem:[#allocation2 + $0x22f] sm:$0xff] }
 0x3c8   : > { %v3067_v2 = vadd.f32 %v6011_v32, %v3034_v6  ;;  %v1928_v6 = vadd.f32 %v6897_v53, %v1651_v42  ;;  %v6188_v1 = vpop.f32.mrf.mxu2 }
 0x3c9   : > { %v2407_v49 = vpop.f32.mrf.mxu3 }
 0x3ca   : > { %v3099_v3 = vmax.f32 %v3067_v2, 0.0  ;;  %v2481_v26 = vadd.f32 %v2407_v49, %v2203_v52  ;;  %v1652_v2 = vadd.f32 %v6898_v54, %v5841_v8  ;;  %v2205_v49 = vadd.f32 %v5949_v11, %v1928_v6 }
 0x3cc   : > { %v2758_v50 = vadd.f32 %v6091_v43, %v2481_v26  ;;  %4207 = vmatmul.msk.f32.gmra.mxu2 %vm310_vm0, %v3099_v3  ;;  %v2204_v43 = vadd.f32 %v5936_v35, %v1927_v47  ;;  %v2976_v35 = vpop.f32.mrf.mxu1  ;;  %v2702_v8 = vpop.f32.mrf.mxu0 }
 0x3ce   : > { %v3035_v58 = vadd.f32 %v6096_v23, %v2758_v50  ;;  %4129 = vmatmul.msk.f32.gmra.mxu3 %vm310_vm0, %v2253_v25  ;;  %v2255_v50 = vld [vmem:[#allocation2 + $0x227] sm:$0xff] }
 0x3d0   : > { %v3068_v24 = vadd.f32 %v6011_v32, %v3035_v58  ;;  %v6900_v58 = vld [vmem:[#allocation46_spill] sm:$0xff] }
 0x3d1   : > { %v2410_v13 = vpop.f32.mrf.mxu3  ;;  %v1653_v11 = vadd.f32 %v6900_v58, %v5850_v40  ;;  %v6902_v40 = vld [vmem:[#allocation48_spill] sm:$0xff] }
 0x3d2   : > { %v3100_v27 = vmax.f32 %v3068_v24, 0.0  ;;  %v2482_v28 = vadd.f32 %v2410_v13, %v2204_v43  ;;  %v6199_v13 = vpop.f32.mrf.mxu2 }
 0x3d4   : > { %v2759_v23 = vadd.f32 %v6109_v21, %v2482_v28  ;;  %4208 = vmatmul.msk.f32.gmra.mxu2 %vm310_vm0, %v3100_v27  ;;  %v2979_v42 = vpop.f32.mrf.mxu1 }
 0x3d6   : > { %v3036_v10 = vadd.f32 %v6113_v36, %v2759_v23  ;;  %4130 = vmatmul.msk.f32.gmra.mxu3 %vm310_vm0, %v2254_v19  ;;  %v6899_v36 = vld [vmem:[#allocation85_spill] sm:$0xff]  ;;  %v2705_v19 = vpop.f32.mrf.mxu0 }
 0x3d7   : > { %v1929_v47 = vadd.f32 %v6899_v36, %v1652_v2 }
 0x3d8   : > { %v3069_v52 = vadd.f32 %v6011_v32, %v3036_v10 }
 0x3d9   : > { %v2413_v21 = vpop.f32.mrf.mxu3  ;;  %v2206_v29 = vadd.f32 %v5959_v62, %v1929_v47  ;;  %v1654_v62 = vadd.f32 %v6902_v40, %v5858_v14  ;;  %v6903_v14 = vld [vmem:[#allocation50_spill] sm:$0xff] }
 0x3da   : > { %v3101_v3 = vmax.f32 %v3069_v52, 0.0  ;;  %v2483_v26 = vadd.f32 %v2413_v21, %v2205_v49  ;;  %v6213_v49 = vpop.f32.mrf.mxu2 }
 0x3dc   : > { %v2760_v22 = vadd.f32 %v6126_v41, %v2483_v26  ;;  %4209 = vmatmul.msk.f32.gmra.mxu2 %vm310_vm0, %v3101_v3  ;;  %v1655_v3 = vadd.f32 %v6903_v14, %v5864_v20 }
 0x3de   : > { %v3037_v25 = vadd.f32 %v6132_v59, %v2760_v22  ;;  %4131 = vmatmul.msk.f32.gmra.mxu3 %vm310_vm0, %v2255_v50  ;;  %v6901_v59 = vld [vmem:[#allocation87_spill] sm:$0xff]  ;;  %v2708_v47 = vpop.f32.mrf.mxu0 }
 0x3df   : > { %v1930_v28 = vadd.f32 %v6901_v59, %v1653_v11  ;;  %v6905_v59 = vld [vmem:[#allocation55_spill] sm:$0xff] }
 0x3e0   : > { %v3070_v63 = vadd.f32 %v6011_v32, %v3037_v25 }
 0x3e1   : > { %v2416_v24 = vpop.f32.mrf.mxu3  ;;  %v2207_v6 = vadd.f32 %v5972_v55, %v1930_v28  ;;  %v1657_v28 = vadd.f32 %v6905_v59, %v5880_v5  ;;  %v6911_v59 = vld [vmem:[#allocation39_spill] sm:$0xff] }
 0x3e2   : > { %v3102_v43 = vmax.f32 %v3070_v63, 0.0  ;;  %v2484_v41 = vadd.f32 %v2416_v24, %v2206_v29  ;;  %v6222_v11 = vpop.f32.mrf.mxu2 }
 0x3e4   : > { %v2761_v27 = vadd.f32 %v6145_v12, %v2484_v41  ;;  %4210 = vmatmul.msk.f32.gmra.mxu2 %vm310_vm0, %v3102_v43  ;;  %v2982_v12 = vpop.f32.mrf.mxu1 }
 0x3e6   : > { %v3038_v23 = vadd.f32 %v6147_v37, %v2761_v27  ;;  %4132 = vmatmul.msk.f32.gmra.mxu3 %vm310_vm0, %v2256_v44  ;;  %v1931_v37 = vadd.f32 %v5693_v4, %v1654_v62  ;;  %v1932_v4 = vadd.f32 %v5706_v33, %v1655_v3  ;;  %v2711_v33 = vpop.f32.mrf.mxu0  ;;  %v6235_v62 = vperm.slane %v6008_v7, 2 }
 0x3e8   : > { %v3071_v53 = vadd.f32 %v6011_v32, %v3038_v23  ;;  %v2208_v26 = vadd.f32 %v5978_v30, %v1931_v37  ;;  %v2209_v30 = vadd.f32 %v5993_v45, %v1932_v4 }
 0x3e9   : > { %v2419_v10 = vpop.f32.mrf.mxu3 }
 0x3ea   : > { %v3103_v54 = vmax.f32 %v3071_v53, 0.0  ;;  %v2485_v2 = vadd.f32 %v2419_v10, %v2207_v6 }
 0x3ec   : > { %v2762_v52 = vadd.f32 %v6162_v9, %v2485_v2  ;;  %4211 = vmatmul.msk.f32.gmra.mxu2 %vm310_vm0, %v3103_v54  ;;  %v2985_v25 = vpop.f32.mrf.mxu1 }
 0x3ee   : > { %v3039_v21 = vadd.f32 %v6167_v34, %v2762_v52  ;;  %v6904_v34 = vld [vmem:[#allocation52_spill] sm:$0xff]  ;;  %v2714_v5 = vpop.f32.mrf.mxu0 }
 0x3ef   : > { %v1656_v20 = vadd.f32 %v6904_v34, %v5872_v48 }
 0x3f0   : > { %v3072_v55 = vadd.f32 %v6011_v32, %v3039_v21 }
 0x3f1   : > { %v2422_v50 = vpop.f32.mrf.mxu3 }
 0x3f2   : > { %v3104_v22 = vmax.f32 %v3072_v55, 0.0  ;;  %v2486_v36 = vadd.f32 %v2422_v50, %v2208_v26 }
 0x3f4   : > { %v2763_v9 = vadd.f32 %v2699_v60, %v2486_v36  ;;  %4212 = vmatmul.msk.f32.gmra.mxu2 %vm310_vm0, %v3104_v22  ;;  %v1933_v60 = vadd.f32 %v5725_v17, %v1656_v20  ;;  %v1934_v17 = vadd.f32 %v5740_v15, %v1657_v28  ;;  %v6908_v36 = vld [vmem:[#allocation104_spill] sm:$0xff]  ;;  %v6912_v28 = vld [vmem:[#allocation67_spill] sm:$0xff] }
 0x3f6   : > { %v3040_v58 = vadd.f32 %v2976_v35, %v2763_v9  ;;  %v2988_v35 = vpop.f32.mrf.mxu1  ;;  %v2210_v23 = vadd.f32 %v6014_v18, %v1933_v60  ;;  %v6906_v18 = vld [vmem:[#allocation58_spill] sm:$0xff]  ;;  %v2717_v20 = vpop.f32.mrf.mxu0 }
 0x3f7   : > { %v1658_v54 = vadd.f32 %v6906_v18, %v5890_v56  ;;  %v6907_v56 = vld [vmem:[#allocation92_spill] sm:$0xff] }
 0x3f8   : > { %v3073_v63 = vadd.f32 %v6011_v32, %v3040_v58 }
 0x3f9   : > { %v2425_v29 = vpop.f32.mrf.mxu3  ;;  %v1935_v26 = vadd.f32 %v6907_v56, %v1658_v54 }
 0x3fa   : > { %v3105_v24 = vmax.f32 %v3073_v63, 0.0  ;;  %v2487_v43 = vadd.f32 %v2425_v29, %v2209_v30 }
 0x3fb   : > { %v2212_v34 = vadd.f32 %v6050_v38, %v1935_v26 }
 0x3fc   : > { %v2764_v41 = vadd.f32 %v2702_v8, %v2487_v43  ;;  %4213 = vmatmul.msk.f32.gmra.mxu2 %vm310_vm0, %v3105_v24 }
 0x3fe   : > { %v3041_v44 = vadd.f32 %v2979_v42, %v2764_v41  ;;  %v2991_v52 = vpop.f32.mrf.mxu1  ;;  %v6910_v41 = vld [vmem:[#allocation93_spill] sm:$0xff] }
 0x3ff   : > { %v3239_v27 = vpop.f32.mrf.mxu2 }
 0x400   : > { %v3074_v48 = vadd.f32 %v6011_v32, %v3041_v44  ;;  %v6240_v42 = vadd.f32 %v3239_v27, %v6235_v62 }
 0x401   : > { %v2428_v45 = vpop.f32.mrf.mxu3 }
 0x402   : > { %v3106_v40 = vmax.f32 %v3074_v48, 0.0  ;;  %v2488_v8 = vadd.f32 %v2428_v45, %v2210_v23  ;;  %v3336_v15 = vsel %vm3335_vm1, %v6240_v42, 0.0  ;;  %v1660_v48 = vadd.f32 %v6912_v28, %v6911_v59 }
 0x404   : > { %v2765_v53 = vadd.f32 %v2705_v19, %v2488_v8  ;;  %4214 = vmatmul.msk.f32.gmra.mxu2 %vm310_vm0, %v3106_v40  ;;  %v2211_v19 = vadd.f32 %v6031_v39, %v1934_v17  ;;  %v6909_v39 = vld [vmem:[#allocation63_spill] sm:$0xff]  ;;  %v2720_v17 = vpop.f32.mrf.mxu0 }
 0x405   : > { %v1659_v9 = vadd.f32 %v6909_v39, %v6908_v36 }
 0x406   : > { %v3042_v6 = vadd.f32 %v2982_v12, %v2765_v53  ;;  %v2994_v24 = vpop.f32.mrf.mxu1 }
 0x407   : > { %v3242_v10 = vpop.f32.mrf.mxu2  ;;  %v1936_v60 = vadd.f32 %v6910_v41, %v1659_v9 }
 0x408   : > { %v3075_v2 = vadd.f32 %v6011_v32, %v3042_v6  ;;  %v6246_v7 = vadd.f32 %v3242_v10, %v6235_v62  ;;  %v6913_v10 = vld [vmem:[#allocation94_spill] sm:$0xff] }
 0x409   : > { %v2431_v37 = vpop.f32.mrf.mxu3  ;;  %v2213_v45 = vadd.f32 %v6065_v57, %v1936_v60  ;;  %v1937_v18 = vadd.f32 %v6913_v10, %v1660_v48 }
 0x40a   : > { %v3107_v21 = vmax.f32 %v3075_v2, 0.0  ;;  %v3337_v12 = vsel %vm3335_vm1, %v6246_v7, 0.0  ;;  %v2489_v14 = vadd.f32 %v2431_v37, %v2211_v19  ;;  %v6914_v37 = vld [vmem:[#allocation40_spill] sm:$0xff] }
 0x40b   : > { %v3338_v3 = vadd.f32 %v3337_v12, %v3336_v15  ;;  %v6915_v15 = vld [vmem:[#allocation71_spill] sm:$0xff] }
 0x40c   : > { %v2766_v55 = vadd.f32 %v2708_v47, %v2489_v14  ;;  %4215 = vmatmul.msk.f32.gmra.mxu2 %vm310_vm0, %v3107_v21  ;;  %v1661_v21 = vadd.f32 %v6915_v15, %v6914_v37  ;;  %v2214_v14 = vadd.f32 %v6083_v51, %v1937_v18  ;;  %v2723_v36 = vpop.f32.mrf.mxu0 }
 0x40e   : > { %v3043_v50 = vadd.f32 %v2985_v25, %v2766_v55  ;;  %v2997_v54 = vpop.f32.mrf.mxu1 }
 0x40f   : > { %v3245_v22 = vpop.f32.mrf.mxu2 }
 0x410   : > { %v3076_v4 = vadd.f32 %v6011_v32, %v3043_v50  ;;  %v6259_v58 = vadd.f32 %v3245_v22, %v6235_v62 }
 0x411   : > { %v2434_v63 = vpop.f32.mrf.mxu3 }
 0x412   : > { %v3108_v30 = vmax.f32 %v3076_v4, 0.0  ;;  %v3339_v47 = vsel %vm3335_vm1, %v6259_v58, 0.0  ;;  %v2490_v29 = vadd.f32 %v2434_v63, %v2212_v34  ;;  %v6917_v34 = vld [vmem:[#allocation59_spill] sm:$0xff] }
 0x413   : > { %v3340_v25 = vadd.f32 %v3339_v47, %v3338_v3  ;;  %v6918_v63 = vld [vmem:[#allocation75_spill] sm:$0xff] }
 0x414   : > { %v2767_v43 = vadd.f32 %v2711_v33, %v2490_v29  ;;  %4216 = vmatmul.msk.f32.gmra.mxu2 %vm310_vm0, %v3108_v30  ;;  %v1662_v30 = vadd.f32 %v6918_v63, %v6917_v34  ;;  %v2726_v28 = vpop.f32.mrf.mxu0 }
 0x416   : > { %v3044_v44 = vadd.f32 %v2988_v35, %v2767_v43  ;;  %v3000_v9 = vpop.f32.mrf.mxu1 }
 0x417   : > { %v3248_v27 = vpop.f32.mrf.mxu2 }
 0x418   : > { %v3077_v38 = vadd.f32 %v6011_v32, %v3044_v44  ;;  %v6270_v23 = vadd.f32 %v3248_v27, %v6235_v62  ;;  %v6919_v44 = vld [vmem:[#allocation96_spill] sm:$0xff] }
 0x419   : > { %v2437_v40 = vpop.f32.mrf.mxu3  ;;  %v1939_v27 = vadd.f32 %v6919_v44, %v1662_v30  ;;  %v6926_v30 = vld [vmem:[#allocation70_spill] sm:$0xff] }
 0x41a   : > { %v3109_v8 = vmax.f32 %v3077_v38, 0.0  ;;  %v3341_v33 = vsel %vm3335_vm1, %v6270_v23, 0.0  ;;  %v2491_v53 = vadd.f32 %v2437_v40, %v2213_v45  ;;  %v6920_v38 = vld [vmem:[#allocation62_spill] sm:$0xff]  ;;  %v6921_v45 = vld [vmem:[#allocation81_spill] sm:$0xff] }
 0x41b   : > { %v3342_v6 = vadd.f32 %v3341_v33, %v3340_v25  ;;  %v1663_v40 = vadd.f32 %v6921_v45, %v6920_v38  ;;  %v2216_v33 = vadd.f32 %v6119_v0, %v1939_v27 }
 0x41c   : > { %v2768_v35 = vadd.f32 %v2714_v5, %v2491_v53  ;;  %4217 = vmatmul.msk.f32.gmra.mxu2 %vm310_vm0, %v3109_v8 }
 0x41e   : > { %v3045_v2 = vadd.f32 %v2991_v52, %v2768_v35  ;;  %v6916_v52 = vld [vmem:[#allocation95_spill] sm:$0xff]  ;;  %v3003_v53 = vpop.f32.mrf.mxu1 }
 0x41f   : > { %v3251_v19 = vpop.f32.mrf.mxu2  ;;  %v1938_v22 = vadd.f32 %v6916_v52, %v1661_v21  ;;  %v6923_v21 = vld [vmem:[#allocation66_spill] sm:$0xff] }
 0x420   : > { %v3078_v57 = vadd.f32 %v6011_v32, %v3045_v2  ;;  %v6281_v12 = vadd.f32 %v3251_v19, %v6235_v62  ;;  %v6922_v2 = vld [vmem:[#allocation97_spill] sm:$0xff] }
 0x421   : > { %v2440_v3 = vpop.f32.mrf.mxu3  ;;  %v2215_v29 = vadd.f32 %v6100_v61, %v1938_v22  ;;  %v1940_v19 = vadd.f32 %v6922_v2, %v1663_v40 }
 0x422   : > { %v3110_v55 = vmax.f32 %v3078_v57, 0.0  ;;  %v3343_v5 = vsel %vm3335_vm1, %v6281_v12, 0.0  ;;  %v2492_v56 = vadd.f32 %v2440_v3, %v2214_v14  ;;  %v6924_v57 = vld [vmem:[#allocation84_spill] sm:$0xff] }
 0x423   : > { %v3344_v26 = vadd.f32 %v3343_v5, %v3342_v6  ;;  %v1664_v14 = vadd.f32 %v6924_v57, %v6923_v21  ;;  %v2729_v5 = vpop.f32.mrf.mxu0 }
 0x424   : > { %v2769_v50 = vadd.f32 %v2717_v20, %v2492_v56  ;;  %4218 = vmatmul.msk.f32.gmra.mxu2 %vm310_vm0, %v3110_v55  ;;  %v2217_v55 = vadd.f32 %v6134_v46, %v1940_v19 }
 0x426   : > { %v3046_v39 = vadd.f32 %v2994_v24, %v2769_v50  ;;  %v3006_v22 = vpop.f32.mrf.mxu1 }
 0x427   : > { %v3254_v4 = vpop.f32.mrf.mxu2 }
 0x428   : > { %v3079_v51 = vadd.f32 %v6011_v32, %v3046_v39  ;;  %v6292_v47 = vadd.f32 %v3254_v4, %v6235_v62 }
 0x429   : > { %v2443_v25 = vpop.f32.mrf.mxu3 }
 0x42a   : > { %v3111_v20 = vmax.f32 %v3079_v51, 0.0  ;;  %v3345_v43 = vsel %vm3335_vm1, %v6292_v47, 0.0  ;;  %v2493_v41 = vadd.f32 %v2443_v25, %v2215_v29  ;;  %v6927_v51 = vld [vmem:[#allocation86_spill] sm:$0xff] }
 0x42b   : > { %v3346_v60 = vadd.f32 %v3345_v43, %v3344_v26  ;;  %v1665_v29 = vadd.f32 %v6927_v51, %v6926_v30  ;;  %v2732_v44 = vpop.f32.mrf.mxu0 }
 0x42c   : > { %v2770_v24 = vadd.f32 %v2720_v17, %v2493_v41  ;;  %4219 = vmatmul.msk.f32.gmra.mxu2 %vm310_vm0, %v3111_v20 }
 0x42e   : > { %v3047_v59 = vadd.f32 %v2997_v54, %v2770_v24  ;;  %v3009_v38 = vpop.f32.mrf.mxu1 }
 0x42f   : > { %v3257_v48 = vpop.f32.mrf.mxu2 }
 0x430   : > { %v3080_v61 = vadd.f32 %v6011_v32, %v3047_v59  ;;  %v6303_v8 = vadd.f32 %v3257_v48, %v6235_v62 }
 0x431   : > { %v2446_v6 = vpop.f32.mrf.mxu3 }
 0x432   : > { %v3112_v17 = vmax.f32 %v3080_v61, 0.0  ;;  %v3347_v35 = vsel %vm3335_vm1, %v6303_v8, 0.0  ;;  %v2494_v10 = vadd.f32 %v2446_v6, %v2216_v33  ;;  %v6929_v61 = vld [vmem:[#allocation79_spill] sm:$0xff]  ;;  %v6930_v33 = vld [vmem:[#allocation88_spill] sm:$0xff] }
 0x433   : > { %v3348_v18 = vadd.f32 %v3347_v35, %v3346_v60  ;;  %v2735_v21 = vpop.f32.mrf.mxu0 }
 0x434   : > { %v2771_v54 = vadd.f32 %v2723_v36, %v2494_v10  ;;  %4220 = vmatmul.msk.f32.gmra.mxu2 %vm310_vm0, %v3112_v17 }
 0x436   : > { %v3048_v37 = vadd.f32 %v3000_v9, %v2771_v54  ;;  %v6925_v9 = vld [vmem:[#allocation98_spill] sm:$0xff] }
 0x437   : > { %v3260_v15 = vpop.f32.mrf.mxu2  ;;  %v1941_v4 = vadd.f32 %v6925_v9, %v1664_v14  ;;  %v3012_v14 = vpop.f32.mrf.mxu1 }
 0x438   : > { %v3081_v0 = vadd.f32 %v6011_v32, %v3048_v37  ;;  %v6314_v3 = vadd.f32 %v3260_v15, %v6235_v62  ;;  %v6931_v37 = vld [vmem:[#allocation100_spill] sm:$0xff] }
 0x439   : > { %v2449_v56 = vpop.f32.mrf.mxu3  ;;  %v2218_v20 = vadd.f32 %v6152_v31, %v1941_v4 }
 0x43a   : > { %v3113_v26 = vmax.f32 %v3081_v0, 0.0  ;;  %v3349_v50 = vsel %vm3335_vm1, %v6314_v3, 0.0  ;;  %v2495_v52 = vadd.f32 %v2449_v56, %v2217_v55  ;;  %v6932_v55 = vld [vmem:[#allocation73_spill] sm:$0xff] }
 0x43b   : > { %v3350_v36 = vadd.f32 %v3349_v50, %v3348_v18  ;;  %v2738_v51 = vpop.f32.mrf.mxu0 }
 0x43c   : > { %v2772_v39 = vadd.f32 %v2726_v28, %v2495_v52  ;;  %4221 = vmatmul.msk.f32.gmra.mxu2 %vm310_vm0, %v3113_v26  ;;  %v6928_v28 = vld [vmem:[#allocation99_spill] sm:$0xff] }
 0x43d   : > { %v1942_v48 = vadd.f32 %v6928_v28, %v1665_v29 }
 0x43e   : > { %v3049_v34 = vadd.f32 %v3003_v53, %v2772_v39  ;;  %v1666_v53 = vadd.f32 %v6930_v33, %v6929_v61 }
 0x43f   : > { %v3263_v63 = vpop.f32.mrf.mxu2  ;;  %v2219_v17 = vadd.f32 %v6171_v16, %v1942_v48  ;;  %v6937_v48 = vld [vmem:[#allocation102_spill] sm:$0xff] }
 0x440   : > { %v3082_v46 = vadd.f32 %v6011_v32, %v3049_v34  ;;  %v6325_v25 = vadd.f32 %v3263_v63, %v6235_v62  ;;  %v1943_v15 = vadd.f32 %v6931_v37, %v1666_v53  ;;  %v6934_v34 = vld [vmem:[#allocation101_spill] sm:$0xff]  ;;  %v6938_v53 = vld [vmem:[#allocation11_spill] sm:$0xff] }
 0x441   : > { %v2452_v43 = vpop.f32.mrf.mxu3 }
 0x442   : > { %v3114_v41 = vmax.f32 %v3082_v46, 0.0  ;;  %v3351_v60 = vsel %vm3335_vm1, %v6325_v25, 0.0  ;;  %v2496_v24 = vadd.f32 %v2452_v43, %v2218_v20  ;;  %v2220_v50 = vadd.f32 %v6188_v1, %v1943_v15  ;;  %v6935_v46 = vld [vmem:[#allocation76_spill] sm:$0xff]  ;;  %v6936_v20 = vld [vmem:[#allocation90_spill] sm:$0xff] }
 0x443   : > { %v3352_v27 = vadd.f32 %v3351_v60, %v3350_v36  ;;  %v1668_v43 = vadd.f32 %v6936_v20, %v6935_v46  ;;  %v3015_v60 = vpop.f32.mrf.mxu1  ;;  %v2741_v33 = vpop.f32.mrf.mxu0 }
 0x444   : > { %v2773_v59 = vadd.f32 %v2729_v5, %v2496_v24  ;;  %4222 = vmatmul.msk.f32.gmra.mxu2 %vm310_vm0, %v3114_v41  ;;  %v6933_v5 = vld [vmem:[#allocation89_spill] sm:$0xff] }
 0x445   : > { %v1667_v56 = vadd.f32 %v6933_v5, %v6932_v55 }
 0x446   : > { %v3050_v45 = vadd.f32 %v3006_v22, %v2773_v59 }
 0x447   : > { %v3266_v40 = vpop.f32.mrf.mxu2  ;;  %v1944_v63 = vadd.f32 %v6934_v34, %v1667_v56 }
 0x448   : > { %v3083_v31 = vadd.f32 %v6011_v32, %v3050_v45  ;;  %v6336_v6 = vadd.f32 %v3266_v40, %v6235_v62 }
 0x449   : > { %v2455_v35 = vpop.f32.mrf.mxu3  ;;  %v2221_v41 = vadd.f32 %v6199_v13, %v1944_v63  ;;  %v6939_v13 = vld [vmem:[#allocation91_spill] sm:$0xff] }
 0x44a   : > { %v3115_v10 = vmax.f32 %v3083_v31, 0.0  ;;  %v3353_v18 = vsel %vm3335_vm1, %v6336_v6, 0.0  ;;  %v2497_v54 = vadd.f32 %v2455_v35, %v2219_v17  ;;  %v1669_v31 = vadd.f32 %v6939_v13, %v6938_v53 }
 0x44b   : > { %v3354_v2 = vadd.f32 %v3353_v18, %v3352_v27 }
 0x44c   : > { %v2774_v19 = vadd.f32 %v2732_v44, %v2497_v54  ;;  %4223 = vmatmul.msk.f32.gmra.mxu2 %vm310_vm0, %v3115_v10 }
 0x44e   : > { %v3051_v57 = vadd.f32 %v3009_v38, %v2774_v19  ;;  %v1945_v38 = vadd.f32 %v6937_v48, %v1668_v43 }
 0x44f   : > { %v3269_v0 = vpop.f32.mrf.mxu2 }
 0x450   : > { %v3084_v16 = vadd.f32 %v6011_v32, %v3051_v57  ;;  %v6347_v26 = vadd.f32 %v3269_v0, %v6235_v62  ;;  %v2222_v10 = vadd.f32 %v6213_v49, %v1945_v38 }
 0x451   : > { %v2458_v52 = vpop.f32.mrf.mxu3 }
 0x452   : > { %v3116_v22 = vmax.f32 %v3084_v16, 0.0  ;;  %v3355_v36 = vsel %vm3335_vm1, %v6347_v26, 0.0  ;;  %v2498_v39 = vadd.f32 %v2458_v52, %v2220_v50  ;;  %v2744_v52 = vpop.f32.mrf.mxu0 }
 0x453   : > { %v3356_v9 = vadd.f32 %v3355_v36, %v3354_v2  ;;  %v3018_v2 = vpop.f32.mrf.mxu1 }
 0x454   : > { %v2775_v4 = vadd.f32 %v2735_v21, %v2498_v39  ;;  %4224 = vmatmul.msk.f32.gmra.mxu2 %vm310_vm0, %v3116_v22 }
 0x456   : > { %v3052_v30 = vadd.f32 %v3012_v14, %v2775_v4  ;;  %v6940_v14 = vld [vmem:[#allocation103_spill] sm:$0xff] }
 0x457   : > { %v3272_v29 = vpop.f32.mrf.mxu2  ;;  %v1946_v0 = vadd.f32 %v6940_v14, %v1669_v31 }
 0x458   : > { %v3085_v1 = vadd.f32 %v6011_v32, %v3052_v30  ;;  %v6359_v27 = vadd.f32 %v3272_v29, %v6235_v62 }
 0x459   : > { %v2461_v24 = vpop.f32.mrf.mxu3  ;;  %v2223_v16 = vadd.f32 %v6222_v11, %v1946_v0 }
 0x45a   : > { %v3117_v44 = vmax.f32 %v3085_v1, 0.0  ;;  %v2499_v59 = vadd.f32 %v2461_v24, %v2221_v41  ;;  %v3357_v45 = vsel %vm3335_vm1, %v6359_v27, 0.0 }
 0x45b   : > { %v3358_v18 = vadd.f32 %v3357_v45, %v3356_v9  ;;  %v3021_v4 = vpop.f32.mrf.mxu1 }
 0x45c   : > { %v2776_v28 = vadd.f32 %v2738_v51, %v2499_v59  ;;  %4225 = vmatmul.msk.f32.gmra.mxu2 %vm310_vm0, %v3117_v44 }
 0x45e   : > { %v3053_v40 = vadd.f32 %v3015_v60, %v2776_v28 }
 0x45f   : > { %v3275_v61 = vpop.f32.mrf.mxu2 }
 0x460   : > { %v3086_v17 = vadd.f32 %v6011_v32, %v3053_v40  ;;  %v6369_v35 = vadd.f32 %v3275_v61, %v6235_v62 }
 0x461   : > { %v2464_v54 = vpop.f32.mrf.mxu3 }
 0x462   : > { %v3118_v19 = vmax.f32 %v3086_v17, 0.0  ;;  %v3359_v37 = vsel %vm3335_vm1, %v6369_v35, 0.0  ;;  %v2500_v15 = vadd.f32 %v2464_v54, %v2222_v10 }
 0x463   : > { %v3360_v21 = vadd.f32 %v3359_v37, %v3358_v18 }
 0x464   : > { %v2777_v57 = vadd.f32 %v2741_v33, %v2500_v15  ;;  %4226 = vmatmul.msk.f32.gmra.mxu2 %vm310_vm0, %v3118_v19 }
 0x466   : > { %v3054_v55 = vadd.f32 %v3018_v2, %v2777_v57 }
 0x467   : > { %v3278_v5 = vpop.f32.mrf.mxu2 }
 0x468   : > { %v3087_v56 = vadd.f32 %v6011_v32, %v3054_v55  ;;  %v6378_v49 = vadd.f32 %v3278_v5, %v6235_v62 }
 0x469   : > { %v2467_v50 = vpop.f32.mrf.mxu3 }
 0x46a   : > { %v3119_v22 = vmax.f32 %v3087_v56, 0.0  ;;  %v3361_v36 = vsel %vm3335_vm1, %v6378_v49, 0.0  ;;  %v2501_v39 = vadd.f32 %v2467_v50, %v2223_v16 }
 0x46b   : > { %v3362_v9 = vadd.f32 %v3361_v36, %v3360_v21 }
 0x46c   : > { %v2778_v34 = vadd.f32 %v2744_v52, %v2501_v39  ;;  %4227 = vmatmul.msk.f32.gmra.mxu2 %vm310_vm0, %v3119_v22 }
 0x46e   : > { %v3055_v63 = vadd.f32 %v3021_v4, %v2778_v34 }
 0x46f   : > { %v3281_v30 = vpop.f32.mrf.mxu2 }
 0x470   : > { %v3088_v51 = vadd.f32 %v6011_v32, %v3055_v63  ;;  %v6386_v46 = vadd.f32 %v3281_v30, %v6235_v62 }
 0x472   : > { %v3120_v29 = vmax.f32 %v3088_v51, 0.0  ;;  %v3363_v11 = vsel %vm3335_vm1, %v6386_v46, 0.0 }
 0x473   : > { %v3364_v1 = vadd.f32 %v3363_v11, %v3362_v9 }
 0x474   : > { %4228 = vmatmul.msk.f32.gmra.mxu2 %vm310_vm0, %v3120_v29 }
 0x477   : > { %v3284_v20 = vpop.f32.mrf.mxu2 }
 0x478   : > { %v6392_v43 = vadd.f32 %v3284_v20, %v6235_v62 }
 0x47a   : > { %v3365_v41 = vsel %vm3335_vm1, %v6392_v43, 0.0 }
 0x47b   : > { %v3366_v60 = vadd.f32 %v3365_v41, %v3364_v1  ;;  %v4415_v41 = vmov 256.0  }
 0x47c   : > { %4305 = vrcp.f32 %v4415_v41  ;;  %v6942_v41 = vld [vmem:[#allocation9_spill] sm:$0xff] }
 0x47f   : > { %v3287_v24 = vpop.f32.mrf.mxu2 }
 0x480   : > { %v6397_v44 = vadd.f32 %v3287_v24, %v6235_v62 }
 0x482   : > { %v3367_v28 = vsel %vm3335_vm1, %v6397_v44, 0.0 }
 0x483   : > { %v3368_v38 = vadd.f32 %v3367_v28, %v3366_v60 }
 0x487   : > { %v3290_v32 = vpop.f32.mrf.mxu2 }
 0x488   : > { %v6400_v59 = vadd.f32 %v3290_v32, %v6235_v62 }
 0x48a   : > { %v3369_v48 = vsel %vm3335_vm1, %v6400_v59, 0.0 }
 0x48b   : > { %v3370_v61 = vadd.f32 %v3369_v48, %v3368_v38 }
 0x48f   : > { %v3293_v45 = vpop.f32.mrf.mxu2 }
 0x490   : > { %v6407_v40 = vadd.f32 %v3293_v45, %v6235_v62 }
 0x492   : > { %v3371_v33 = vsel %vm3335_vm1, %v6407_v40, 0.0 }
 0x493   : > { %v3372_v53 = vadd.f32 %v3371_v33, %v3370_v61 }
 0x497   : > { %v3296_v13 = vpop.f32.mrf.mxu2 }
 0x498   : > { %v6412_v15 = vadd.f32 %v3296_v13, %v6235_v62 }
 0x49a   : > { %v3373_v14 = vsel %vm3335_vm1, %v6412_v15, 0.0 }
 0x49b   : > { %v3374_v56 = vadd.f32 %v3373_v14, %v3372_v53  ;;  %v4306_v53 = vpop.eup %4305 }
 0x49c   : > { %vm3410_vm2 = vweird.f32 %v4306_v53 }
 0x49f   : > { %v3299_v31 = vpop.f32.mrf.mxu2 }
 0x4a0   : > { %v6415_v21 = vadd.f32 %v3299_v31, %v6235_v62 }
 0x4a2   : > { %v3375_v55 = vsel %vm3335_vm1, %v6415_v21, 0.0 }
 0x4a3   : > { %v3376_v52 = vadd.f32 %v3375_v55, %v3374_v56 }
 0x4a7   : > { %v3302_v17 = vpop.f32.mrf.mxu2 }
 0x4a8   : > { %v6420_v0 = vadd.f32 %v3302_v17, %v6235_v62 }
 0x4aa   : > { %v3377_v16 = vsel %vm3335_vm1, %v6420_v0, 0.0 }
 0x4ab   : > { %v3378_v39 = vadd.f32 %v3377_v16, %v3376_v52 }
 0x4af   : > { %v3305_v10 = vpop.f32.mrf.mxu2 }
 0x4b0   : > { %v6425_v5 = vadd.f32 %v3305_v10, %v6235_v62 }
 0x4b2   : > { %v3379_v22 = vsel %vm3335_vm1, %v6425_v5, 0.0 }
 0x4b3   : > { %v3380_v63 = vadd.f32 %v3379_v22, %v3378_v39 }
 0x4b7   : > { %v3308_v18 = vpop.f32.mrf.mxu2 }
 0x4b8   : > { %v6430_v50 = vadd.f32 %v3308_v18, %v6235_v62  ;;  %v3406_v18 = vmul.f32 256.0, %v4306_v53 }
 0x4ba   : > { %v3381_v4 = vsel %vm3335_vm1, %v6430_v50, 0.0  ;;  %v3407_v14 = vsub.f32 1.0, %v3406_v18 }
 0x4bb   : > { %v3382_v29 = vadd.f32 %v3381_v4, %v3380_v63 }
 0x4bc   : > { %v3408_v16 = vmul.f32 %v4306_v53, %v3407_v14  ;;  %v6952_v14 = vld [vmem:[#allocation19_spill] sm:$0xff] }
 0x4be   : > { %v3409_v39 = vadd.f32 %v4306_v53, %v3408_v16  ;;  %v6954_v16 = vld [vmem:[#allocation34_spill] sm:$0xff] }
 0x4bf   : > { %v3311_v54 = vpop.f32.mrf.mxu2 }
 0x4c0   : > { %v6435_v36 = vadd.f32 %v3311_v54, %v6235_v62  ;;  %v3411_v63 = vsel %vm3410_vm2, %v4306_v53, %v3409_v39  ;;  %v4416_v53 = vmov 0  }
 0x4c1   : > { %4303 = vset.pattern.permute.xlu2 %v4416_v53  ;;  %4304 = vset.pattern.permute.xlu0 %v4416_v53  ;;  %v4312_v53 = vld [vmem:[%s6719_s4] sm:$0xf] }
 0x4c2   : > { %v3383_v30 = vsel %vm3335_vm1, %v6435_v36, 0.0 }
 0x4c3   : > { %v3384_v1 = vadd.f32 %v3383_v30, %v3382_v29 }
 0x4c7   : > { %v3314_v2 = vpop.f32.mrf.mxu2 }
 0x4c8   : > { %v6440_v34 = vadd.f32 %v3314_v2, %v6235_v62 }
 0x4ca   : > { %v3385_v11 = vsel %vm3335_vm1, %v6440_v34, 0.0 }
 0x4cb   : > { %v3386_v32 = vadd.f32 %v3385_v11, %v3384_v1 }
 0x4cf   : > { %v3317_v19 = vpop.f32.mrf.mxu2 }
 0x4d0   : > { %v6445_v51 = vadd.f32 %v3317_v19, %v6235_v62 }
 0x4d2   : > { %v3387_v60 = vsel %vm3335_vm1, %v6445_v51, 0.0 }
 0x4d3   : > { %v3388_v45 = vadd.f32 %v3387_v60, %v3386_v32  ;;  %v6943_v60 = vld [vmem:[#allocation10_spill] sm:$0xff]  ;;  %v6944_v32 = vld [vmem:[#allocation16_spill] sm:$0xff] }
 0x4d7   : > { %v3320_v37 = vpop.f32.mrf.mxu2 }
 0x4d8   : > { %v6450_v20 = vadd.f32 %v3320_v37, %v6235_v62 }
 0x4da   : > { %v3389_v48 = vsel %vm3335_vm1, %v6450_v20, 0.0 }
 0x4db   : > { %v3390_v13 = vadd.f32 %v3389_v48, %v3388_v45  ;;  %v6946_v48 = vld [vmem:[#allocation22_spill] sm:$0xff]  ;;  %v6947_v45 = vld [vmem:[#allocation20_spill] sm:$0xff] }
 0x4df   : > { %v3323_v57 = vpop.f32.mrf.mxu2 }
 0x4e0   : > { %v6455_v24 = vadd.f32 %v3323_v57, %v6235_v62 }
 0x4e2   : > { %v3391_v61 = vsel %vm3335_vm1, %v6455_v24, 0.0 }
 0x4e3   : > { %v3392_v17 = vadd.f32 %v3391_v61, %v3390_v13  ;;  %v6948_v61 = vld [vmem:[#allocation25_spill] sm:$0xff]  ;;  %v3446_v13 = vpop.permute.xlu0 %3445 }
 0x4e7   : > { %v3326_v9 = vpop.f32.mrf.mxu2 }
 0x4e8   : > { %v6460_v38 = vadd.f32 %v3326_v9, %v6235_v62 }
 0x4ea   : > { %v3393_v31 = vsel %vm3335_vm1, %v6460_v38, 0.0 }
 0x4eb   : > { %v3394_v54 = vadd.f32 %v3393_v31, %v3392_v17  ;;  %v6494_v31 = vpop.permute.xlu0 %3463  ;;  %v3574_v17 = vld [vmem:[%s6720_s5 + $0x8] sm:$0xf] }
 0x4ef   : > { %v3329_v28 = vpop.f32.mrf.mxu2 }
 0x4f0   : > { %v6465_v33 = vadd.f32 %v3329_v28, %v6235_v62  ;;  %v6945_v28 = vld [vmem:[#allocation18_spill] sm:$0xff] }
 0x4f2   : > { %v3395_v10 = vsel %vm3335_vm1, %v6465_v33, 0.0 }
 0x4f3   : > { %v3396_v37 = vadd.f32 %v3395_v10, %v3394_v54 }
 0x4f7   : > { %v3332_v2 = vpop.f32.mrf.mxu2 }
 0x4f8   : > { %v6472_v19 = vadd.f32 %v3332_v2, %v6235_v62  ;;  %v3573_v62 = vld [vmem:[%s6720_s5] sm:$0xff]  ;;  %v6949_v2 = vld [vmem:[#allocation14_spill] sm:$0xff] }
 0x4fa   : > { %6941 = vst [vmem:[#allocation12_spill] sm:$0xff] %v6472_v19  ;;  %v3397_v57 = vsel %vm3335_vm1, %v6472_v19, 0.0 }
 0x4fb   : > { %v3398_v55 = vadd.f32 %v3397_v57, %v3396_v37  ;;  %v6950_v37 = vld [vmem:[#allocation17_spill] sm:$0xff] }
 0x4fc   : > { %v6951_v57 = vld [vmem:[#allocation21_spill] sm:$0xff] }
 0x4fd   : > { %v3399_v56 = vrot.slane %v3398_v55, 4 }
 0x4ff   : > { %v3400_v52 = vadd.f32 %v3399_v56, %v3398_v55  ;;  %v6953_v55 = vld [vmem:[#allocation23_spill] sm:$0xff]  ;;  %v3452_v56 = vpop.permute.xlu2 %3451 }
 0x501   : > { %v3401_v22 = vrot.slane %v3400_v52, 2 }
 0x503   : > { %v3402_v9 = vadd.f32 %v3401_v22, %v3400_v52 }
 0x505   : > { %v3403_v4 = vrot.slane %v3402_v9, 1 }
 0x507   : > { %v3404_v30 = vadd.f32 %v3403_v4, %v3402_v9  ;;  %v3454_v52 = vpop.permute.xlu2 %3453  ;;  %v3448_v4 = vpop.permute.xlu1 %3447 }
 0x509   : > { %v3412_v29 = vmul.f32 %v3411_v63, %v3404_v30  ;;  %v3588_v63 = vrot.slane %v3573_v62, 4 }
 0x50b   : > { %v3575_v11 = vmul.f32 %v3573_v62, %v3412_v29 }
 0x50d   : > { %v3577_v1 = vsel %vm3576_vm3, %v3575_v11, 0.0 }
 0x50e   : > { %3578 = vadd.xlane.f32.xlu0 %v3577_v1 }
 0x50f   : > { %v3458_v22 = vpop.permute.xlu2 %3457 }
 0x517   : > { %v3462_v39 = vpop.permute.xlu2 %3461 }
 0x51f   : > { %v3472_v9 = vpop.permute.xlu2 %3471 }
 0x522   : > { %3467 = vrot.lane.b32.xlu0 %v6942_v41, %s4414_s17 }
 0x52a   : > { %3473 = vrot.lane.b32.xlu0 %v6943_v60, %s4414_s17  ;;  %v3450_v60 = vpop.permute.xlu1 %3449 }
 0x532   : > { %3479 = vrot.lane.b32.xlu0 %v6944_v32, %s4414_s17 }
 0x53a   : > { %3485 = vrot.lane.b32.xlu0 %v6945_v28, %s4414_s17 }
 0x542   : > { %3491 = vrot.lane.b32.xlu0 %v6946_v48, %s4414_s17 }
 0x54a   : > { %3497 = vrot.lane.b32.xlu0 %v6947_v45, %s4414_s17 }
 0x552   : > { %3503 = vrot.lane.b32.xlu0 %v6948_v61, %s4414_s17  ;;  %v3456_v61 = vpop.permute.xlu1 %3455 }
 0x581   : > { %v3579_v10 = vpop.xlane.xlu0 %3578 }
 0x582   : > { %v3580_v18 = vadd.f32 %v3579_v10, %v3574_v17 }
 0x584   : > { %v3581_v54 = vmax.f32 %v3580_v18, 0.0 }
 0x586   : > { %3584 = vperm.xlu2 %4303, %v3581_v54   ;;  %v3460_v54 = vpop.permute.xlu1 %3459 }
 0x58e   : > { %3477 = vrot.lane.b32.xlu2 %v6949_v2, %s4414_s17 }
 0x594   : > { %v3468_v62 = vpop.permute.xlu0 %3467 }
 0x596   : > { %3483 = vrot.lane.b32.xlu2 %v6950_v37, %s4414_s17 }
 0x59e   : > { %3489 = vrot.lane.b32.xlu2 %v6951_v57, %s4414_s17  ;;  %v3466_v57 = vpop.permute.xlu1 %3465 }
 0x5a6   : > { %3495 = vrot.lane.b32.xlu2 %v6952_v14, %s4414_s17  ;;  %v3474_v14 = vpop.permute.xlu0 %3473 }
 0x5ae   : > { %3501 = vrot.lane.b32.xlu2 %v6953_v55, %s4414_s17 }
 0x5b6   : > { %3507 = vrot.lane.b32.xlu2 %v6954_v16, %s4414_s17  ;;  %s4363_s17 = scalar_lea.hbm %s6721_s6, 256 }
 0x5b7   : > { %p4365_p1 = scmp.lt.s32.totalorder %s4363_s17, %s4359_s13 }
 0x5b9   : > { %p4366_p3 = por %p4365_p1, %p4364_p0 }
 0x5bb   : > { %p4367_p4 = pnand %p4366_p3, %p4362_p13 }
 0x5e0   : > { %v3585_v30 = vpop.permute.xlu2 %3584 }
 0x5e1   : > { %v3590_v29 = vmul.f32 %v3588_v63, %v3585_v30  ;;  %v3470_v30 = vpop.permute.xlu1 %3469 }
 0x5e3   : > { %v3591_v11 = vsel %vm3576_vm3, %v3590_v29, 0.0 }
 0x5e4   : > { %v3592_v1 = vrot.slane %v3591_v11, 4 }
 0x5e6   : > { %v3593_v41 = vadd.f32 %v3592_v1, %v3591_v11  ;;  %v3480_v11 = vpop.permute.xlu0 %3479 }
 0x5e8   : > { %v3594_v32 = vrot.slane %v3593_v41, 2  ;;  %v3478_v55 = vpop.permute.xlu2 %3477 }
 0x5ea   : > { %v3595_v28 = vadd.f32 %v3594_v32, %v3593_v41 }
 0x5ec   : > { %v3596_v48 = vrot.slane %v3595_v28, 1 }
 0x5ee   : > { %v3597_v45 = vadd.f32 %v3596_v48, %v3595_v28  ;;  %v3541_v28 = vadd.f32 %v3446_v13, %v6240_v42  ;;  %v3542_v48 = vadd.f32 %v3448_v4, %v6246_v7  ;;  %v3476_v7 = vpop.permute.xlu1 %3475  ;;  %v3550_v13 = vadd.f32 %v6494_v31, %v6336_v6 }
 0x5f0   : > { %v3598_v17 = vadd.f32 %v4312_v53, %v3597_v45  ;;  %v3543_v45 = vadd.f32 %v3450_v60, %v6259_v58  ;;  %v3484_v42 = vpop.permute.xlu2 %3483  ;;  %v3549_v58 = vadd.f32 %v3462_v39, %v6325_v25  ;;  %v3558_v25 = vadd.f32 %v3480_v11, %v6400_v59 }
 0x5f1   : > { %v3557_v39 = vadd.f32 %v3478_v55, %v6397_v44 }
 0x5f2   : > { %v3599_v10 = vsub.f32 0.0, %v3598_v17  ;;  %v3544_v17 = vadd.f32 %v3452_v56, %v6270_v23  ;;  %v3551_v23 = vadd.f32 %v3466_v57, %v6347_v26  ;;  %v3554_v56 = vadd.f32 %v3472_v9, %v6378_v49 }
 0x5f4   : > { %v3600_v18 = vmul.f32 1.442695, %v3599_v10  ;;  %v3545_v10 = vadd.f32 %v3454_v52, %v6281_v12 }
 0x5f6   : > { %4307 = vpow2.f32 %v3600_v18  ;;  %v3546_v18 = vadd.f32 %v3456_v61, %v6292_v47  ;;  %v3553_v47 = vadd.f32 %v3470_v30, %v6369_v35  ;;  %v3482_v57 = vpop.permute.xlu1 %3481 }
 0x5f7   : > { %v3559_v11 = vadd.f32 %v3482_v57, %v6407_v40 }
 0x5f8   : > { %v3490_v55 = vpop.permute.xlu2 %3489 }
 0x5fc   : > { %v4308_v2 = vpop.eup %4307 }
 0x5fd   : > { %v3602_v37 = vadd.f32 1.0, %v4308_v2 }
 0x5ff   : > { %4309 = vrcp.f32 %v3602_v37  ;;  %v3614_v1 = vand.u32 2147483648, %v3602_v37  ;;  %v3612_v32 = vand.u32 2147483647, %v3602_v37  ;;  %vm3608_vm5 = vweird.f32 %v3602_v37 }
 0x601   : > { %v3615_v2 = vor.u32 1.1754944e-38, %v3614_v1  ;;  %vm3613_vm7 = vcmp.eq.f32.partialorder %v3612_v32, 8.507059e+37  ;;  %v3560_v1 = vadd.f32 %v3484_v42, %v6412_v15 }
 0x605   : > { %v4310_v16 = vpop.eup %4309 }
 0x606   : > { %v3604_v63 = vmul.f32 %v4310_v16, %v3602_v37  ;;  %vm3609_vm4 = vweird.f32 %v4310_v16 }
 0x607   : > { %vm3610_vm6 = vmor %vm3608_vm5, %vm3609_vm4 }
 0x608   : > { %v3605_v29 = vsub.f32 1.0, %v3604_v63  ;;  %v3547_v63 = vadd.f32 %v3458_v22, %v6303_v8  ;;  %v3556_v8 = vadd.f32 %v3476_v7, %v6392_v43  ;;  %v3555_v22 = vadd.f32 %v3474_v14, %v6386_v46  ;;  %v3486_v43 = vpop.permute.xlu0 %3485 }
 0x60a   : > { %v3606_v41 = vmul.f32 %v4310_v16, %v3605_v29  ;;  %v3548_v29 = vadd.f32 %v3460_v54, %v6314_v3  ;;  %v3552_v3 = vadd.f32 %v3468_v62, %v6359_v27 }
 0x60c   : > { %v3607_v53 = vadd.f32 %v4310_v16, %v3606_v41  ;;  %v3561_v41 = vadd.f32 %v3486_v43, %v6415_v21 }
 0x60e   : > { %v3611_v19 = vsel %vm3610_vm6, %v4310_v16, %v3607_v53 }
 0x60f   : > { %v3616_v12 = vsel %vm3613_vm7, %v3615_v2, %v3611_v19  ;;  %v3563_v2 = vadd.f32 %v3490_v55, %v6425_v5 }
 0x610   : > { %v6530_v52 = vperm.slane %v3616_v12, 3 }
 0x612   : > { %v6537_v6 = vadd.f32 %v6530_v52, %v3541_v28  ;;  %v6540_v26 = vadd.f32 %v6530_v52, %v3542_v48  ;;  %v6543_v35 = vadd.f32 %v6530_v52, %v3543_v45  ;;  %v6546_v49 = vadd.f32 %v6530_v52, %v3544_v17  ;;  %v3492_v28 = vpop.permute.xlu0 %3491  ;;  %v3488_v17 = vpop.permute.xlu1 %3487 }
 0x613   : > { %v6549_v27 = vadd.f32 %v6530_v52, %v3545_v10  ;;  %v6552_v46 = vadd.f32 %v6530_v52, %v3546_v18  ;;  %v6555_v44 = vadd.f32 %v6530_v52, %v3547_v63  ;;  %v6558_v59 = vadd.f32 %v6530_v52, %v3548_v29  ;;  %v3496_v18 = vpop.permute.xlu2 %3495 }
 0x614   : > { %v6561_v19 = vadd.f32 %v6530_v52, %v3549_v58  ;;  %v6564_v31 = vadd.f32 %v6530_v52, %v3550_v13  ;;  %v6567_v9 = vadd.f32 %v6530_v52, %v3551_v23  ;;  %v6570_v4 = vadd.f32 %v6530_v52, %v3552_v3 }
 0x615   : > { %v6573_v60 = vadd.f32 %v6530_v52, %v3553_v47  ;;  %v6576_v61 = vadd.f32 %v6530_v52, %v3554_v56  ;;  %v6579_v62 = vadd.f32 %v6530_v52, %v3555_v22  ;;  %v6582_v54 = vadd.f32 %v6530_v52, %v3556_v8 }
 0x616   : > { %v3636_v37 = vadd.f32 %v6530_v52, %v3558_v25  ;;  %v3635_v14 = vadd.f32 %v6530_v52, %v3557_v39  ;;  %v3637_v32 = vadd.f32 %v6530_v52, %v3559_v11  ;;  %v3638_v48 = vadd.f32 %v6530_v52, %v3560_v1 }
 0x617   : > { %v3639_v45 = vadd.f32 %v6530_v52, %v3561_v41  ;;  %v3562_v40 = vadd.f32 %v3488_v17, %v6420_v0  ;;  %v3564_v63 = vadd.f32 %v3492_v28, %v6430_v50  ;;  %v3641_v29 = vadd.f32 %v6530_v52, %v3563_v2 }
 0x618   : > { %v3667_v16 = vmax.f32 %v3635_v14, 0.0  ;;  %v3668_v30 = vmax.f32 %v3636_v37, 0.0  ;;  %v3669_v53 = vmax.f32 %v3637_v32, 0.0  ;;  %v3670_v15 = vmax.f32 %v3638_v48, 0.0 }
 0x619   : > { %v3671_v10 = vmax.f32 %v3639_v45, 0.0  ;;  %v3640_v21 = vadd.f32 %v6530_v52, %v3562_v40  ;;  %v3642_v42 = vadd.f32 %v6530_v52, %v3564_v63  ;;  %v3673_v23 = vmax.f32 %v3641_v29, 0.0 }
 0x61a   : > { %3699 = vrot.lane.b32.xlu0 %v3667_v16, %s4417_s14  ;;  %3701 = vrot.lane.b32.xlu1 %v3668_v30, %s4417_s14  ;;  %v3494_v7 = vpop.permute.xlu1 %3493  ;;  %v3498_v58 = vpop.permute.xlu0 %3497  ;;  %v3566_v47 = vadd.f32 %v3496_v18, %v6440_v34  ;;  %v3652_v2 = vmax.f32 %v6540_v26, 0.0  ;;  %v3655_v26 = vmax.f32 %v6549_v27, 0.0  ;;  %v3658_v27 = vmax.f32 %v6558_v59, 0.0 }
 0x61b   : > { %3703 = vrot.lane.b32.xlu2 %v3669_v53, %s4417_s14  ;;  %v3672_v0 = vmax.f32 %v3640_v21, 0.0  ;;  %v3565_v13 = vadd.f32 %v3494_v7, %v6435_v36  ;;  %v3674_v12 = vmax.f32 %v3642_v42, 0.0  ;;  %v3567_v50 = vadd.f32 %v3498_v58, %v6445_v51  ;;  %v3502_v56 = vpop.permute.xlu2 %3501 }
 0x61c   : > { %v3644_v8 = vadd.f32 %v6530_v52, %v3566_v47  ;;  %v3569_v51 = vadd.f32 %v3502_v56, %v6455_v24  ;;  %v6955_v24 = vld [vmem:[#allocation12_spill] sm:$0xff]  ;;  %v3651_v21 = vmax.f32 %v6537_v6, 0.0  ;;  %v3654_v6 = vmax.f32 %v6546_v49, 0.0 }
 0x61d   : > { %v3643_v5 = vadd.f32 %v6530_v52, %v3565_v13  ;;  %v3645_v3 = vadd.f32 %v6530_v52, %v3567_v50  ;;  %v3657_v49 = vmax.f32 %v6555_v44, 0.0 }
 0x61e   : > { %v3676_v43 = vmax.f32 %v3644_v8, 0.0  ;;  %v3647_v14 = vadd.f32 %v6530_v52, %v3569_v51 }
 0x61f   : > { %v3675_v36 = vmax.f32 %v3643_v5, 0.0  ;;  %v3677_v34 = vmax.f32 %v3645_v3, 0.0 }
 0x620   : > { %v3679_v1 = vmax.f32 %v3647_v14, 0.0 }
 0x622   : > { %3705 = vrot.lane.b32.xlu0 %v3670_v15, %s4417_s14  ;;  %3707 = vrot.lane.b32.xlu1 %v3671_v10, %s4417_s14  ;;  %v3500_v22 = vpop.permute.xlu1 %3499  ;;  %v3504_v39 = vpop.permute.xlu0 %3503 }
 0x623   : > { %3709 = vrot.lane.b32.xlu2 %v3672_v0, %s4417_s14  ;;  %v3568_v25 = vadd.f32 %v3500_v22, %v6450_v20  ;;  %v3570_v57 = vadd.f32 %v3504_v39, %v6460_v38  ;;  %v3508_v20 = vpop.permute.xlu2 %3507  ;;  %v3663_v39 = vmax.f32 %v6573_v60, 0.0  ;;  %v3666_v60 = vmax.f32 %v6582_v54, 0.0 }
 0x624   : > { %v3572_v41 = vadd.f32 %v3508_v20, %v6955_v24 }
 0x625   : > { %v3646_v37 = vadd.f32 %v6530_v52, %v3568_v25  ;;  %v3648_v55 = vadd.f32 %v6530_v52, %v3570_v57 }
 0x626   : > { %v3650_v28 = vadd.f32 %v6530_v52, %v3572_v41 }
 0x627   : > { %v3678_v16 = vmax.f32 %v3646_v37, 0.0  ;;  %v3680_v32 = vmax.f32 %v3648_v55, 0.0 }
 0x628   : > { %v3682_v45 = vmax.f32 %v3650_v28, 0.0 }
 0x62a   : > { %3711 = vrot.lane.b32.xlu0 %v3673_v23, %s4417_s14  ;;  %3713 = vrot.lane.b32.xlu1 %v3674_v12, %s4417_s14  ;;  %v3506_v30 = vpop.permute.xlu1 %3505 }
 0x62b   : > { %3715 = vrot.lane.b32.xlu2 %v3675_v36, %s4417_s14  ;;  %v3571_v11 = vadd.f32 %v3506_v30, %v6465_v33  ;;  %v3653_v33 = vmax.f32 %v6543_v35, 0.0  ;;  %v3659_v35 = vmax.f32 %v6561_v19, 0.0  ;;  %v3662_v19 = vmax.f32 %v6570_v4, 0.0 }
 0x62c   : > { %v3665_v4 = vmax.f32 %v6579_v62, 0.0  ;;  %v3660_v62 = vmax.f32 %v6564_v31, 0.0  ;;  %v3661_v36 = vmax.f32 %v6567_v9, 0.0 }
 0x62d   : > { %v3649_v38 = vadd.f32 %v6530_v52, %v3571_v11  ;;  %v3656_v52 = vmax.f32 %v6552_v46, 0.0 }
 0x62f   : > { %v3681_v48 = vmax.f32 %v3649_v38, 0.0 }
 0x632   : > { %3717 = vrot.lane.b32.xlu0 %v3676_v43, %s4417_s14  ;;  %3719 = vrot.lane.b32.xlu1 %v3677_v34, %s4417_s14  ;;  %v3664_v43 = vmax.f32 %v6576_v61, 0.0 }
 0x633   : > { %3721 = vrot.lane.b32.xlu2 %v3678_v16, %s4417_s14 }
 0x63a   : > { %3723 = vrot.lane.b32.xlu0 %v3679_v1, %s4417_s14  ;;  %3725 = vrot.lane.b32.xlu1 %v3680_v32, %s4417_s14 }
 0x63b   : > { %3727 = vrot.lane.b32.xlu2 %v3681_v48, %s4417_s14 }
 0x642   : > { %3729 = vrot.lane.b32.xlu0 %v3682_v45, %s4417_s14 }
 0x675   : > { %v3704_v53 = vpop.permute.xlu2 %3703 }
 0x676   : > { %v3749_v17 = vsel %vm3335_vm1, %v3653_v33, %v3704_v53 }
 0x677   : > { %3765 = vst [vmem:[%s6633_s11 + $0x10] sm:$0xff] %v3749_v17 }
 0x67d   : > { %v3710_v40 = vpop.permute.xlu2 %3709 }
 0x67e   : > { %v3752_v15 = vsel %vm3335_vm1, %v3656_v52, %v3710_v40 }
 0x67f   : > { %3768 = vst [vmem:[%s6633_s11 + $0x28] sm:$0xff] %v3752_v15 }
 0x685   : > { %v3716_v10 = vpop.permute.xlu2 %3715 }
 0x686   : > { %v3755_v18 = vsel %vm3335_vm1, %v3659_v35, %v3716_v10 }
 0x687   : > { %3771 = vst [vmem:[%s6633_s11 + $0x40] sm:$0xff] %v3755_v18 }
 0x68c   : > { %v3700_v63 = vpop.permute.xlu0 %3699  ;;  %v3702_v29 = vpop.permute.xlu1 %3701 }
 0x68d   : > { %v3747_v46 = vsel %vm3335_vm1, %v3651_v21, %v3700_v63  ;;  %v3748_v42 = vsel %vm3335_vm1, %v3652_v2, %v3702_v29  ;;  %v3722_v0 = vpop.permute.xlu2 %3721 }
 0x68e   : > { %3763 = vst [vmem:[%s6633_s11] sm:$0xff] %v3747_v46  ;;  %v3758_v7 = vsel %vm3335_vm1, %v3662_v19, %v3722_v0 }
 0x68f   : > { %3764 = vst [vmem:[%s6633_s11 + $0x8] sm:$0xff] %v3748_v42 }
 0x690   : > { %3774 = vst [vmem:[%s6633_s11 + $0x58] sm:$0xff] %v3758_v7 }
 0x694   : > { %v3706_v58 = vpop.permute.xlu0 %3705  ;;  %v3708_v13 = vpop.permute.xlu1 %3707 }
 0x695   : > { %v3750_v23 = vsel %vm3335_vm1, %v3654_v6, %v3706_v58  ;;  %v3751_v12 = vsel %vm3335_vm1, %v3655_v26, %v3708_v13  ;;  %v3728_v5 = vpop.permute.xlu2 %3727 }
 0x696   : > { %3766 = vst [vmem:[%s6633_s11 + $0x18] sm:$0xff] %v3750_v23  ;;  %v3761_v47 = vsel %vm3335_vm1, %v3665_v4, %v3728_v5 }
 0x697   : > { %3767 = vst [vmem:[%s6633_s11 + $0x20] sm:$0xff] %v3751_v12 }
 0x698   : > { %3777 = vst [vmem:[%s6633_s11 + $0x70] sm:$0xff] %v3761_v47 }
 0x69c   : > { %v3712_v50 = vpop.permute.xlu0 %3711  ;;  %v3714_v56 = vpop.permute.xlu1 %3713 }
 0x69d   : > { %v3753_v8 = vsel %vm3335_vm1, %v3657_v49, %v3712_v50  ;;  %v3754_v3 = vsel %vm3335_vm1, %v3658_v27, %v3714_v56 }
 0x69e   : > { %3769 = vst [vmem:[%s6633_s11 + $0x30] sm:$0xff] %v3753_v8 }
 0x69f   : > { %3770 = vst [vmem:[%s6633_s11 + $0x38] sm:$0xff] %v3754_v3 }
 0x6a4   : > { %v3718_v22 = vpop.permute.xlu0 %3717  ;;  %v3720_v44 = vpop.permute.xlu1 %3719 }
 0x6a5   : > { %v3756_v25 = vsel %vm3335_vm1, %v3660_v62, %v3718_v22  ;;  %v3757_v59 = vsel %vm3335_vm1, %v3661_v36, %v3720_v44 }
 0x6a6   : > { %3772 = vst [vmem:[%s6633_s11 + $0x48] sm:$0xff] %v3756_v25 }
 0x6a7   : > { %3773 = vst [vmem:[%s6633_s11 + $0x50] sm:$0xff] %v3757_v59 }
 0x6ac   : > { %v3724_v31 = vpop.permute.xlu0 %3723  ;;  %v3726_v34 = vpop.permute.xlu1 %3725 }
 0x6ad   : > { %v3759_v9 = vsel %vm3335_vm1, %v3663_v39, %v3724_v31  ;;  %v3760_v37 = vsel %vm3335_vm1, %v3664_v43, %v3726_v34 }
 0x6ae   : > { %3775 = vst [vmem:[%s6633_s11 + $0x60] sm:$0xff] %v3759_v9 }
 0x6af   : > { %3776 = vst [vmem:[%s6633_s11 + $0x68] sm:$0xff] %v3760_v37 }
 0x6b4   : > { %v3730_v61 = vpop.permute.xlu0 %3729 }
 0x6b5   : > { %v3762_v51 = vsel %vm3335_vm1, %v3666_v60, %v3730_v61 }
 0x6b6   : > { %3778 = vst [vmem:[%s6633_s11 + $0x78] sm:$0xff] %v3762_v51 }
 0x6b7   : > { %4370 = shalt.err (!%p4367_p4)
}
 0x6b8   : > { %s4418_s18 = smov 128   ;;  %s4419_s11 = smov 8  }
 0x6b9   : > { %4250 = dma.vmem_to_hbm [thread:$0]  (%p4505_p11), %s3793_s25, 2048, %s3795_s19, %s3780_s20, %s4418_s18, %s4418_s18, %s4419_s11  }
 0x6ba PF: > { %s3809_s16 = sand.u32 1, %s4397_s21   ;;  %p6956_p7 = scmp.ge.s32.totalorder %s4409_s24, 2 }
 0x6bb   : > { %s3810_s12 = scalar_lea.sflag [#allocation5], %s3809_s16 }
 0x6bc   : > { %p4257_p5 = pnand %p6956_p7, %p4509_p12 }
 0x6be   : > { %p4258_p8 = pneg %p4257_p5 }
 0x6c0   : > { %4392 = dma.done.wait (%p4258_p8), %s3810_s12, 2048  }
 0x6c1   : > { %4394 = vsyncadd (%p4258_p8), %s3810_s12, 4294965248  ;;  %p19_p10 = scmp.ge.s32.totalorder %s4480_s27, 4   ;;  %s6957_s21 = smov %s4401_s22 }
 0x6c2   : > { %s6958_s22 = smov %s4405_s23  ;;  %s6959_s23 = smov %s4492_s30 }
 0x6c3   : > { %s6960_s24 = smov %s4480_s27  ;;  %21 = sbr.rel (!%p19_p10) target bundleno = 5 (0x5), region = 92 }
 0x6c8   :  { %3816 = vsyncpa [#allocation4], 1 }
 0x6c9   :  { %3818 = vsyncpa [#allocation4 + $0x1], 1 }
 0x6ca   :  { %3819 = vsyncpa [#allocation5], 1 }
 0x6cb   :  { %3821 = vsyncpa [#allocation5 + $0x1], 1 }

</bundles_post_ra>
